<compile_context>
chip_gen: v5e
topology: v5e:2x2
jax: 0.10.0
libtpu: 0.0.40
codegen_flags: <defaults>
</compile_context>

<pallas_src>
import functools

import jax
import jax.numpy as jnp
from jax.experimental import pallas as pl
from jax.experimental.pallas import tpu as pltpu

LANE = 128                       # TPU lane width; every channel axis is padded to this
IN_CH = 3
STEM_C = 8
# (expand_ratio, stride, out_channels) per block  -- scaled-down b3-like config
BLOCKS = [
    (1, 1, 8),                   # depthwise-separable block (no expansion), residual
    (4, 2, 16),                  # MBConv, stride 2
    (4, 1, 16),                  # MBConv, residual
]
HEAD_C = 64
NUM_CLASSES = 1000
NCLS_PAD = 1024                  # classifier padded to a lane-dense multiple of 128

_CPARAMS = pltpu.CompilerParams(
    dimension_semantics=("parallel",),            # batch-block axis -> both TCs on v7x
    vmem_limit_bytes=48 * 1024 * 1024,            # > v5e 16 MiB default, < v7x 64 MiB phys
)


# ------------------------- packed-parameter layout (static) -------------------------

def _build_layout():
    """Static row/slot layout for the packed weight stack and f32 vector table."""
    mat_idx, vec_idx = {}, {}
    nm = nv = 0

    def m(name):
        nonlocal nm
        mat_idx[name] = nm
        nm += 1

    def v(name, rows=1):
        nonlocal nv
        vec_idx[name] = nv
        nv += rows

    m("stem_w"); v("stem_s"); v("stem_b")
    for bi, (expand, _stride, _cout) in enumerate(BLOCKS):
        p = f"b{bi}_"
        if expand != 1:
            m(p + "exp"); v(p + "bn1_s"); v(p + "bn1_b")
        v(p + "dw", rows=9)
        v(p + "bn2_s"); v(p + "bn2_b")
        m(p + "se_r"); v(p + "se_rb")
        m(p + "se_e"); v(p + "se_eb")
        m(p + "pw"); v(p + "bn3_s"); v(p + "bn3_b")
    m("head_w"); v("head_s"); v("head_b")
    return mat_idx, vec_idx, nm, nv


_MAT_IDX, _VEC_IDX, _N_MAT, _N_VEC = _build_layout()
_N_VEC_PAD = ((_N_VEC + 7) // 8) * 8


def _silu(x):
    return x * jax.nn.sigmoid(x)


# ------------------------------ fused whole-network kernel ------------------------------

def _net_kernel(x_ref, wstack_ref, vecs_ref, clsw_ref, clsb_ref, o_ref, *hpad_refs,
                bblk, stem_hw):
    """One grid step == one batch block.  Stem matmul -> MBConv stages -> head + GAP +
    classifier; every intermediate stays in VMEM/vregs."""
    C = LANE
    vecs = vecs_ref[...]                                   # (NVEC, 128) f32, loaded once

    def vrow(name, off=0):
        return vecs[_VEC_IDX[name] + off]                  # (128,) f32

    def mm(a2d, name):                                     # MXU matmul vs packed 128x128 weight
        return jnp.dot(a2d.astype(jnp.bfloat16), wstack_ref[_MAT_IDX[name]],
                       preferred_element_type=jnp.float32)

    # ---- stem: im2col'd 3x3 s2 conv == ONE lane-dense matmul + folded BN + SiLU ----
    H, W = stem_hw
    h = mm(x_ref[...].reshape(bblk * H * W, C), "stem_w")
    h = _silu(h * vrow("stem_s") + vrow("stem_b"))
    x4 = h.reshape(bblk, H, W, C)

    # ---- MBConv stages (expand 1x1 -> dw3x3 -> SE -> project 1x1 [-> residual]) ----
    cin = STEM_C
    for bi, (expand, stride, cout) in enumerate(BLOCKS):
        p = f"b{bi}_"
        hpad_ref = hpad_refs[bi]
        Hn = (H - 1) // stride + 1
        Wn = (W - 1) // stride + 1
        x2 = x4.reshape(bblk * H * W, C)

        if expand != 1:
            h = _silu(mm(x2, p + "exp") * vrow(p + "bn1_s") + vrow(p + "bn1_b"))
        else:
            h = x2
        h4 = h.reshape(bblk, H, W, C)

        # Zero-padded VMEM staging buffer: only the 1-pixel halo is cleared (the interior
        # is fully overwritten each step).  Every element read by the taps below is
        # written here, so this is also safe under "parallel" grid semantics.
        hpad_ref[:, 0:1, :, :] = jnp.zeros((bblk, 1, W + 2, C), jnp.float32)
        hpad_ref[:, H + 1:H + 2, :, :] = jnp.zeros((bblk, 1, W + 2, C), jnp.float32)
        hpad_ref[:, 1:H + 1, 0:1, :] = jnp.zeros((bblk, H, 1, C), jnp.float32)
        hpad_ref[:, 1:H + 1, W + 1:W + 2, :] = jnp.zeros((bblk, H, 1, C), jnp.float32)
        hpad_ref[:, 1:H + 1, 1:W + 1, :] = h4

        # depthwise 3x3 conv (VPU) + folded BN + SiLU; dw weight rows hoisted out of loop
        wd = vecs[_VEC_IDX[p + "dw"]:_VEC_IDX[p + "dw"] + 9]            # (9, 128)
        acc = jnp.zeros((bblk, Hn, Wn, C), jnp.float32)
        if stride == 1:
            for ki in range(3):
                for kj in range(3):
                    tap = hpad_ref[:, ki:ki + Hn, kj:kj + Wn, :]
                    acc = acc + tap * wd[ki * 3 + kj]
        else:
            # stride 2: deinterleave into the 4 spatial parities once (4 strided reads),
            # then every tap is a plain contiguous slice of those values.
            Hh, Wh = Hn + 1, Wn + 1
            par = [[hpad_ref[:, pl.ds(pr, Hh, 2), pl.ds(pc, Wh, 2), :]
                    for pc in range(2)] for pr in range(2)]
            for ki in range(3):
                for kj in range(3):
                    src = par[ki % 2][kj % 2]
                    ro, co = ki // 2, kj // 2
                    tap = src[:, ro:ro + Hn, co:co + Wn, :]
                    acc = acc + tap * wd[ki * 3 + kj]
        dwv = _silu(acc * vrow(p + "bn2_s") + vrow(p + "bn2_b"))
        dw2 = dwv.reshape(bblk, Hn * Wn, C)

        # squeeze-excite: per-sample GAP -> fc + SiLU -> fc + sigmoid -> channel gate
        pooled = jnp.mean(dw2, axis=1)                                   # (bblk, C)
        se = _silu(mm(pooled, p + "se_r") + vrow(p + "se_rb"))
        gate = jax.nn.sigmoid(mm(se, p + "se_e") + vrow(p + "se_eb"))    # (bblk, C)
        gated = dw2 * gate[:, None, :]

        # project 1x1 conv + folded BN (+ residual)
        y = mm(gated.reshape(bblk * Hn * Wn, C), p + "pw")
        y = y * vrow(p + "bn3_s") + vrow(p + "bn3_b")
        if stride == 1 and cin == cout:
            y = y + x2
        x4 = y.reshape(bblk, Hn, Wn, C)
        H, W, cin = Hn, Wn, cout

    # ---- head 1x1 conv + BN + SiLU -> global average pool -> classifier ----
    h = _silu(mm(x4.reshape(bblk * H * W, C), "head_w") * vrow("head_s") + vrow("head_b"))
    pooled = jnp.mean(h.reshape(bblk, H * W, C), axis=1)                 # (bblk, C)
    logits = jnp.dot(pooled.astype(jnp.bfloat16), clsw_ref[...],
                     preferred_element_type=jnp.float32) + clsb_ref[...]
    o_ref[...] = logits.reshape(bblk, 1, NCLS_PAD)


# ------------------------------ wrapper / pallas_call ------------------------------

def _pick_bblk(batch):
    # largest batch block (<= 8) that still leaves >= 2 grid steps (keeps both v7x
    # TensorCores busy); fall back to per-sample steps.
    for cand in (8, 4, 2):
        if batch % cand == 0 and batch // cand >= 2:
            return cand
    return 1


def efficientnetv2_forward(params, x_nchw):
    """Encode x (NCHW, like the PyTorch module) into a vector of size n_outputs=1000."""
    x = jnp.transpose(x_nchw, (0, 2, 3, 1)).astype(jnp.float32)          # NCHW -> NHWC
    B, Hin, Win, _ = x.shape
    Ho = (Hin - 1) // 2 + 1                                              # stem 3x3 s2 p1
    Wo = (Win - 1) // 2 + 1

    # Wrapper-side im2col for the stem: (B, Ho, Wo, 9*Cin) padded once to 128 lanes, so
    # the kernel's stem is a single lane-dense matmul (no 3->128 per-pixel padding in HBM).
    xp = jnp.pad(x, ((0, 0), (1, 1), (1, 1), (0, 0)))
    taps = [xp[:, ki:ki + 2 * Ho:2, kj:kj + 2 * Wo:2, :]
            for ki in range(3) for kj in range(3)]
    xcol = jnp.concatenate(taps, axis=-1)                                # (B, Ho, Wo, 9*Cin)
    xcol = jnp.pad(xcol, ((0, 0), (0, 0), (0, 0), (0, LANE - xcol.shape[-1])))
    xcol = xcol.reshape(B, Ho * Wo, LANE)

    bblk = _pick_bblk(B)

    # per-stage VMEM scratch for the zero-padded depthwise-conv input
    scratch = []
    H, W = Ho, Wo
    for (_e, stride, _c) in BLOCKS:
        scratch.append(pltpu.VMEM((bblk, H + 2, W + 2, LANE), jnp.float32))
        H = (H - 1) // stride + 1
        W = (W - 1) // stride + 1

    kern = functools.partial(_net_kernel, bblk=bblk, stem_hw=(Ho, Wo))
    out = pl.pallas_call(
        kern,
        out_shape=jax.ShapeDtypeStruct((B, 1, NCLS_PAD), jnp.float32),
        grid=(B // bblk,),
        in_specs=[
            pl.BlockSpec((bblk, Ho * Wo, LANE), lambda b: (b, 0, 0)),
            pl.BlockSpec(params["wstack"].shape, lambda b: (0, 0, 0)),
            pl.BlockSpec(params["vecs"].shape, lambda b: (0, 0)),
            pl.BlockSpec(params["cls_w"].shape, lambda b: (0, 0)),
            pl.BlockSpec(params["cls_b"].shape, lambda b: (0, 0)),
        ],
        out_specs=pl.BlockSpec((bblk, 1, NCLS_PAD), lambda b: (b, 0, 0)),
        scratch_shapes=scratch,
        compiler_params=_CPARAMS,
    )(xcol, params["wstack"], params["vecs"], params["cls_w"], params["cls_b"])
    return out[:, 0, :NUM_CLASSES]                                       # (B, 1000)


# --------------------------- deterministic packed parameters ---------------------------

def _init(key, shape, scale=0.1):
    return scale * jax.random.normal(key, shape, jnp.float32)


def init_params(key):
    keys = iter(jax.random.split(key, 256))
    nxt = lambda: next(keys)

    mats = [None] * _N_MAT
    vrows = [jnp.zeros((LANE,), jnp.float32)] * _N_VEC_PAD

    def put_mat(name, w):                              # zero-pad to (128, 128)
        mats[_MAT_IDX[name]] = jnp.pad(w, ((0, LANE - w.shape[0]), (0, LANE - w.shape[1])))

    def put_vec(name, v, off=0):                       # zero-pad to (128,)
        vrows[_VEC_IDX[name] + off] = jnp.pad(v, (0, LANE - v.shape[0]))

    # stem 3x3 s2 conv folded into an im2col matmul weight (9*Cin, STEM_C); eval-mode BN
    put_mat("stem_w", _init(nxt(), (9 * IN_CH, STEM_C)))
    put_vec("stem_s", 1.0 + _init(nxt(), (STEM_C,)))
    put_vec("stem_b", _init(nxt(), (STEM_C,)))

    cin = STEM_C
    for bi, (expand, _stride, cout) in enumerate(BLOCKS):
        p = f"b{bi}_"
        cmid = cin * expand
        cred = max(1, cin // 4)                        # SE reduction: 0.25 of block input
        if expand != 1:
            put_mat(p + "exp", _init(nxt(), (cin, cmid)))
            put_vec(p + "bn1_s", 1.0 + _init(nxt(), (cmid,)))
            put_vec(p + "bn1_b", _init(nxt(), (cmid,)))
        wdw = _init(nxt(), (9, cmid))
        for t in range(9):
            put_vec(p + "dw", wdw[t], off=t)
        put_vec(p + "bn2_s", 1.0 + _init(nxt(), (cmid,)))
        put_vec(p + "bn2_b", _init(nxt(), (cmid,)))
        put_mat(p + "se_r", _init(nxt(), (cmid, cred)))
        put_vec(p + "se_rb", _init(nxt(), (cred,)))
        put_mat(p + "se_e", _init(nxt(), (cred, cmid)))
        put_vec(p + "se_eb", _init(nxt(), (cmid,)))
        put_mat(p + "pw", _init(nxt(), (cmid, cout)))
        put_vec(p + "bn3_s", 1.0 + _init(nxt(), (cout,)))
        put_vec(p + "bn3_b", _init(nxt(), (cout,)))
        cin = cout

    put_mat("head_w", _init(nxt(), (cin, HEAD_C)))
    put_vec("head_s", 1.0 + _init(nxt(), (HEAD_C,)))
    put_vec("head_b", _init(nxt(), (HEAD_C,)))

    wc = _init(nxt(), (HEAD_C, NUM_CLASSES))
    return {
        "wstack": jnp.stack(mats).astype(jnp.bfloat16),                   # (N_MAT, 128, 128)
        "vecs": jnp.stack(vrows),                                         # (N_VEC_PAD, 128) f32
        "cls_w": jnp.pad(wc, ((0, LANE - HEAD_C),
                              (0, NCLS_PAD - NUM_CLASSES))).astype(jnp.bfloat16),
        "cls_b": jnp.pad(_init(nxt(), (NUM_CLASSES,)),
                         (0, NCLS_PAD - NUM_CLASSES)).reshape(1, NCLS_PAD),
    }


# ------------------------------ pure-JAX reference (for checking) ------------------------------

def _reference_forward(params, x_nchw):
    V = params["vecs"]

    def mm(a, name):
        return jnp.dot(a.astype(jnp.bfloat16), params["wstack"][_MAT_IDX[name]],
                       preferred_element_type=jnp.float32)

    x = jnp.transpose(x_nchw, (0, 2, 3, 1)).astype(jnp.float32)
    B, Hin, Win, _ = x.shape
    Ho, Wo = (Hin - 1) // 2 + 1, (Win - 1) // 2 + 1
    xp = jnp.pad(x, ((0, 0), (1, 1), (1, 1), (0, 0)))
    taps = [xp[:, ki:ki + 2 * Ho:2, kj:kj + 2 * Wo:2, :] for ki in range(3) for kj in range(3)]
    xcol = jnp.concatenate(taps, axis=-1)
    xcol = jnp.pad(xcol, ((0, 0), (0, 0), (0, 0), (0, LANE - xcol.shape[-1])))

    h = _silu(mm(xcol.reshape(B * Ho * Wo, LANE), "stem_w")
              * V[_VEC_IDX["stem_s"]] + V[_VEC_IDX["stem_b"]])
    h = h.reshape(B, Ho, Wo, LANE)

    Hc, Wc, cin = Ho, Wo, STEM_C
    for bi, (expand, stride, cout) in enumerate(BLOCKS):
        p = f"b{bi}_"
        x2 = h.reshape(B * Hc * Wc, LANE)
        if expand != 1:
            e = _silu(mm(x2, p + "exp") * V[_VEC_IDX[p + "bn1_s"]] + V[_VEC_IDX[p + "bn1_b"]])
        else:
            e = x2
        ep = jnp.pad(e.reshape(B, Hc, Wc, LANE), ((0, 0), (1, 1), (1, 1), (0, 0)))
        Hn, Wn = (Hc - 1) // stride + 1, (Wc - 1) // stride + 1
        acc = jnp.zeros((B, Hn, Wn, LANE), jnp.float32)
        for ki in range(3):
            for kj in range(3):
                tap = ep[:, ki:ki + (Hn - 1) * stride + 1:stride,
                         kj:kj + (Wn - 1) * stride + 1:stride, :]
                acc = acc + tap * V[_VEC_IDX[p + "dw"] + ki * 3 + kj]
        d = _silu(acc * V[_VEC_IDX[p + "bn2_s"]] + V[_VEC_IDX[p + "bn2_b"]])
        d2 = d.reshape(B, Hn * Wn, LANE)
        pooled = jnp.mean(d2, axis=1)
        se = _silu(mm(pooled, p + "se_r") + V[_VEC_IDX[p + "se_rb"]])
        gate = jax.nn.sigmoid(mm(se, p + "se_e") + V[_VEC_IDX[p + "se_eb"]])
        g = d2 * gate[:, None, :]
        y = mm(g.reshape(B * Hn * Wn, LANE), p + "pw")
        y = y * V[_VEC_IDX[p + "bn3_s"]] + V[_VEC_IDX[p + "bn3_b"]]
        if stride == 1 and cin == cout:
            y = y + x2
        h = y.reshape(B, Hn, Wn, LANE)
        Hc, Wc, cin = Hn, Wn, cout

    hh = _silu(mm(h.reshape(B * Hc * Wc, LANE), "head_w")
               * V[_VEC_IDX["head_s"]] + V[_VEC_IDX["head_b"]])
    pooled = jnp.mean(hh.reshape(B, Hc * Wc, LANE), axis=1)
    logits = jnp.dot(pooled.astype(jnp.bfloat16), params["cls_w"],
                     preferred_element_type=jnp.float32) + params["cls_b"]
    return logits[:, :NUM_CLASSES]


if __name__ == "__main__":
    key = jax.random.PRNGKey(0)
    pkey, xkey = jax.random.split(key)
    params = init_params(pkey)
    x = jax.random.normal(xkey, (2, IN_CH, 16, 16), jnp.float32)         # NCHW like PyTorch
    fwd = jax.jit(efficientnetv2_forward)
    out = jax.block_until_ready(fwd(params, x))
    assert out.shape == (2, NUM_CLASSES), out.shape
    assert out.dtype == jnp.float32
    assert bool(jnp.all(jnp.isfinite(out)))
    ref = jax.block_until_ready(jax.jit(_reference_forward)(params, x))
    assert bool(jnp.allclose(out, ref, atol=5e-3, rtol=5e-3)), \
        float(jnp.max(jnp.abs(out - ref)))
    print("KERNEL_OK")
</pallas_src>

<mosaic_0001>
module attributes {stable_mosaic.version = 11 : i64} {
  func.func @_net_kernel(%arg0: i32, %arg1: memref<1x64x128xf32, #tpu.memory_space<vmem>>, %arg2: memref<13x128x128xbf16, #tpu.memory_space<vmem>>, %arg3: memref<56x128xf32, #tpu.memory_space<vmem>>, %arg4: memref<128x1024xbf16, #tpu.memory_space<vmem>>, %arg5: memref<1x1024xf32, #tpu.memory_space<vmem>>, %arg6: memref<1x1x1024xf32, #tpu.memory_space<vmem>>, %arg7: memref<1x10x10x128xf32, #tpu.memory_space<vmem>>, %arg8: memref<1x10x10x128xf32, #tpu.memory_space<vmem>>, %arg9: memref<1x6x6x128xf32, #tpu.memory_space<vmem>>) attributes {dimension_semantics = [#tpu.dimension_semantics<parallel>], iteration_bounds = array<i64: 2>, scalar_prefetch = 0 : i64, scratch_operands = 3 : i64, tpu.core_type = #tpu.core_type<tc>, window_params = [{transform_indices = @transform_0, window_bounds = array<i64: 1, 64, 128>}, {pipeline_mode = #tpu.pipeline_mode<synchronous>, transform_indices = @transform_1, window_bounds = array<i64: 13, 128, 128>}, {pipeline_mode = #tpu.pipeline_mode<synchronous>, transform_indices = @transform_2, window_bounds = array<i64: 56, 128>}, {pipeline_mode = #tpu.pipeline_mode<synchronous>, transform_indices = @transform_3, window_bounds = array<i64: 128, 1024>}, {pipeline_mode = #tpu.pipeline_mode<synchronous>, transform_indices = @transform_4, window_bounds = array<i64: 1, 1024>}, {transform_indices = @transform_5, window_bounds = array<i64: 1, 1, 1024>}]} {
    %c0 = arith.constant 0 : index
    %c0_0 = arith.constant 0 : index
    %0 = vector.load %arg3[%c0, %c0_0] : memref<56x128xf32, #tpu.memory_space<vmem>>, vector<56x128xf32>
    %c0_1 = arith.constant 0 : index
    %c0_2 = arith.constant 0 : index
    %c0_3 = arith.constant 0 : index
    %1 = vector.load %arg1[%c0_1, %c0_2, %c0_3] : memref<1x64x128xf32, #tpu.memory_space<vmem>>, vector<1x64x128xf32>
    %2 = vector.shape_cast %1 : vector<1x64x128xf32> to vector<64x128xf32>
    %3 = arith.truncf %2 : vector<64x128xf32> to vector<64x128xbf16>
    %c0_4 = arith.constant 0 : index
    %c0_5 = arith.constant 0 : index
    %c0_6 = arith.constant 0 : index
    %4 = vector.load %arg2[%c0_4, %c0_5, %c0_6] : memref<13x128x128xbf16, #tpu.memory_space<vmem>>, vector<1x128x128xbf16>
    %5 = vector.shape_cast %4 : vector<1x128x128xbf16> to vector<128x128xbf16>
    %cst = arith.constant dense<0.000000e+00> : vector<64x128xf32>
    %6 = tpu.matmul %3, %5, %cst {dimension_numbers = #tpu.dot_dimension_numbers<[1], [0], [0], [1], [0, 0, 1, 1], [], []>} : vector<64x128xbf16>, vector<128x128xbf16>, vector<64x128xf32> -> vector<64x128xf32>
    %7 = vector.extract_strided_slice %0 {offsets = [0, 0], sizes = [1, 128], strides = [1, 1]} : vector<56x128xf32> to vector<1x128xf32>
    %8 = vector.shape_cast %7 : vector<1x128xf32> to vector<128xf32>
    %9 = vector.shape_cast %8 : vector<128xf32> to vector<1x128xf32>
    %10 = vector.broadcast %9 : vector<1x128xf32> to vector<64x128xf32>
    %11 = arith.mulf %6, %10 : vector<64x128xf32>
    %12 = vector.extract_strided_slice %0 {offsets = [1, 0], sizes = [1, 128], strides = [1, 1]} : vector<56x128xf32> to vector<1x128xf32>
    %13 = vector.shape_cast %12 : vector<1x128xf32> to vector<128xf32>
    %14 = vector.shape_cast %13 : vector<128xf32> to vector<1x128xf32>
    %15 = vector.broadcast %14 : vector<1x128xf32> to vector<64x128xf32>
    %16 = arith.addf %11, %15 : vector<64x128xf32>
    %17 = arith.negf %16 : vector<64x128xf32>
    %18 = math.exp %17 : vector<64x128xf32>
    %cst_7 = arith.constant 1.000000e+00 : f32
    %19 = vector.broadcast %cst_7 : f32 to vector<64x128xf32>
    %20 = arith.addf %19, %18 : vector<64x128xf32>
    %21 = arith.divf %19, %20 : vector<64x128xf32>
    %22 = arith.mulf %16, %21 : vector<64x128xf32>
    %23 = vector.shape_cast %22 : vector<64x128xf32> to vector<1x8x8x128xf32>
    %24 = vector.shape_cast %23 : vector<1x8x8x128xf32> to vector<64x128xf32>
    %25 = vector.shape_cast %24 : vector<64x128xf32> to vector<1x8x8x128xf32>
    %cst_8 = arith.constant 0.000000e+00 : f32
    %26 = vector.broadcast %cst_8 : f32 to vector<1x1x10x128xf32>
    %c0_9 = arith.constant 0 : index
    %c0_10 = arith.constant 0 : index
    %c0_11 = arith.constant 0 : index
    %c0_12 = arith.constant 0 : index
    %27 = vector.load %arg7[%c0_9, %c0_10, %c0_11, %c0_12] : memref<1x10x10x128xf32, #tpu.memory_space<vmem>>, vector<1x1x10x128xf32>
    tpu.vector_store %arg7[%c0_9, %c0_10, %c0_11, %c0_12], %26 {strides = array<i32>} : memref<1x10x10x128xf32, #tpu.memory_space<vmem>>, vector<1x1x10x128xf32>,
    %cst_13 = arith.constant 0.000000e+00 : f32
    %28 = vector.broadcast %cst_13 : f32 to vector<1x1x10x128xf32>
    %c0_14 = arith.constant 0 : index
    %c9 = arith.constant 9 : index
    %c0_15 = arith.constant 0 : index
    %c0_16 = arith.constant 0 : index
    %29 = vector.load %arg7[%c0_14, %c9, %c0_15, %c0_16] : memref<1x10x10x128xf32, #tpu.memory_space<vmem>>, vector<1x1x10x128xf32>
    tpu.vector_store %arg7[%c0_14, %c9, %c0_15, %c0_16], %28 {strides = array<i32>} : memref<1x10x10x128xf32, #tpu.memory_space<vmem>>, vector<1x1x10x128xf32>,
    %cst_17 = arith.constant 0.000000e+00 : f32
    %30 = vector.broadcast %cst_17 : f32 to vector<1x8x1x128xf32>
    %c0_18 = arith.constant 0 : index
    %c1 = arith.constant 1 : index
    %c0_19 = arith.constant 0 : index
    %c0_20 = arith.constant 0 : index
    %31 = vector.load %arg7[%c0_18, %c1, %c0_19, %c0_20] : memref<1x10x10x128xf32, #tpu.memory_space<vmem>>, vector<1x8x1x128xf32>
    tpu.vector_store %arg7[%c0_18, %c1, %c0_19, %c0_20], %30 {strides = array<i32>} : memref<1x10x10x128xf32, #tpu.memory_space<vmem>>, vector<1x8x1x128xf32>,
    %cst_21 = arith.constant 0.000000e+00 : f32
    %32 = vector.broadcast %cst_21 : f32 to vector<1x8x1x128xf32>
    %c0_22 = arith.constant 0 : index
    %c1_23 = arith.constant 1 : index
    %c9_24 = arith.constant 9 : index
    %c0_25 = arith.constant 0 : index
    %33 = vector.load %arg7[%c0_22, %c1_23, %c9_24, %c0_25] : memref<1x10x10x128xf32, #tpu.memory_space<vmem>>, vector<1x8x1x128xf32>
    tpu.vector_store %arg7[%c0_22, %c1_23, %c9_24, %c0_25], %32 {strides = array<i32>} : memref<1x10x10x128xf32, #tpu.memory_space<vmem>>, vector<1x8x1x128xf32>,
    %c0_26 = arith.constant 0 : index
    %c1_27 = arith.constant 1 : index
    %c1_28 = arith.constant 1 : index
    %c0_29 = arith.constant 0 : index
    %34 = vector.load %arg7[%c0_26, %c1_27, %c1_28, %c0_29] : memref<1x10x10x128xf32, #tpu.memory_space<vmem>>, vector<1x8x8x128xf32>
    tpu.vector_store %arg7[%c0_26, %c1_27, %c1_28, %c0_29], %25 {strides = array<i32>} : memref<1x10x10x128xf32, #tpu.memory_space<vmem>>, vector<1x8x8x128xf32>,
    %35 = vector.extract_strided_slice %0 {offsets = [2, 0], sizes = [9, 128], strides = [1, 1]} : vector<56x128xf32> to vector<9x128xf32>
    %cst_30 = arith.constant 0.000000e+00 : f32
    %36 = vector.broadcast %cst_30 : f32 to vector<1x8x8x128xf32>
    %c0_31 = arith.constant 0 : index
    %c0_32 = arith.constant 0 : index
    %c0_33 = arith.constant 0 : index
    %c0_34 = arith.constant 0 : index
    %37 = vector.load %arg7[%c0_31, %c0_32, %c0_33, %c0_34] : memref<1x10x10x128xf32, #tpu.memory_space<vmem>>, vector<1x8x8x128xf32>
    %38 = vector.extract_strided_slice %35 {offsets = [0, 0], sizes = [1, 128], strides = [1, 1]} : vector<9x128xf32> to vector<1x128xf32>
    %39 = vector.shape_cast %38 : vector<1x128xf32> to vector<128xf32>
    %40 = vector.shape_cast %39 : vector<128xf32> to vector<1x1x1x128xf32>
    %41 = vector.broadcast %40 : vector<1x1x1x128xf32> to vector<1x8x8x128xf32>
    %42 = arith.mulf %37, %41 : vector<1x8x8x128xf32>
    %43 = arith.addf %36, %42 : vector<1x8x8x128xf32>
    %c0_35 = arith.constant 0 : index
    %c0_36 = arith.constant 0 : index
    %c1_37 = arith.constant 1 : index
    %c0_38 = arith.constant 0 : index
    %44 = vector.load %arg7[%c0_35, %c0_36, %c1_37, %c0_38] : memref<1x10x10x128xf32, #tpu.memory_space<vmem>>, vector<1x8x8x128xf32>
    %45 = vector.extract_strided_slice %35 {offsets = [1, 0], sizes = [1, 128], strides = [1, 1]} : vector<9x128xf32> to vector<1x128xf32>
    %46 = vector.shape_cast %45 : vector<1x128xf32> to vector<128xf32>
    %47 = vector.shape_cast %46 : vector<128xf32> to vector<1x1x1x128xf32>
    %48 = vector.broadcast %47 : vector<1x1x1x128xf32> to vector<1x8x8x128xf32>
    %49 = arith.mulf %44, %48 : vector<1x8x8x128xf32>
    %50 = arith.addf %43, %49 : vector<1x8x8x128xf32>
    %c0_39 = arith.constant 0 : index
    %c0_40 = arith.constant 0 : index
    %c2 = arith.constant 2 : index
    %c0_41 = arith.constant 0 : index
    %51 = vector.load %arg7[%c0_39, %c0_40, %c2, %c0_41] : memref<1x10x10x128xf32, #tpu.memory_space<vmem>>, vector<1x8x8x128xf32>
    %52 = vector.extract_strided_slice %35 {offsets = [2, 0], sizes = [1, 128], strides = [1, 1]} : vector<9x128xf32> to vector<1x128xf32>
    %53 = vector.shape_cast %52 : vector<1x128xf32> to vector<128xf32>
    %54 = vector.shape_cast %53 : vector<128xf32> to vector<1x1x1x128xf32>
    %55 = vector.broadcast %54 : vector<1x1x1x128xf32> to vector<1x8x8x128xf32>
    %56 = arith.mulf %51, %55 : vector<1x8x8x128xf32>
    %57 = arith.addf %50, %56 : vector<1x8x8x128xf32>
    %c0_42 = arith.constant 0 : index
    %c1_43 = arith.constant 1 : index
    %c0_44 = arith.constant 0 : index
    %c0_45 = arith.constant 0 : index
    %58 = vector.load %arg7[%c0_42, %c1_43, %c0_44, %c0_45] : memref<1x10x10x128xf32, #tpu.memory_space<vmem>>, vector<1x8x8x128xf32>
    %59 = vector.extract_strided_slice %35 {offsets = [3, 0], sizes = [1, 128], strides = [1, 1]} : vector<9x128xf32> to vector<1x128xf32>
    %60 = vector.shape_cast %59 : vector<1x128xf32> to vector<128xf32>
    %61 = vector.shape_cast %60 : vector<128xf32> to vector<1x1x1x128xf32>
    %62 = vector.broadcast %61 : vector<1x1x1x128xf32> to vector<1x8x8x128xf32>
    %63 = arith.mulf %58, %62 : vector<1x8x8x128xf32>
    %64 = arith.addf %57, %63 : vector<1x8x8x128xf32>
    %c0_46 = arith.constant 0 : index
    %c1_47 = arith.constant 1 : index
    %c1_48 = arith.constant 1 : index
    %c0_49 = arith.constant 0 : index
    %65 = vector.load %arg7[%c0_46, %c1_47, %c1_48, %c0_49] : memref<1x10x10x128xf32, #tpu.memory_space<vmem>>, vector<1x8x8x128xf32>
    %66 = vector.extract_strided_slice %35 {offsets = [4, 0], sizes = [1, 128], strides = [1, 1]} : vector<9x128xf32> to vector<1x128xf32>
    %67 = vector.shape_cast %66 : vector<1x128xf32> to vector<128xf32>
    %68 = vector.shape_cast %67 : vector<128xf32> to vector<1x1x1x128xf32>
    %69 = vector.broadcast %68 : vector<1x1x1x128xf32> to vector<1x8x8x128xf32>
    %70 = arith.mulf %65, %69 : vector<1x8x8x128xf32>
    %71 = arith.addf %64, %70 : vector<1x8x8x128xf32>
    %c0_50 = arith.constant 0 : index
    %c1_51 = arith.constant 1 : index
    %c2_52 = arith.constant 2 : index
    %c0_53 = arith.constant 0 : index
    %72 = vector.load %arg7[%c0_50, %c1_51, %c2_52, %c0_53] : memref<1x10x10x128xf32, #tpu.memory_space<vmem>>, vector<1x8x8x128xf32>
    %73 = vector.extract_strided_slice %35 {offsets = [5, 0], sizes = [1, 128], strides = [1, 1]} : vector<9x128xf32> to vector<1x128xf32>
    %74 = vector.shape_cast %73 : vector<1x128xf32> to vector<128xf32>
    %75 = vector.shape_cast %74 : vector<128xf32> to vector<1x1x1x128xf32>
    %76 = vector.broadcast %75 : vector<1x1x1x128xf32> to vector<1x8x8x128xf32>
    %77 = arith.mulf %72, %76 : vector<1x8x8x128xf32>
    %78 = arith.addf %71, %77 : vector<1x8x8x128xf32>
    %c0_54 = arith.constant 0 : index
    %c2_55 = arith.constant 2 : index
    %c0_56 = arith.constant 0 : index
    %c0_57 = arith.constant 0 : index
    %79 = vector.load %arg7[%c0_54, %c2_55, %c0_56, %c0_57] : memref<1x10x10x128xf32, #tpu.memory_space<vmem>>, vector<1x8x8x128xf32>
    %80 = vector.extract_strided_slice %35 {offsets = [6, 0], sizes = [1, 128], strides = [1, 1]} : vector<9x128xf32> to vector<1x128xf32>
    %81 = vector.shape_cast %80 : vector<1x128xf32> to vector<128xf32>
    %82 = vector.shape_cast %81 : vector<128xf32> to vector<1x1x1x128xf32>
    %83 = vector.broadcast %82 : vector<1x1x1x128xf32> to vector<1x8x8x128xf32>
    %84 = arith.mulf %79, %83 : vector<1x8x8x128xf32>
    %85 = arith.addf %78, %84 : vector<1x8x8x128xf32>
    %c0_58 = arith.constant 0 : index
    %c2_59 = arith.constant 2 : index
    %c1_60 = arith.constant 1 : index
    %c0_61 = arith.constant 0 : index
    %86 = vector.load %arg7[%c0_58, %c2_59, %c1_60, %c0_61] : memref<1x10x10x128xf32, #tpu.memory_space<vmem>>, vector<1x8x8x128xf32>
    %87 = vector.extract_strided_slice %35 {offsets = [7, 0], sizes = [1, 128], strides = [1, 1]} : vector<9x128xf32> to vector<1x128xf32>
    %88 = vector.shape_cast %87 : vector<1x128xf32> to vector<128xf32>
    %89 = vector.shape_cast %88 : vector<128xf32> to vector<1x1x1x128xf32>
    %90 = vector.broadcast %89 : vector<1x1x1x128xf32> to vector<1x8x8x128xf32>
    %91 = arith.mulf %86, %90 : vector<1x8x8x128xf32>
    %92 = arith.addf %85, %91 : vector<1x8x8x128xf32>
    %c0_62 = arith.constant 0 : index
    %c2_63 = arith.constant 2 : index
    %c2_64 = arith.constant 2 : index
    %c0_65 = arith.constant 0 : index
    %93 = vector.load %arg7[%c0_62, %c2_63, %c2_64, %c0_65] : memref<1x10x10x128xf32, #tpu.memory_space<vmem>>, vector<1x8x8x128xf32>
    %94 = vector.extract_strided_slice %35 {offsets = [8, 0], sizes = [1, 128], strides = [1, 1]} : vector<9x128xf32> to vector<1x128xf32>
    %95 = vector.shape_cast %94 : vector<1x128xf32> to vector<128xf32>
    %96 = vector.shape_cast %95 : vector<128xf32> to vector<1x1x1x128xf32>
    %97 = vector.broadcast %96 : vector<1x1x1x128xf32> to vector<1x8x8x128xf32>
    %98 = arith.mulf %93, %97 : vector<1x8x8x128xf32>
    %99 = arith.addf %92, %98 : vector<1x8x8x128xf32>
    %100 = vector.extract_strided_slice %0 {offsets = [11, 0], sizes = [1, 128], strides = [1, 1]} : vector<56x128xf32> to vector<1x128xf32>
    %101 = vector.shape_cast %100 : vector<1x128xf32> to vector<128xf32>
    %102 = vector.shape_cast %101 : vector<128xf32> to vector<1x1x1x128xf32>
    %103 = vector.broadcast %102 : vector<1x1x1x128xf32> to vector<1x8x8x128xf32>
    %104 = arith.mulf %99, %103 : vector<1x8x8x128xf32>
    %105 = vector.extract_strided_slice %0 {offsets = [12, 0], sizes = [1, 128], strides = [1, 1]} : vector<56x128xf32> to vector<1x128xf32>
    %106 = vector.shape_cast %105 : vector<1x128xf32> to vector<128xf32>
    %107 = vector.shape_cast %106 : vector<128xf32> to vector<1x1x1x128xf32>
    %108 = vector.broadcast %107 : vector<1x1x1x128xf32> to vector<1x8x8x128xf32>
    %109 = arith.addf %104, %108 : vector<1x8x8x128xf32>
    %110 = arith.negf %109 : vector<1x8x8x128xf32>
    %111 = math.exp %110 : vector<1x8x8x128xf32>
    %cst_66 = arith.constant 1.000000e+00 : f32
    %112 = vector.broadcast %cst_66 : f32 to vector<1x8x8x128xf32>
    %113 = arith.addf %112, %111 : vector<1x8x8x128xf32>
    %114 = arith.divf %112, %113 : vector<1x8x8x128xf32>
    %115 = arith.mulf %109, %114 : vector<1x8x8x128xf32>
    %116 = vector.shape_cast %115 : vector<1x8x8x128xf32> to vector<1x64x128xf32>
    %cst_67 = arith.constant dense<0.000000e+00> : vector<1x128xf32>
    %117 = vector.multi_reduction <add>, %116, %cst_67 [1] : vector<1x64x128xf32> to vector<1x128xf32>
    %cst_68 = arith.constant 6.400000e+01 : f32
    %118 = vector.broadcast %cst_68 : f32 to vector<1x128xf32>
    %119 = arith.divf %117, %118 : vector<1x128xf32>
    %120 = arith.truncf %119 : vector<1x128xf32> to vector<1x128xbf16>
    %c1_69 = arith.constant 1 : index
    %c0_70 = arith.constant 0 : index
    %c0_71 = arith.constant 0 : index
    %121 = vector.load %arg2[%c1_69, %c0_70, %c0_71] : memref<13x128x128xbf16, #tpu.memory_space<vmem>>, vector<1x128x128xbf16>
    %122 = vector.shape_cast %121 : vector<1x128x128xbf16> to vector<128x128xbf16>
    %cst_72 = arith.constant dense<0.000000e+00> : vector<1x128xf32>
    %123 = tpu.matmul %120, %122, %cst_72 {dimension_numbers = #tpu.dot_dimension_numbers<[1], [0], [0], [1], [0, 0, 1, 1], [], []>} : vector<1x128xbf16>, vector<128x128xbf16>, vector<1x128xf32> -> vector<1x128xf32>
    %124 = vector.extract_strided_slice %0 {offsets = [13, 0], sizes = [1, 128], strides = [1, 1]} : vector<56x128xf32> to vector<1x128xf32>
    %125 = vector.shape_cast %124 : vector<1x128xf32> to vector<128xf32>
    %126 = vector.shape_cast %125 : vector<128xf32> to vector<1x128xf32>
    %127 = arith.addf %123, %126 : vector<1x128xf32>
    %128 = arith.negf %127 : vector<1x128xf32>
    %129 = math.exp %128 : vector<1x128xf32>
    %cst_73 = arith.constant 1.000000e+00 : f32
    %130 = vector.broadcast %cst_73 : f32 to vector<1x128xf32>
    %131 = arith.addf %130, %129 : vector<1x128xf32>
    %132 = arith.divf %130, %131 : vector<1x128xf32>
    %133 = arith.mulf %127, %132 : vector<1x128xf32>
    %134 = arith.truncf %133 : vector<1x128xf32> to vector<1x128xbf16>
    %c2_74 = arith.constant 2 : index
    %c0_75 = arith.constant 0 : index
    %c0_76 = arith.constant 0 : index
    %135 = vector.load %arg2[%c2_74, %c0_75, %c0_76] : memref<13x128x128xbf16, #tpu.memory_space<vmem>>, vector<1x128x128xbf16>
    %136 = vector.shape_cast %135 : vector<1x128x128xbf16> to vector<128x128xbf16>
    %cst_77 = arith.constant dense<0.000000e+00> : vector<1x128xf32>
    %137 = tpu.matmul %134, %136, %cst_77 {dimension_numbers = #tpu.dot_dimension_numbers<[1], [0], [0], [1], [0, 0, 1, 1], [], []>} : vector<1x128xbf16>, vector<128x128xbf16>, vector<1x128xf32> -> vector<1x128xf32>
    %138 = vector.extract_strided_slice %0 {offsets = [14, 0], sizes = [1, 128], strides = [1, 1]} : vector<56x128xf32> to vector<1x128xf32>
    %139 = vector.shape_cast %138 : vector<1x128xf32> to vector<128xf32>
    %140 = vector.shape_cast %139 : vector<128xf32> to vector<1x128xf32>
    %141 = arith.addf %137, %140 : vector<1x128xf32>
    %142 = arith.negf %141 : vector<1x128xf32>
    %143 = math.exp %142 : vector<1x128xf32>
    %cst_78 = arith.constant 1.000000e+00 : f32
    %144 = vector.broadcast %cst_78 : f32 to vector<1x128xf32>
    %145 = arith.addf %144, %143 : vector<1x128xf32>
    %146 = arith.divf %144, %145 : vector<1x128xf32>
    %147 = vector.shape_cast %146 : vector<1x128xf32> to vector<1x1x128xf32>
    %148 = vector.broadcast %147 : vector<1x1x128xf32> to vector<1x64x128xf32>
    %149 = arith.mulf %116, %148 : vector<1x64x128xf32>
    %150 = vector.shape_cast %149 : vector<1x64x128xf32> to vector<64x128xf32>
    %151 = arith.truncf %150 : vector<64x128xf32> to vector<64x128xbf16>
    %c3 = arith.constant 3 : index
    %c0_79 = arith.constant 0 : index
    %c0_80 = arith.constant 0 : index
    %152 = vector.load %arg2[%c3, %c0_79, %c0_80] : memref<13x128x128xbf16, #tpu.memory_space<vmem>>, vector<1x128x128xbf16>
    %153 = vector.shape_cast %152 : vector<1x128x128xbf16> to vector<128x128xbf16>
    %cst_81 = arith.constant dense<0.000000e+00> : vector<64x128xf32>
    %154 = tpu.matmul %151, %153, %cst_81 {dimension_numbers = #tpu.dot_dimension_numbers<[1], [0], [0], [1], [0, 0, 1, 1], [], []>} : vector<64x128xbf16>, vector<128x128xbf16>, vector<64x128xf32> -> vector<64x128xf32>
    %155 = vector.extract_strided_slice %0 {offsets = [15, 0], sizes = [1, 128], strides = [1, 1]} : vector<56x128xf32> to vector<1x128xf32>
    %156 = vector.shape_cast %155 : vector<1x128xf32> to vector<128xf32>
    %157 = vector.shape_cast %156 : vector<128xf32> to vector<1x128xf32>
    %158 = vector.broadcast %157 : vector<1x128xf32> to vector<64x128xf32>
    %159 = arith.mulf %154, %158 : vector<64x128xf32>
    %160 = vector.extract_strided_slice %0 {offsets = [16, 0], sizes = [1, 128], strides = [1, 1]} : vector<56x128xf32> to vector<1x128xf32>
    %161 = vector.shape_cast %160 : vector<1x128xf32> to vector<128xf32>
    %162 = vector.shape_cast %161 : vector<128xf32> to vector<1x128xf32>
    %163 = vector.broadcast %162 : vector<1x128xf32> to vector<64x128xf32>
    %164 = arith.addf %159, %163 : vector<64x128xf32>
    %165 = arith.addf %164, %24 : vector<64x128xf32>
    %166 = vector.shape_cast %165 : vector<64x128xf32> to vector<1x8x8x128xf32>
    %167 = vector.shape_cast %166 : vector<1x8x8x128xf32> to vector<64x128xf32>
    %168 = arith.truncf %167 : vector<64x128xf32> to vector<64x128xbf16>
    %c4 = arith.constant 4 : index
    %c0_82 = arith.constant 0 : index
    %c0_83 = arith.constant 0 : index
    %169 = vector.load %arg2[%c4, %c0_82, %c0_83] : memref<13x128x128xbf16, #tpu.memory_space<vmem>>, vector<1x128x128xbf16>
    %170 = vector.shape_cast %169 : vector<1x128x128xbf16> to vector<128x128xbf16>
    %cst_84 = arith.constant dense<0.000000e+00> : vector<64x128xf32>
    %171 = tpu.matmul %168, %170, %cst_84 {dimension_numbers = #tpu.dot_dimension_numbers<[1], [0], [0], [1], [0, 0, 1, 1], [], []>} : vector<64x128xbf16>, vector<128x128xbf16>, vector<64x128xf32> -> vector<64x128xf32>
    %172 = vector.extract_strided_slice %0 {offsets = [17, 0], sizes = [1, 128], strides = [1, 1]} : vector<56x128xf32> to vector<1x128xf32>
    %173 = vector.shape_cast %172 : vector<1x128xf32> to vector<128xf32>
    %174 = vector.shape_cast %173 : vector<128xf32> to vector<1x128xf32>
    %175 = vector.broadcast %174 : vector<1x128xf32> to vector<64x128xf32>
    %176 = arith.mulf %171, %175 : vector<64x128xf32>
    %177 = vector.extract_strided_slice %0 {offsets = [18, 0], sizes = [1, 128], strides = [1, 1]} : vector<56x128xf32> to vector<1x128xf32>
    %178 = vector.shape_cast %177 : vector<1x128xf32> to vector<128xf32>
    %179 = vector.shape_cast %178 : vector<128xf32> to vector<1x128xf32>
    %180 = vector.broadcast %179 : vector<1x128xf32> to vector<64x128xf32>
    %181 = arith.addf %176, %180 : vector<64x128xf32>
    %182 = arith.negf %181 : vector<64x128xf32>
    %183 = math.exp %182 : vector<64x128xf32>
    %cst_85 = arith.constant 1.000000e+00 : f32
    %184 = vector.broadcast %cst_85 : f32 to vector<64x128xf32>
    %185 = arith.addf %184, %183 : vector<64x128xf32>
    %186 = arith.divf %184, %185 : vector<64x128xf32>
    %187 = arith.mulf %181, %186 : vector<64x128xf32>
    %188 = vector.shape_cast %187 : vector<64x128xf32> to vector<1x8x8x128xf32>
    %cst_86 = arith.constant 0.000000e+00 : f32
    %189 = vector.broadcast %cst_86 : f32 to vector<1x1x10x128xf32>
    %c0_87 = arith.constant 0 : index
    %c0_88 = arith.constant 0 : index
    %c0_89 = arith.constant 0 : index
    %c0_90 = arith.constant 0 : index
    %190 = vector.load %arg8[%c0_87, %c0_88, %c0_89, %c0_90] : memref<1x10x10x128xf32, #tpu.memory_space<vmem>>, vector<1x1x10x128xf32>
    tpu.vector_store %arg8[%c0_87, %c0_88, %c0_89, %c0_90], %189 {strides = array<i32>} : memref<1x10x10x128xf32, #tpu.memory_space<vmem>>, vector<1x1x10x128xf32>,
    %cst_91 = arith.constant 0.000000e+00 : f32
    %191 = vector.broadcast %cst_91 : f32 to vector<1x1x10x128xf32>
    %c0_92 = arith.constant 0 : index
    %c9_93 = arith.constant 9 : index
    %c0_94 = arith.constant 0 : index
    %c0_95 = arith.constant 0 : index
    %192 = vector.load %arg8[%c0_92, %c9_93, %c0_94, %c0_95] : memref<1x10x10x128xf32, #tpu.memory_space<vmem>>, vector<1x1x10x128xf32>
    tpu.vector_store %arg8[%c0_92, %c9_93, %c0_94, %c0_95], %191 {strides = array<i32>} : memref<1x10x10x128xf32, #tpu.memory_space<vmem>>, vector<1x1x10x128xf32>,
    %cst_96 = arith.constant 0.000000e+00 : f32
    %193 = vector.broadcast %cst_96 : f32 to vector<1x8x1x128xf32>
    %c0_97 = arith.constant 0 : index
    %c1_98 = arith.constant 1 : index
    %c0_99 = arith.constant 0 : index
    %c0_100 = arith.constant 0 : index
    %194 = vector.load %arg8[%c0_97, %c1_98, %c0_99, %c0_100] : memref<1x10x10x128xf32, #tpu.memory_space<vmem>>, vector<1x8x1x128xf32>
    tpu.vector_store %arg8[%c0_97, %c1_98, %c0_99, %c0_100], %193 {strides = array<i32>} : memref<1x10x10x128xf32, #tpu.memory_space<vmem>>, vector<1x8x1x128xf32>,
    %cst_101 = arith.constant 0.000000e+00 : f32
    %195 = vector.broadcast %cst_101 : f32 to vector<1x8x1x128xf32>
    %c0_102 = arith.constant 0 : index
    %c1_103 = arith.constant 1 : index
    %c9_104 = arith.constant 9 : index
    %c0_105 = arith.constant 0 : index
    %196 = vector.load %arg8[%c0_102, %c1_103, %c9_104, %c0_105] : memref<1x10x10x128xf32, #tpu.memory_space<vmem>>, vector<1x8x1x128xf32>
    tpu.vector_store %arg8[%c0_102, %c1_103, %c9_104, %c0_105], %195 {strides = array<i32>} : memref<1x10x10x128xf32, #tpu.memory_space<vmem>>, vector<1x8x1x128xf32>,
    %c0_106 = arith.constant 0 : index
    %c1_107 = arith.constant 1 : index
    %c1_108 = arith.constant 1 : index
    %c0_109 = arith.constant 0 : index
    %197 = vector.load %arg8[%c0_106, %c1_107, %c1_108, %c0_109] : memref<1x10x10x128xf32, #tpu.memory_space<vmem>>, vector<1x8x8x128xf32>
    tpu.vector_store %arg8[%c0_106, %c1_107, %c1_108, %c0_109], %188 {strides = array<i32>} : memref<1x10x10x128xf32, #tpu.memory_space<vmem>>, vector<1x8x8x128xf32>,
    %198 = vector.extract_strided_slice %0 {offsets = [19, 0], sizes = [9, 128], strides = [1, 1]} : vector<56x128xf32> to vector<9x128xf32>
    %cst_110 = arith.constant 0.000000e+00 : f32
    %199 = vector.broadcast %cst_110 : f32 to vector<1x4x4x128xf32>
    %c0_111 = arith.constant 0 : index
    %c0_112 = arith.constant 0 : index
    %c0_113 = arith.constant 0 : index
    %c0_114 = arith.constant 0 : index
    %200 = tpu.strided_load %arg8[%c0_111, %c0_112, %c0_113, %c0_114] {strides = array<i32: 1, 2, 2, 1>} : memref<1x10x10x128xf32, #tpu.memory_space<vmem>>, vector<1x5x5x128xf32>
    %c0_115 = arith.constant 0 : index
    %c0_116 = arith.constant 0 : index
    %c1_117 = arith.constant 1 : index
    %c0_118 = arith.constant 0 : index
    %201 = tpu.strided_load %arg8[%c0_115, %c0_116, %c1_117, %c0_118] {strides = array<i32: 1, 2, 2, 1>} : memref<1x10x10x128xf32, #tpu.memory_space<vmem>>, vector<1x5x5x128xf32>
    %c0_119 = arith.constant 0 : index
    %c1_120 = arith.constant 1 : index
    %c0_121 = arith.constant 0 : index
    %c0_122 = arith.constant 0 : index
    %202 = tpu.strided_load %arg8[%c0_119, %c1_120, %c0_121, %c0_122] {strides = array<i32: 1, 2, 2, 1>} : memref<1x10x10x128xf32, #tpu.memory_space<vmem>>, vector<1x5x5x128xf32>
    %c0_123 = arith.constant 0 : index
    %c1_124 = arith.constant 1 : index
    %c1_125 = arith.constant 1 : index
    %c0_126 = arith.constant 0 : index
    %203 = tpu.strided_load %arg8[%c0_123, %c1_124, %c1_125, %c0_126] {strides = array<i32: 1, 2, 2, 1>} : memref<1x10x10x128xf32, #tpu.memory_space<vmem>>, vector<1x5x5x128xf32>
    %204 = vector.extract_strided_slice %200 {offsets = [0, 0, 0, 0], sizes = [1, 4, 4, 128], strides = [1, 1, 1, 1]} : vector<1x5x5x128xf32> to vector<1x4x4x128xf32>
    %205 = vector.extract_strided_slice %198 {offsets = [0, 0], sizes = [1, 128], strides = [1, 1]} : vector<9x128xf32> to vector<1x128xf32>
    %206 = vector.shape_cast %205 : vector<1x128xf32> to vector<128xf32>
    %207 = vector.shape_cast %206 : vector<128xf32> to vector<1x1x1x128xf32>
    %208 = vector.broadcast %207 : vector<1x1x1x128xf32> to vector<1x4x4x128xf32>
    %209 = arith.mulf %204, %208 : vector<1x4x4x128xf32>
    %210 = arith.addf %199, %209 : vector<1x4x4x128xf32>
    %211 = vector.extract_strided_slice %201 {offsets = [0, 0, 0, 0], sizes = [1, 4, 4, 128], strides = [1, 1, 1, 1]} : vector<1x5x5x128xf32> to vector<1x4x4x128xf32>
    %212 = vector.extract_strided_slice %198 {offsets = [1, 0], sizes = [1, 128], strides = [1, 1]} : vector<9x128xf32> to vector<1x128xf32>
    %213 = vector.shape_cast %212 : vector<1x128xf32> to vector<128xf32>
    %214 = vector.shape_cast %213 : vector<128xf32> to vector<1x1x1x128xf32>
    %215 = vector.broadcast %214 : vector<1x1x1x128xf32> to vector<1x4x4x128xf32>
    %216 = arith.mulf %211, %215 : vector<1x4x4x128xf32>
    %217 = arith.addf %210, %216 : vector<1x4x4x128xf32>
    %218 = vector.extract_strided_slice %200 {offsets = [0, 0, 1, 0], sizes = [1, 4, 4, 128], strides = [1, 1, 1, 1]} : vector<1x5x5x128xf32> to vector<1x4x4x128xf32>
    %219 = vector.extract_strided_slice %198 {offsets = [2, 0], sizes = [1, 128], strides = [1, 1]} : vector<9x128xf32> to vector<1x128xf32>
    %220 = vector.shape_cast %219 : vector<1x128xf32> to vector<128xf32>
    %221 = vector.shape_cast %220 : vector<128xf32> to vector<1x1x1x128xf32>
    %222 = vector.broadcast %221 : vector<1x1x1x128xf32> to vector<1x4x4x128xf32>
    %223 = arith.mulf %218, %222 : vector<1x4x4x128xf32>
    %224 = arith.addf %217, %223 : vector<1x4x4x128xf32>
    %225 = vector.extract_strided_slice %202 {offsets = [0, 0, 0, 0], sizes = [1, 4, 4, 128], strides = [1, 1, 1, 1]} : vector<1x5x5x128xf32> to vector<1x4x4x128xf32>
    %226 = vector.extract_strided_slice %198 {offsets = [3, 0], sizes = [1, 128], strides = [1, 1]} : vector<9x128xf32> to vector<1x128xf32>
    %227 = vector.shape_cast %226 : vector<1x128xf32> to vector<128xf32>
    %228 = vector.shape_cast %227 : vector<128xf32> to vector<1x1x1x128xf32>
    %229 = vector.broadcast %228 : vector<1x1x1x128xf32> to vector<1x4x4x128xf32>
    %230 = arith.mulf %225, %229 : vector<1x4x4x128xf32>
    %231 = arith.addf %224, %230 : vector<1x4x4x128xf32>
    %232 = vector.extract_strided_slice %203 {offsets = [0, 0, 0, 0], sizes = [1, 4, 4, 128], strides = [1, 1, 1, 1]} : vector<1x5x5x128xf32> to vector<1x4x4x128xf32>
    %233 = vector.extract_strided_slice %198 {offsets = [4, 0], sizes = [1, 128], strides = [1, 1]} : vector<9x128xf32> to vector<1x128xf32>
    %234 = vector.shape_cast %233 : vector<1x128xf32> to vector<128xf32>
    %235 = vector.shape_cast %234 : vector<128xf32> to vector<1x1x1x128xf32>
    %236 = vector.broadcast %235 : vector<1x1x1x128xf32> to vector<1x4x4x128xf32>
    %237 = arith.mulf %232, %236 : vector<1x4x4x128xf32>
    %238 = arith.addf %231, %237 : vector<1x4x4x128xf32>
    %239 = vector.extract_strided_slice %202 {offsets = [0, 0, 1, 0], sizes = [1, 4, 4, 128], strides = [1, 1, 1, 1]} : vector<1x5x5x128xf32> to vector<1x4x4x128xf32>
    %240 = vector.extract_strided_slice %198 {offsets = [5, 0], sizes = [1, 128], strides = [1, 1]} : vector<9x128xf32> to vector<1x128xf32>
    %241 = vector.shape_cast %240 : vector<1x128xf32> to vector<128xf32>
    %242 = vector.shape_cast %241 : vector<128xf32> to vector<1x1x1x128xf32>
    %243 = vector.broadcast %242 : vector<1x1x1x128xf32> to vector<1x4x4x128xf32>
    %244 = arith.mulf %239, %243 : vector<1x4x4x128xf32>
    %245 = arith.addf %238, %244 : vector<1x4x4x128xf32>
    %246 = vector.extract_strided_slice %200 {offsets = [0, 1, 0, 0], sizes = [1, 4, 4, 128], strides = [1, 1, 1, 1]} : vector<1x5x5x128xf32> to vector<1x4x4x128xf32>
    %247 = vector.extract_strided_slice %198 {offsets = [6, 0], sizes = [1, 128], strides = [1, 1]} : vector<9x128xf32> to vector<1x128xf32>
    %248 = vector.shape_cast %247 : vector<1x128xf32> to vector<128xf32>
    %249 = vector.shape_cast %248 : vector<128xf32> to vector<1x1x1x128xf32>
    %250 = vector.broadcast %249 : vector<1x1x1x128xf32> to vector<1x4x4x128xf32>
    %251 = arith.mulf %246, %250 : vector<1x4x4x128xf32>
    %252 = arith.addf %245, %251 : vector<1x4x4x128xf32>
    %253 = vector.extract_strided_slice %201 {offsets = [0, 1, 0, 0], sizes = [1, 4, 4, 128], strides = [1, 1, 1, 1]} : vector<1x5x5x128xf32> to vector<1x4x4x128xf32>
    %254 = vector.extract_strided_slice %198 {offsets = [7, 0], sizes = [1, 128], strides = [1, 1]} : vector<9x128xf32> to vector<1x128xf32>
    %255 = vector.shape_cast %254 : vector<1x128xf32> to vector<128xf32>
    %256 = vector.shape_cast %255 : vector<128xf32> to vector<1x1x1x128xf32>
    %257 = vector.broadcast %256 : vector<1x1x1x128xf32> to vector<1x4x4x128xf32>
    %258 = arith.mulf %253, %257 : vector<1x4x4x128xf32>
    %259 = arith.addf %252, %258 : vector<1x4x4x128xf32>
    %260 = vector.extract_strided_slice %200 {offsets = [0, 1, 1, 0], sizes = [1, 4, 4, 128], strides = [1, 1, 1, 1]} : vector<1x5x5x128xf32> to vector<1x4x4x128xf32>
    %261 = vector.extract_strided_slice %198 {offsets = [8, 0], sizes = [1, 128], strides = [1, 1]} : vector<9x128xf32> to vector<1x128xf32>
    %262 = vector.shape_cast %261 : vector<1x128xf32> to vector<128xf32>
    %263 = vector.shape_cast %262 : vector<128xf32> to vector<1x1x1x128xf32>
    %264 = vector.broadcast %263 : vector<1x1x1x128xf32> to vector<1x4x4x128xf32>
    %265 = arith.mulf %260, %264 : vector<1x4x4x128xf32>
    %266 = arith.addf %259, %265 : vector<1x4x4x128xf32>
    %267 = vector.extract_strided_slice %0 {offsets = [28, 0], sizes = [1, 128], strides = [1, 1]} : vector<56x128xf32> to vector<1x128xf32>
    %268 = vector.shape_cast %267 : vector<1x128xf32> to vector<128xf32>
    %269 = vector.shape_cast %268 : vector<128xf32> to vector<1x1x1x128xf32>
    %270 = vector.broadcast %269 : vector<1x1x1x128xf32> to vector<1x4x4x128xf32>
    %271 = arith.mulf %266, %270 : vector<1x4x4x128xf32>
    %272 = vector.extract_strided_slice %0 {offsets = [29, 0], sizes = [1, 128], strides = [1, 1]} : vector<56x128xf32> to vector<1x128xf32>
    %273 = vector.shape_cast %272 : vector<1x128xf32> to vector<128xf32>
    %274 = vector.shape_cast %273 : vector<128xf32> to vector<1x1x1x128xf32>
    %275 = vector.broadcast %274 : vector<1x1x1x128xf32> to vector<1x4x4x128xf32>
    %276 = arith.addf %271, %275 : vector<1x4x4x128xf32>
    %277 = arith.negf %276 : vector<1x4x4x128xf32>
    %278 = math.exp %277 : vector<1x4x4x128xf32>
    %cst_127 = arith.constant 1.000000e+00 : f32
    %279 = vector.broadcast %cst_127 : f32 to vector<1x4x4x128xf32>
    %280 = arith.addf %279, %278 : vector<1x4x4x128xf32>
    %281 = arith.divf %279, %280 : vector<1x4x4x128xf32>
    %282 = arith.mulf %276, %281 : vector<1x4x4x128xf32>
    %283 = vector.shape_cast %282 : vector<1x4x4x128xf32> to vector<1x16x128xf32>
    %cst_128 = arith.constant dense<0.000000e+00> : vector<1x128xf32>
    %284 = vector.multi_reduction <add>, %283, %cst_128 [1] : vector<1x16x128xf32> to vector<1x128xf32>
    %cst_129 = arith.constant 1.600000e+01 : f32
    %285 = vector.broadcast %cst_129 : f32 to vector<1x128xf32>
    %286 = arith.divf %284, %285 : vector<1x128xf32>
    %287 = arith.truncf %286 : vector<1x128xf32> to vector<1x128xbf16>
    %c5 = arith.constant 5 : index
    %c0_130 = arith.constant 0 : index
    %c0_131 = arith.constant 0 : index
    %288 = vector.load %arg2[%c5, %c0_130, %c0_131] : memref<13x128x128xbf16, #tpu.memory_space<vmem>>, vector<1x128x128xbf16>
    %289 = vector.shape_cast %288 : vector<1x128x128xbf16> to vector<128x128xbf16>
    %cst_132 = arith.constant dense<0.000000e+00> : vector<1x128xf32>
    %290 = tpu.matmul %287, %289, %cst_132 {dimension_numbers = #tpu.dot_dimension_numbers<[1], [0], [0], [1], [0, 0, 1, 1], [], []>} : vector<1x128xbf16>, vector<128x128xbf16>, vector<1x128xf32> -> vector<1x128xf32>
    %291 = vector.extract_strided_slice %0 {offsets = [30, 0], sizes = [1, 128], strides = [1, 1]} : vector<56x128xf32> to vector<1x128xf32>
    %292 = vector.shape_cast %291 : vector<1x128xf32> to vector<128xf32>
    %293 = vector.shape_cast %292 : vector<128xf32> to vector<1x128xf32>
    %294 = arith.addf %290, %293 : vector<1x128xf32>
    %295 = arith.negf %294 : vector<1x128xf32>
    %296 = math.exp %295 : vector<1x128xf32>
    %cst_133 = arith.constant 1.000000e+00 : f32
    %297 = vector.broadcast %cst_133 : f32 to vector<1x128xf32>
    %298 = arith.addf %297, %296 : vector<1x128xf32>
    %299 = arith.divf %297, %298 : vector<1x128xf32>
    %300 = arith.mulf %294, %299 : vector<1x128xf32>
    %301 = arith.truncf %300 : vector<1x128xf32> to vector<1x128xbf16>
    %c6 = arith.constant 6 : index
    %c0_134 = arith.constant 0 : index
    %c0_135 = arith.constant 0 : index
    %302 = vector.load %arg2[%c6, %c0_134, %c0_135] : memref<13x128x128xbf16, #tpu.memory_space<vmem>>, vector<1x128x128xbf16>
    %303 = vector.shape_cast %302 : vector<1x128x128xbf16> to vector<128x128xbf16>
    %cst_136 = arith.constant dense<0.000000e+00> : vector<1x128xf32>
    %304 = tpu.matmul %301, %303, %cst_136 {dimension_numbers = #tpu.dot_dimension_numbers<[1], [0], [0], [1], [0, 0, 1, 1], [], []>} : vector<1x128xbf16>, vector<128x128xbf16>, vector<1x128xf32> -> vector<1x128xf32>
    %305 = vector.extract_strided_slice %0 {offsets = [31, 0], sizes = [1, 128], strides = [1, 1]} : vector<56x128xf32> to vector<1x128xf32>
    %306 = vector.shape_cast %305 : vector<1x128xf32> to vector<128xf32>
    %307 = vector.shape_cast %306 : vector<128xf32> to vector<1x128xf32>
    %308 = arith.addf %304, %307 : vector<1x128xf32>
    %309 = arith.negf %308 : vector<1x128xf32>
    %310 = math.exp %309 : vector<1x128xf32>
    %cst_137 = arith.constant 1.000000e+00 : f32
    %311 = vector.broadcast %cst_137 : f32 to vector<1x128xf32>
    %312 = arith.addf %311, %310 : vector<1x128xf32>
    %313 = arith.divf %311, %312 : vector<1x128xf32>
    %314 = vector.shape_cast %313 : vector<1x128xf32> to vector<1x1x128xf32>
    %315 = vector.broadcast %314 : vector<1x1x128xf32> to vector<1x16x128xf32>
    %316 = arith.mulf %283, %315 : vector<1x16x128xf32>
    %317 = vector.shape_cast %316 : vector<1x16x128xf32> to vector<16x128xf32>
    %318 = arith.truncf %317 : vector<16x128xf32> to vector<16x128xbf16>
    %c7 = arith.constant 7 : index
    %c0_138 = arith.constant 0 : index
    %c0_139 = arith.constant 0 : index
    %319 = vector.load %arg2[%c7, %c0_138, %c0_139] : memref<13x128x128xbf16, #tpu.memory_space<vmem>>, vector<1x128x128xbf16>
    %320 = vector.shape_cast %319 : vector<1x128x128xbf16> to vector<128x128xbf16>
    %cst_140 = arith.constant dense<0.000000e+00> : vector<16x128xf32>
    %321 = tpu.matmul %318, %320, %cst_140 {dimension_numbers = #tpu.dot_dimension_numbers<[1], [0], [0], [1], [0, 0, 1, 1], [], []>} : vector<16x128xbf16>, vector<128x128xbf16>, vector<16x128xf32> -> vector<16x128xf32>
    %322 = vector.extract_strided_slice %0 {offsets = [32, 0], sizes = [1, 128], strides = [1, 1]} : vector<56x128xf32> to vector<1x128xf32>
    %323 = vector.shape_cast %322 : vector<1x128xf32> to vector<128xf32>
    %324 = vector.shape_cast %323 : vector<128xf32> to vector<1x128xf32>
    %325 = vector.broadcast %324 : vector<1x128xf32> to vector<16x128xf32>
    %326 = arith.mulf %321, %325 : vector<16x128xf32>
    %327 = vector.extract_strided_slice %0 {offsets = [33, 0], sizes = [1, 128], strides = [1, 1]} : vector<56x128xf32> to vector<1x128xf32>
    %328 = vector.shape_cast %327 : vector<1x128xf32> to vector<128xf32>
    %329 = vector.shape_cast %328 : vector<128xf32> to vector<1x128xf32>
    %330 = vector.broadcast %329 : vector<1x128xf32> to vector<16x128xf32>
    %331 = arith.addf %326, %330 : vector<16x128xf32>
    %332 = vector.shape_cast %331 : vector<16x128xf32> to vector<1x4x4x128xf32>
    %333 = vector.shape_cast %332 : vector<1x4x4x128xf32> to vector<16x128xf32>
    %334 = arith.truncf %333 : vector<16x128xf32> to vector<16x128xbf16>
    %c8 = arith.constant 8 : index
    %c0_141 = arith.constant 0 : index
    %c0_142 = arith.constant 0 : index
    %335 = vector.load %arg2[%c8, %c0_141, %c0_142] : memref<13x128x128xbf16, #tpu.memory_space<vmem>>, vector<1x128x128xbf16>
    %336 = vector.shape_cast %335 : vector<1x128x128xbf16> to vector<128x128xbf16>
    %cst_143 = arith.constant dense<0.000000e+00> : vector<16x128xf32>
    %337 = tpu.matmul %334, %336, %cst_143 {dimension_numbers = #tpu.dot_dimension_numbers<[1], [0], [0], [1], [0, 0, 1, 1], [], []>} : vector<16x128xbf16>, vector<128x128xbf16>, vector<16x128xf32> -> vector<16x128xf32>
    %338 = vector.extract_strided_slice %0 {offsets = [34, 0], sizes = [1, 128], strides = [1, 1]} : vector<56x128xf32> to vector<1x128xf32>
    %339 = vector.shape_cast %338 : vector<1x128xf32> to vector<128xf32>
    %340 = vector.shape_cast %339 : vector<128xf32> to vector<1x128xf32>
    %341 = vector.broadcast %340 : vector<1x128xf32> to vector<16x128xf32>
    %342 = arith.mulf %337, %341 : vector<16x128xf32>
    %343 = vector.extract_strided_slice %0 {offsets = [35, 0], sizes = [1, 128], strides = [1, 1]} : vector<56x128xf32> to vector<1x128xf32>
    %344 = vector.shape_cast %343 : vector<1x128xf32> to vector<128xf32>
    %345 = vector.shape_cast %344 : vector<128xf32> to vector<1x128xf32>
    %346 = vector.broadcast %345 : vector<1x128xf32> to vector<16x128xf32>
    %347 = arith.addf %342, %346 : vector<16x128xf32>
    %348 = arith.negf %347 : vector<16x128xf32>
    %349 = math.exp %348 : vector<16x128xf32>
    %cst_144 = arith.constant 1.000000e+00 : f32
    %350 = vector.broadcast %cst_144 : f32 to vector<16x128xf32>
    %351 = arith.addf %350, %349 : vector<16x128xf32>
    %352 = arith.divf %350, %351 : vector<16x128xf32>
    %353 = arith.mulf %347, %352 : vector<16x128xf32>
    %354 = vector.shape_cast %353 : vector<16x128xf32> to vector<1x4x4x128xf32>
    %cst_145 = arith.constant 0.000000e+00 : f32
    %355 = vector.broadcast %cst_145 : f32 to vector<1x1x6x128xf32>
    %c0_146 = arith.constant 0 : index
    %c0_147 = arith.constant 0 : index
    %c0_148 = arith.constant 0 : index
    %c0_149 = arith.constant 0 : index
    %356 = vector.load %arg9[%c0_146, %c0_147, %c0_148, %c0_149] : memref<1x6x6x128xf32, #tpu.memory_space<vmem>>, vector<1x1x6x128xf32>
    tpu.vector_store %arg9[%c0_146, %c0_147, %c0_148, %c0_149], %355 {strides = array<i32>} : memref<1x6x6x128xf32, #tpu.memory_space<vmem>>, vector<1x1x6x128xf32>,
    %cst_150 = arith.constant 0.000000e+00 : f32
    %357 = vector.broadcast %cst_150 : f32 to vector<1x1x6x128xf32>
    %c0_151 = arith.constant 0 : index
    %c5_152 = arith.constant 5 : index
    %c0_153 = arith.constant 0 : index
    %c0_154 = arith.constant 0 : index
    %358 = vector.load %arg9[%c0_151, %c5_152, %c0_153, %c0_154] : memref<1x6x6x128xf32, #tpu.memory_space<vmem>>, vector<1x1x6x128xf32>
    tpu.vector_store %arg9[%c0_151, %c5_152, %c0_153, %c0_154], %357 {strides = array<i32>} : memref<1x6x6x128xf32, #tpu.memory_space<vmem>>, vector<1x1x6x128xf32>,
    %cst_155 = arith.constant 0.000000e+00 : f32
    %359 = vector.broadcast %cst_155 : f32 to vector<1x4x1x128xf32>
    %c0_156 = arith.constant 0 : index
    %c1_157 = arith.constant 1 : index
    %c0_158 = arith.constant 0 : index
    %c0_159 = arith.constant 0 : index
    %360 = vector.load %arg9[%c0_156, %c1_157, %c0_158, %c0_159] : memref<1x6x6x128xf32, #tpu.memory_space<vmem>>, vector<1x4x1x128xf32>
    tpu.vector_store %arg9[%c0_156, %c1_157, %c0_158, %c0_159], %359 {strides = array<i32>} : memref<1x6x6x128xf32, #tpu.memory_space<vmem>>, vector<1x4x1x128xf32>,
    %cst_160 = arith.constant 0.000000e+00 : f32
    %361 = vector.broadcast %cst_160 : f32 to vector<1x4x1x128xf32>
    %c0_161 = arith.constant 0 : index
    %c1_162 = arith.constant 1 : index
    %c5_163 = arith.constant 5 : index
    %c0_164 = arith.constant 0 : index
    %362 = vector.load %arg9[%c0_161, %c1_162, %c5_163, %c0_164] : memref<1x6x6x128xf32, #tpu.memory_space<vmem>>, vector<1x4x1x128xf32>
    tpu.vector_store %arg9[%c0_161, %c1_162, %c5_163, %c0_164], %361 {strides = array<i32>} : memref<1x6x6x128xf32, #tpu.memory_space<vmem>>, vector<1x4x1x128xf32>,
    %c0_165 = arith.constant 0 : index
    %c1_166 = arith.constant 1 : index
    %c1_167 = arith.constant 1 : index
    %c0_168 = arith.constant 0 : index
    %363 = vector.load %arg9[%c0_165, %c1_166, %c1_167, %c0_168] : memref<1x6x6x128xf32, #tpu.memory_space<vmem>>, vector<1x4x4x128xf32>
    tpu.vector_store %arg9[%c0_165, %c1_166, %c1_167, %c0_168], %354 {strides = array<i32>} : memref<1x6x6x128xf32, #tpu.memory_space<vmem>>, vector<1x4x4x128xf32>,
    %364 = vector.extract_strided_slice %0 {offsets = [36, 0], sizes = [9, 128], strides = [1, 1]} : vector<56x128xf32> to vector<9x128xf32>
    %cst_169 = arith.constant 0.000000e+00 : f32
    %365 = vector.broadcast %cst_169 : f32 to vector<1x4x4x128xf32>
    %c0_170 = arith.constant 0 : index
    %c0_171 = arith.constant 0 : index
    %c0_172 = arith.constant 0 : index
    %c0_173 = arith.constant 0 : index
    %366 = vector.load %arg9[%c0_170, %c0_171, %c0_172, %c0_173] : memref<1x6x6x128xf32, #tpu.memory_space<vmem>>, vector<1x4x4x128xf32>
    %367 = vector.extract_strided_slice %364 {offsets = [0, 0], sizes = [1, 128], strides = [1, 1]} : vector<9x128xf32> to vector<1x128xf32>
    %368 = vector.shape_cast %367 : vector<1x128xf32> to vector<128xf32>
    %369 = vector.shape_cast %368 : vector<128xf32> to vector<1x1x1x128xf32>
    %370 = vector.broadcast %369 : vector<1x1x1x128xf32> to vector<1x4x4x128xf32>
    %371 = arith.mulf %366, %370 : vector<1x4x4x128xf32>
    %372 = arith.addf %365, %371 : vector<1x4x4x128xf32>
    %c0_174 = arith.constant 0 : index
    %c0_175 = arith.constant 0 : index
    %c1_176 = arith.constant 1 : index
    %c0_177 = arith.constant 0 : index
    %373 = vector.load %arg9[%c0_174, %c0_175, %c1_176, %c0_177] : memref<1x6x6x128xf32, #tpu.memory_space<vmem>>, vector<1x4x4x128xf32>
    %374 = vector.extract_strided_slice %364 {offsets = [1, 0], sizes = [1, 128], strides = [1, 1]} : vector<9x128xf32> to vector<1x128xf32>
    %375 = vector.shape_cast %374 : vector<1x128xf32> to vector<128xf32>
    %376 = vector.shape_cast %375 : vector<128xf32> to vector<1x1x1x128xf32>
    %377 = vector.broadcast %376 : vector<1x1x1x128xf32> to vector<1x4x4x128xf32>
    %378 = arith.mulf %373, %377 : vector<1x4x4x128xf32>
    %379 = arith.addf %372, %378 : vector<1x4x4x128xf32>
    %c0_178 = arith.constant 0 : index
    %c0_179 = arith.constant 0 : index
    %c2_180 = arith.constant 2 : index
    %c0_181 = arith.constant 0 : index
    %380 = vector.load %arg9[%c0_178, %c0_179, %c2_180, %c0_181] : memref<1x6x6x128xf32, #tpu.memory_space<vmem>>, vector<1x4x4x128xf32>
    %381 = vector.extract_strided_slice %364 {offsets = [2, 0], sizes = [1, 128], strides = [1, 1]} : vector<9x128xf32> to vector<1x128xf32>
    %382 = vector.shape_cast %381 : vector<1x128xf32> to vector<128xf32>
    %383 = vector.shape_cast %382 : vector<128xf32> to vector<1x1x1x128xf32>
    %384 = vector.broadcast %383 : vector<1x1x1x128xf32> to vector<1x4x4x128xf32>
    %385 = arith.mulf %380, %384 : vector<1x4x4x128xf32>
    %386 = arith.addf %379, %385 : vector<1x4x4x128xf32>
    %c0_182 = arith.constant 0 : index
    %c1_183 = arith.constant 1 : index
    %c0_184 = arith.constant 0 : index
    %c0_185 = arith.constant 0 : index
    %387 = vector.load %arg9[%c0_182, %c1_183, %c0_184, %c0_185] : memref<1x6x6x128xf32, #tpu.memory_space<vmem>>, vector<1x4x4x128xf32>
    %388 = vector.extract_strided_slice %364 {offsets = [3, 0], sizes = [1, 128], strides = [1, 1]} : vector<9x128xf32> to vector<1x128xf32>
    %389 = vector.shape_cast %388 : vector<1x128xf32> to vector<128xf32>
    %390 = vector.shape_cast %389 : vector<128xf32> to vector<1x1x1x128xf32>
    %391 = vector.broadcast %390 : vector<1x1x1x128xf32> to vector<1x4x4x128xf32>
    %392 = arith.mulf %387, %391 : vector<1x4x4x128xf32>
    %393 = arith.addf %386, %392 : vector<1x4x4x128xf32>
    %c0_186 = arith.constant 0 : index
    %c1_187 = arith.constant 1 : index
    %c1_188 = arith.constant 1 : index
    %c0_189 = arith.constant 0 : index
    %394 = vector.load %arg9[%c0_186, %c1_187, %c1_188, %c0_189] : memref<1x6x6x128xf32, #tpu.memory_space<vmem>>, vector<1x4x4x128xf32>
    %395 = vector.extract_strided_slice %364 {offsets = [4, 0], sizes = [1, 128], strides = [1, 1]} : vector<9x128xf32> to vector<1x128xf32>
    %396 = vector.shape_cast %395 : vector<1x128xf32> to vector<128xf32>
    %397 = vector.shape_cast %396 : vector<128xf32> to vector<1x1x1x128xf32>
    %398 = vector.broadcast %397 : vector<1x1x1x128xf32> to vector<1x4x4x128xf32>
    %399 = arith.mulf %394, %398 : vector<1x4x4x128xf32>
    %400 = arith.addf %393, %399 : vector<1x4x4x128xf32>
    %c0_190 = arith.constant 0 : index
    %c1_191 = arith.constant 1 : index
    %c2_192 = arith.constant 2 : index
    %c0_193 = arith.constant 0 : index
    %401 = vector.load %arg9[%c0_190, %c1_191, %c2_192, %c0_193] : memref<1x6x6x128xf32, #tpu.memory_space<vmem>>, vector<1x4x4x128xf32>
    %402 = vector.extract_strided_slice %364 {offsets = [5, 0], sizes = [1, 128], strides = [1, 1]} : vector<9x128xf32> to vector<1x128xf32>
    %403 = vector.shape_cast %402 : vector<1x128xf32> to vector<128xf32>
    %404 = vector.shape_cast %403 : vector<128xf32> to vector<1x1x1x128xf32>
    %405 = vector.broadcast %404 : vector<1x1x1x128xf32> to vector<1x4x4x128xf32>
    %406 = arith.mulf %401, %405 : vector<1x4x4x128xf32>
    %407 = arith.addf %400, %406 : vector<1x4x4x128xf32>
    %c0_194 = arith.constant 0 : index
    %c2_195 = arith.constant 2 : index
    %c0_196 = arith.constant 0 : index
    %c0_197 = arith.constant 0 : index
    %408 = vector.load %arg9[%c0_194, %c2_195, %c0_196, %c0_197] : memref<1x6x6x128xf32, #tpu.memory_space<vmem>>, vector<1x4x4x128xf32>
    %409 = vector.extract_strided_slice %364 {offsets = [6, 0], sizes = [1, 128], strides = [1, 1]} : vector<9x128xf32> to vector<1x128xf32>
    %410 = vector.shape_cast %409 : vector<1x128xf32> to vector<128xf32>
    %411 = vector.shape_cast %410 : vector<128xf32> to vector<1x1x1x128xf32>
    %412 = vector.broadcast %411 : vector<1x1x1x128xf32> to vector<1x4x4x128xf32>
    %413 = arith.mulf %408, %412 : vector<1x4x4x128xf32>
    %414 = arith.addf %407, %413 : vector<1x4x4x128xf32>
    %c0_198 = arith.constant 0 : index
    %c2_199 = arith.constant 2 : index
    %c1_200 = arith.constant 1 : index
    %c0_201 = arith.constant 0 : index
    %415 = vector.load %arg9[%c0_198, %c2_199, %c1_200, %c0_201] : memref<1x6x6x128xf32, #tpu.memory_space<vmem>>, vector<1x4x4x128xf32>
    %416 = vector.extract_strided_slice %364 {offsets = [7, 0], sizes = [1, 128], strides = [1, 1]} : vector<9x128xf32> to vector<1x128xf32>
    %417 = vector.shape_cast %416 : vector<1x128xf32> to vector<128xf32>
    %418 = vector.shape_cast %417 : vector<128xf32> to vector<1x1x1x128xf32>
    %419 = vector.broadcast %418 : vector<1x1x1x128xf32> to vector<1x4x4x128xf32>
    %420 = arith.mulf %415, %419 : vector<1x4x4x128xf32>
    %421 = arith.addf %414, %420 : vector<1x4x4x128xf32>
    %c0_202 = arith.constant 0 : index
    %c2_203 = arith.constant 2 : index
    %c2_204 = arith.constant 2 : index
    %c0_205 = arith.constant 0 : index
    %422 = vector.load %arg9[%c0_202, %c2_203, %c2_204, %c0_205] : memref<1x6x6x128xf32, #tpu.memory_space<vmem>>, vector<1x4x4x128xf32>
    %423 = vector.extract_strided_slice %364 {offsets = [8, 0], sizes = [1, 128], strides = [1, 1]} : vector<9x128xf32> to vector<1x128xf32>
    %424 = vector.shape_cast %423 : vector<1x128xf32> to vector<128xf32>
    %425 = vector.shape_cast %424 : vector<128xf32> to vector<1x1x1x128xf32>
    %426 = vector.broadcast %425 : vector<1x1x1x128xf32> to vector<1x4x4x128xf32>
    %427 = arith.mulf %422, %426 : vector<1x4x4x128xf32>
    %428 = arith.addf %421, %427 : vector<1x4x4x128xf32>
    %429 = vector.extract_strided_slice %0 {offsets = [45, 0], sizes = [1, 128], strides = [1, 1]} : vector<56x128xf32> to vector<1x128xf32>
    %430 = vector.shape_cast %429 : vector<1x128xf32> to vector<128xf32>
    %431 = vector.shape_cast %430 : vector<128xf32> to vector<1x1x1x128xf32>
    %432 = vector.broadcast %431 : vector<1x1x1x128xf32> to vector<1x4x4x128xf32>
    %433 = arith.mulf %428, %432 : vector<1x4x4x128xf32>
    %434 = vector.extract_strided_slice %0 {offsets = [46, 0], sizes = [1, 128], strides = [1, 1]} : vector<56x128xf32> to vector<1x128xf32>
    %435 = vector.shape_cast %434 : vector<1x128xf32> to vector<128xf32>
    %436 = vector.shape_cast %435 : vector<128xf32> to vector<1x1x1x128xf32>
    %437 = vector.broadcast %436 : vector<1x1x1x128xf32> to vector<1x4x4x128xf32>
    %438 = arith.addf %433, %437 : vector<1x4x4x128xf32>
    %439 = arith.negf %438 : vector<1x4x4x128xf32>
    %440 = math.exp %439 : vector<1x4x4x128xf32>
    %cst_206 = arith.constant 1.000000e+00 : f32
    %441 = vector.broadcast %cst_206 : f32 to vector<1x4x4x128xf32>
    %442 = arith.addf %441, %440 : vector<1x4x4x128xf32>
    %443 = arith.divf %441, %442 : vector<1x4x4x128xf32>
    %444 = arith.mulf %438, %443 : vector<1x4x4x128xf32>
    %445 = vector.shape_cast %444 : vector<1x4x4x128xf32> to vector<1x16x128xf32>
    %cst_207 = arith.constant dense<0.000000e+00> : vector<1x128xf32>
    %446 = vector.multi_reduction <add>, %445, %cst_207 [1] : vector<1x16x128xf32> to vector<1x128xf32>
    %cst_208 = arith.constant 1.600000e+01 : f32
    %447 = vector.broadcast %cst_208 : f32 to vector<1x128xf32>
    %448 = arith.divf %446, %447 : vector<1x128xf32>
    %449 = arith.truncf %448 : vector<1x128xf32> to vector<1x128xbf16>
    %c9_209 = arith.constant 9 : index
    %c0_210 = arith.constant 0 : index
    %c0_211 = arith.constant 0 : index
    %450 = vector.load %arg2[%c9_209, %c0_210, %c0_211] : memref<13x128x128xbf16, #tpu.memory_space<vmem>>, vector<1x128x128xbf16>
    %451 = vector.shape_cast %450 : vector<1x128x128xbf16> to vector<128x128xbf16>
    %cst_212 = arith.constant dense<0.000000e+00> : vector<1x128xf32>
    %452 = tpu.matmul %449, %451, %cst_212 {dimension_numbers = #tpu.dot_dimension_numbers<[1], [0], [0], [1], [0, 0, 1, 1], [], []>} : vector<1x128xbf16>, vector<128x128xbf16>, vector<1x128xf32> -> vector<1x128xf32>
    %453 = vector.extract_strided_slice %0 {offsets = [47, 0], sizes = [1, 128], strides = [1, 1]} : vector<56x128xf32> to vector<1x128xf32>
    %454 = vector.shape_cast %453 : vector<1x128xf32> to vector<128xf32>
    %455 = vector.shape_cast %454 : vector<128xf32> to vector<1x128xf32>
    %456 = arith.addf %452, %455 : vector<1x128xf32>
    %457 = arith.negf %456 : vector<1x128xf32>
    %458 = math.exp %457 : vector<1x128xf32>
    %cst_213 = arith.constant 1.000000e+00 : f32
    %459 = vector.broadcast %cst_213 : f32 to vector<1x128xf32>
    %460 = arith.addf %459, %458 : vector<1x128xf32>
    %461 = arith.divf %459, %460 : vector<1x128xf32>
    %462 = arith.mulf %456, %461 : vector<1x128xf32>
    %463 = arith.truncf %462 : vector<1x128xf32> to vector<1x128xbf16>
    %c10 = arith.constant 10 : index
    %c0_214 = arith.constant 0 : index
    %c0_215 = arith.constant 0 : index
    %464 = vector.load %arg2[%c10, %c0_214, %c0_215] : memref<13x128x128xbf16, #tpu.memory_space<vmem>>, vector<1x128x128xbf16>
    %465 = vector.shape_cast %464 : vector<1x128x128xbf16> to vector<128x128xbf16>
    %cst_216 = arith.constant dense<0.000000e+00> : vector<1x128xf32>
    %466 = tpu.matmul %463, %465, %cst_216 {dimension_numbers = #tpu.dot_dimension_numbers<[1], [0], [0], [1], [0, 0, 1, 1], [], []>} : vector<1x128xbf16>, vector<128x128xbf16>, vector<1x128xf32> -> vector<1x128xf32>
    %467 = vector.extract_strided_slice %0 {offsets = [48, 0], sizes = [1, 128], strides = [1, 1]} : vector<56x128xf32> to vector<1x128xf32>
    %468 = vector.shape_cast %467 : vector<1x128xf32> to vector<128xf32>
    %469 = vector.shape_cast %468 : vector<128xf32> to vector<1x128xf32>
    %470 = arith.addf %466, %469 : vector<1x128xf32>
    %471 = arith.negf %470 : vector<1x128xf32>
    %472 = math.exp %471 : vector<1x128xf32>
    %cst_217 = arith.constant 1.000000e+00 : f32
    %473 = vector.broadcast %cst_217 : f32 to vector<1x128xf32>
    %474 = arith.addf %473, %472 : vector<1x128xf32>
    %475 = arith.divf %473, %474 : vector<1x128xf32>
    %476 = vector.shape_cast %475 : vector<1x128xf32> to vector<1x1x128xf32>
    %477 = vector.broadcast %476 : vector<1x1x128xf32> to vector<1x16x128xf32>
    %478 = arith.mulf %445, %477 : vector<1x16x128xf32>
    %479 = vector.shape_cast %478 : vector<1x16x128xf32> to vector<16x128xf32>
    %480 = arith.truncf %479 : vector<16x128xf32> to vector<16x128xbf16>
    %c11 = arith.constant 11 : index
    %c0_218 = arith.constant 0 : index
    %c0_219 = arith.constant 0 : index
    %481 = vector.load %arg2[%c11, %c0_218, %c0_219] : memref<13x128x128xbf16, #tpu.memory_space<vmem>>, vector<1x128x128xbf16>
    %482 = vector.shape_cast %481 : vector<1x128x128xbf16> to vector<128x128xbf16>
    %cst_220 = arith.constant dense<0.000000e+00> : vector<16x128xf32>
    %483 = tpu.matmul %480, %482, %cst_220 {dimension_numbers = #tpu.dot_dimension_numbers<[1], [0], [0], [1], [0, 0, 1, 1], [], []>} : vector<16x128xbf16>, vector<128x128xbf16>, vector<16x128xf32> -> vector<16x128xf32>
    %484 = vector.extract_strided_slice %0 {offsets = [49, 0], sizes = [1, 128], strides = [1, 1]} : vector<56x128xf32> to vector<1x128xf32>
    %485 = vector.shape_cast %484 : vector<1x128xf32> to vector<128xf32>
    %486 = vector.shape_cast %485 : vector<128xf32> to vector<1x128xf32>
    %487 = vector.broadcast %486 : vector<1x128xf32> to vector<16x128xf32>
    %488 = arith.mulf %483, %487 : vector<16x128xf32>
    %489 = vector.extract_strided_slice %0 {offsets = [50, 0], sizes = [1, 128], strides = [1, 1]} : vector<56x128xf32> to vector<1x128xf32>
    %490 = vector.shape_cast %489 : vector<1x128xf32> to vector<128xf32>
    %491 = vector.shape_cast %490 : vector<128xf32> to vector<1x128xf32>
    %492 = vector.broadcast %491 : vector<1x128xf32> to vector<16x128xf32>
    %493 = arith.addf %488, %492 : vector<16x128xf32>
    %494 = arith.addf %493, %333 : vector<16x128xf32>
    %495 = vector.shape_cast %494 : vector<16x128xf32> to vector<1x4x4x128xf32>
    %496 = vector.shape_cast %495 : vector<1x4x4x128xf32> to vector<16x128xf32>
    %497 = arith.truncf %496 : vector<16x128xf32> to vector<16x128xbf16>
    %c12 = arith.constant 12 : index
    %c0_221 = arith.constant 0 : index
    %c0_222 = arith.constant 0 : index
    %498 = vector.load %arg2[%c12, %c0_221, %c0_222] : memref<13x128x128xbf16, #tpu.memory_space<vmem>>, vector<1x128x128xbf16>
    %499 = vector.shape_cast %498 : vector<1x128x128xbf16> to vector<128x128xbf16>
    %cst_223 = arith.constant dense<0.000000e+00> : vector<16x128xf32>
    %500 = tpu.matmul %497, %499, %cst_223 {dimension_numbers = #tpu.dot_dimension_numbers<[1], [0], [0], [1], [0, 0, 1, 1], [], []>} : vector<16x128xbf16>, vector<128x128xbf16>, vector<16x128xf32> -> vector<16x128xf32>
    %501 = vector.extract_strided_slice %0 {offsets = [51, 0], sizes = [1, 128], strides = [1, 1]} : vector<56x128xf32> to vector<1x128xf32>
    %502 = vector.shape_cast %501 : vector<1x128xf32> to vector<128xf32>
    %503 = vector.shape_cast %502 : vector<128xf32> to vector<1x128xf32>
    %504 = vector.broadcast %503 : vector<1x128xf32> to vector<16x128xf32>
    %505 = arith.mulf %500, %504 : vector<16x128xf32>
    %506 = vector.extract_strided_slice %0 {offsets = [52, 0], sizes = [1, 128], strides = [1, 1]} : vector<56x128xf32> to vector<1x128xf32>
    %507 = vector.shape_cast %506 : vector<1x128xf32> to vector<128xf32>
    %508 = vector.shape_cast %507 : vector<128xf32> to vector<1x128xf32>
    %509 = vector.broadcast %508 : vector<1x128xf32> to vector<16x128xf32>
    %510 = arith.addf %505, %509 : vector<16x128xf32>
    %511 = arith.negf %510 : vector<16x128xf32>
    %512 = math.exp %511 : vector<16x128xf32>
    %cst_224 = arith.constant 1.000000e+00 : f32
    %513 = vector.broadcast %cst_224 : f32 to vector<16x128xf32>
    %514 = arith.addf %513, %512 : vector<16x128xf32>
    %515 = arith.divf %513, %514 : vector<16x128xf32>
    %516 = arith.mulf %510, %515 : vector<16x128xf32>
    %517 = vector.shape_cast %516 : vector<16x128xf32> to vector<1x16x128xf32>
    %cst_225 = arith.constant dense<0.000000e+00> : vector<1x128xf32>
    %518 = vector.multi_reduction <add>, %517, %cst_225 [1] : vector<1x16x128xf32> to vector<1x128xf32>
    %cst_226 = arith.constant 1.600000e+01 : f32
    %519 = vector.broadcast %cst_226 : f32 to vector<1x128xf32>
    %520 = arith.divf %518, %519 : vector<1x128xf32>
    %521 = arith.truncf %520 : vector<1x128xf32> to vector<1x128xbf16>
    %c0_227 = arith.constant 0 : index
    %c0_228 = arith.constant 0 : index
    %522 = vector.load %arg4[%c0_227, %c0_228] : memref<128x1024xbf16, #tpu.memory_space<vmem>>, vector<128x1024xbf16>
    %cst_229 = arith.constant dense<0.000000e+00> : vector<1x1024xf32>
    %523 = tpu.matmul %521, %522, %cst_229 {dimension_numbers = #tpu.dot_dimension_numbers<[1], [0], [0], [1], [0, 0, 1, 1], [], []>} : vector<1x128xbf16>, vector<128x1024xbf16>, vector<1x1024xf32> -> vector<1x1024xf32>
    %c0_230 = arith.constant 0 : index
    %c0_231 = arith.constant 0 : index
    %524 = vector.load %arg5[%c0_230, %c0_231] : memref<1x1024xf32, #tpu.memory_space<vmem>>, vector<1x1024xf32>
    %525 = arith.addf %523, %524 : vector<1x1024xf32>
    %526 = vector.shape_cast %525 : vector<1x1024xf32> to vector<1x1x1024xf32>
    %c0_232 = arith.constant 0 : index
    %c0_233 = arith.constant 0 : index
    %c0_234 = arith.constant 0 : index
    %527 = vector.load %arg6[%c0_232, %c0_233, %c0_234] : memref<1x1x1024xf32, #tpu.memory_space<vmem>>, vector<1x1x1024xf32>
    tpu.vector_store %arg6[%c0_232, %c0_233, %c0_234], %526 {strides = array<i32>} : memref<1x1x1024xf32, #tpu.memory_space<vmem>>, vector<1x1x1024xf32>,
    return
  }
  func.func @transform_0(%arg0: i32) -> (i32, i32, i32) {
    %c0_i32 = arith.constant 0 : i32
    %c0_i32_0 = arith.constant 0 : i32
    %c0_i32_1 = arith.constant 0 : i32
    return %arg0, %c0_i32, %c0_i32_0 : i32, i32, i32
  }
  func.func @transform_1(%arg0: i32) -> (i32, i32, i32) {
    %c0_i32 = arith.constant 0 : i32
    %c0_i32_0 = arith.constant 0 : i32
    %c0_i32_1 = arith.constant 0 : i32
    %c0_i32_2 = arith.constant 0 : i32
    return %c0_i32, %c0_i32_0, %c0_i32_1 : i32, i32, i32
  }
  func.func @transform_2(%arg0: i32) -> (i32, i32) {
    %c0_i32 = arith.constant 0 : i32
    %c0_i32_0 = arith.constant 0 : i32
    %c0_i32_1 = arith.constant 0 : i32
    return %c0_i32, %c0_i32_0 : i32, i32
  }
  func.func @transform_3(%arg0: i32) -> (i32, i32) {
    %c0_i32 = arith.constant 0 : i32
    %c0_i32_0 = arith.constant 0 : i32
    %c0_i32_1 = arith.constant 0 : i32
    return %c0_i32, %c0_i32_0 : i32, i32
  }
  func.func @transform_4(%arg0: i32) -> (i32, i32) {
    %c0_i32 = arith.constant 0 : i32
    %c0_i32_0 = arith.constant 0 : i32
    %c0_i32_1 = arith.constant 0 : i32
    return %c0_i32, %c0_i32_0 : i32, i32
  }
  func.func @transform_5(%arg0: i32) -> (i32, i32, i32) {
    %c0_i32 = arith.constant 0 : i32
    %c0_i32_0 = arith.constant 0 : i32
    %c0_i32_1 = arith.constant 0 : i32
    return %arg0, %c0_i32, %c0_i32_0 : i32, i32, i32
  }
}

</mosaic_0001>

<bundles_post_ra>
// kernel: efficientnetv2_forward.1
= control target key start
LH: loop header
LB: loop body
LE: loop exit
PB: predicated region body
PF: predicated region fallthrough
CT: control target
= control target key end

     0   :  { %s4928_s18 = smov 0   ;;  %s6752_s0 = inlined_call_operand.vmem [shape: f32[2,64,128], index: 0, kind: input, shape index: {}]   ;;  %s6753_s1 = inlined_call_operand.vmem [shape: bf16[13,128,128], index: 1, kind: input, shape index: {}]   ;;  %s6754_s2 = inlined_call_operand.vmem [shape: f32[56,128], index: 2, kind: input, shape index: {}]   ;;  %s6755_s3 = inlined_call_operand.vmem [shape: bf16[128,1024], index: 3, kind: input, shape index: {}]   ;;  %s6756_s4 = inlined_call_operand.vmem [shape: f32[1,1024], index: 4, kind: input, shape index: {}]   ;;  %s6757_s5 = inlined_call_operand.vmem [shape: f32[2,1,1024], index: 5, kind: output, shape index: {}]  }
   0x1 LB: > { %s3613_s19 = sadd.s32 4294967295, %s4893_s18   ;;  %p3617_p0 = scmp.ge.s32.totalorder %s4893_s18, 1  ;;  %s4893_s18 = sphi %s4928_s18, %s15_s18  }
   0x2   : > { %p187_p1 = scmp.lt.s32.totalorder %s4893_s18, 3 }
   0x4   : > { %p188_p2 = pnand %p3617_p0, %p187_p1 }
   0x5   : > { %p214_p3 = scmp.lt.s32.totalorder (!%p188_p2), %s3613_s19, 1 }
   0x6   : > { %191 = sbr.rel (%p188_p2) target bundleno = 2689 (0xa81), region = 40 }
   0xb   : > { %v4537_v0 = vld [vmem:[%s6753_s1 + $0x38] sm:$0xff]  ;;  %v4536_v1 = vld [vmem:[%s6753_s1 + $0x30] sm:$0xff]  ;;  %v4535_v2 = vld [vmem:[%s6753_s1 + $0x28] sm:$0xff]  ;;  %s6803_s19 = smov (!%p214_p3, %s3613_s19), 1  ;;  %v4895_v23 = vmov 0.0  }
   0xc   : > { %306 = vmatpush.bf16.msra.mxu0 %v4537_v0  ;;  %v4534_v3 = vld [vmem:[%s6753_s1 + $0x20] sm:$0xff]  ;;  %v4533_v4 = vld [vmem:[%s6753_s1 + $0x18] sm:$0xff]  ;;  %v4532_v5 = vld [vmem:[%s6753_s1 + $0x10] sm:$0xff]  ;;  %s4529_s7 = sshll.u32 %s6803_s19, 6  ;;  %519 = vst [vmem:[#allocation2 + $0x10] sm:$0x1] %v4895_v23 }
   0xd   : > { %v4531_v6 = vld [vmem:[%s6753_s1 + $0x8] sm:$0xff]  ;;  %s218_s12 = scalar_lea.vmem %s6752_s0, %s4529_s7  ;;  %v4530_v7 = vld [vmem:[%s6753_s1] sm:$0xff]  ;;  %527 = vst [vmem:[#allocation2 + $0x19] sm:$0x1] %v4895_v23  ;;  %s3620_s23 = sshll.u32 %s6803_s19, 3 }
   0xe   : > { %v230_v8 = vld [vmem:[%s218_s12] sm:$0xff]  ;;  %v231_v9 = vld [vmem:[%s218_s12 + $0x8] sm:$0xff]  ;;  %v232_v11 = vld [vmem:[%s218_s12 + $0x10] sm:$0xff]  ;;  %513 = vst [vmem:[#allocation2] sm:$0xff] %v4895_v23  ;;  %s222_s26 = scalar_lea.vmem %s6757_s5, %s3620_s23 }
   0xf   : > { %v238_v10 = vpack.c.bf16 %v231_v9, %v230_v8  ;;  %v233_v12 = vld [vmem:[%s218_s12 + $0x18] sm:$0xff]  ;;  %v234_v14 = vld [vmem:[%s218_s12 + $0x20] sm:$0xff]  ;;  %v235_v15 = vld [vmem:[%s218_s12 + $0x28] sm:$0xff]  ;;  %514 = vst [vmem:[#allocation2 + $0x8] sm:$0x3] %v4895_v23 }
  0x10   : > { %307 = vmatpush.bf16.msra.mxu0 %v4536_v1  ;;  %v239_v13 = vpack.c.bf16 %v233_v12, %v232_v11  ;;  %v240_v16 = vpack.c.bf16 %v235_v15, %v234_v14  ;;  %v236_v17 = vld [vmem:[%s218_s12 + $0x30] sm:$0xff]  ;;  %v237_v18 = vld [vmem:[%s218_s12 + $0x38] sm:$0xff]  ;;  %v4969_v20 = vld [vmem:[%s6754_s2] sm:$0xff]  ;;  %516 = vst [vmem:[#allocation2 + $0x90] sm:$0xff] %v4895_v23 }
  0x11   : > { %v241_v19 = vpack.c.bf16 %v237_v18, %v236_v17  ;;  %v4972_v21 = vperm.slane %v4969_v20, 0  ;;  %v4975_v22 = vperm.slane %v4969_v20, 1  ;;  %517 = vst [vmem:[#allocation2 + $0x98] sm:$0x3] %v4895_v23  ;;  %v5044_v62 = vperm.slane %v4969_v20, 2 }
  0x12   : > { %520 = vst [vmem:[#allocation2 + $0x20] sm:$0x1] %v4895_v23 }
  0x13   : > { %521 = vst [vmem:[#allocation2 + $0x30] sm:$0x1] %v4895_v23 }
  0x14   : > { %308 = vmatpush.bf16.msra.mxu0 %v4535_v2  ;;  %522 = vst [vmem:[#allocation2 + $0x40] sm:$0x1] %v4895_v23 }
  0x15   : > { %523 = vst [vmem:[#allocation2 + $0x50] sm:$0x1] %v4895_v23 }
  0x16   : > { %524 = vst [vmem:[#allocation2 + $0x60] sm:$0x1] %v4895_v23  ;;  %v568_v1 = vld [vmem:[#allocation2 + $0x1] sm:$0xff] }
  0x17   : > { %525 = vst [vmem:[#allocation2 + $0x70] sm:$0x1] %v4895_v23  ;;  %v593_v17 = vld [vmem:[#allocation2 + $0x2] sm:$0xff] }
  0x18   : > { %309 = vmatpush.bf16.msra.mxu0 %v4534_v3  ;;  %526 = vst [vmem:[#allocation2 + $0x80] sm:$0x1] %v4895_v23  ;;  %v5051_v3 = vperm.slane %v4969_v20, 3 }
  0x19   : > { %528 = vst [vmem:[#allocation2 + $0x29] sm:$0x1] %v4895_v23 }
  0x1a   : > { %529 = vst [vmem:[#allocation2 + $0x39] sm:$0x1] %v4895_v23  ;;  %v577_v14 = vmul.f32 %v5051_v3, %v568_v1 }
  0x1b   : > { %530 = vst [vmem:[#allocation2 + $0x49] sm:$0x1] %v4895_v23 }
  0x1c   : > { %310 = vmatpush.bf16.msra.mxu0 %v4533_v4  ;;  %531 = vst [vmem:[#allocation2 + $0x59] sm:$0x1] %v4895_v23 }
  0x1d   : > { %532 = vst [vmem:[#allocation2 + $0x69] sm:$0x1] %v4895_v23 }
  0x1e   : > { %533 = vst [vmem:[#allocation2 + $0x79] sm:$0x1] %v4895_v23 }
  0x1f   : > { %534 = vst [vmem:[#allocation2 + $0x89] sm:$0x1] %v4895_v23 }
  0x20   : > { %311 = vmatpush.bf16.msra.mxu0 %v4532_v5  ;;  %1579 = vst [vmem:[#allocation3] sm:$0xff] %v4895_v23 }
  0x21   : > { %1580 = vst [vmem:[#allocation3 + $0x8] sm:$0x3] %v4895_v23 }
  0x22   : > { %1585 = vst [vmem:[#allocation3 + $0x10] sm:$0x1] %v4895_v23 }
  0x23   : > { %1586 = vst [vmem:[#allocation3 + $0x20] sm:$0x1] %v4895_v23 }
  0x24   : > { %312 = vmatpush.bf16.msra.mxu0 %v4531_v6  ;;  %1587 = vst [vmem:[#allocation3 + $0x30] sm:$0x1] %v4895_v23 }
  0x25   : > { %1588 = vst [vmem:[#allocation3 + $0x40] sm:$0x1] %v4895_v23 }
  0x26   : > { %1589 = vst [vmem:[#allocation3 + $0x50] sm:$0x1] %v4895_v23 }
  0x27   : > { %1590 = vst [vmem:[#allocation3 + $0x60] sm:$0x1] %v4895_v23 }
  0x28   : > { %313 = vmatpush.bf16.msra.mxu0 %v4530_v7  ;;  %1591 = vst [vmem:[#allocation3 + $0x70] sm:$0x1] %v4895_v23 }
  0x29   : > { %1592 = vst [vmem:[#allocation3 + $0x80] sm:$0x1] %v4895_v23 }
  0x2a   : > { %1593 = vst [vmem:[#allocation3 + $0x19] sm:$0x1] %v4895_v23 }
  0x2b   : > { %314 = vmatmul.bf16.vlgmr.msra.gmra.mxu0 %v238_v10  ;;  %1594 = vst [vmem:[#allocation3 + $0x29] sm:$0x1] %v4895_v23  ;;  %v5062_v10 = vperm.slane %v4969_v20, 4 }
  0x2c   : > { %1595 = vst [vmem:[#allocation3 + $0x39] sm:$0x1] %v4895_v23 }
  0x2d   : > { %1596 = vst [vmem:[#allocation3 + $0x49] sm:$0x1] %v4895_v23 }
  0x2e   : > { %1597 = vst [vmem:[#allocation3 + $0x59] sm:$0x1] %v4895_v23 }
  0x2f   : > { %1598 = vst [vmem:[#allocation3 + $0x69] sm:$0x1] %v4895_v23 }
  0x30   : > { %1599 = vst [vmem:[#allocation3 + $0x79] sm:$0x1] %v4895_v23 }
  0x31   : > { %1600 = vst [vmem:[#allocation3 + $0x89] sm:$0x1] %v4895_v23 }
  0x32   : > { %2323 = vst [vmem:[#allocation4] sm:$0x3f] %v4895_v23 }
  0x33   : > { %2325 = vst [vmem:[#allocation4 + $0x28] sm:$0x3f] %v4895_v23 }
  0x34   : > { %2327 = vst [vmem:[#allocation4 + $0x8] sm:$0x1] %v4895_v23 }
  0x35   : > { %2328 = vst [vmem:[#allocation4 + $0x10] sm:$0x1] %v4895_v23 }
  0x36   : > { %2329 = vst [vmem:[#allocation4 + $0x18] sm:$0x1] %v4895_v23 }
  0x37   : > { %2330 = vst [vmem:[#allocation4 + $0x20] sm:$0x1] %v4895_v23 }
  0x38   : > { %2331 = vst [vmem:[#allocation4 + $0xd] sm:$0x1] %v4895_v23 }
  0x39   : > { %2332 = vst [vmem:[#allocation4 + $0x15] sm:$0x1] %v4895_v23 }
  0x3a   : > { %2333 = vst [vmem:[#allocation4 + $0x1d] sm:$0x1] %v4895_v23 }
  0x3b   : > { %319 = vmatmul.bf16.gmra.mxu0 %v239_v13  ;;  %v552_v13 = vmul.f32 0.0, %v5044_v62  ;;  %2334 = vst [vmem:[#allocation4 + $0x25] sm:$0x1] %v4895_v23  ;;  %v5120_v23 = vld [vmem:[%s6754_s2 + $0x8] sm:$0xff] }
  0x3c   : > { %v5134_v1 = vperm.slane %v5120_v23, 0 }
  0x4b   : > { %324 = vmatmul.bf16.gmra.mxu0 %v240_v16 }
  0x5b   : > { %329 = vmatmul.bf16.gmra.mxu0 %v241_v19 }
  0xa8   : > { %v315_v24 = vpop.f32.mrf.mxu0 }
  0xa9   : > { %v336_v25 = vmul.f32 %v4972_v21, %v315_v24  ;;  %v5079_v24 = vperm.slane %v4969_v20, 5 }
  0xab   : > { %v4983_v26 = vadd.f32 %v4975_v22, %v336_v25 }
  0xad   : > { %v3653_v27 = vmul.f32 -1.442695, %v4983_v26 }
  0xaf   : > { %4709 = vpow2.f32 %v3653_v27 }
  0xb0   : > { %v317_v28 = vpop.f32.mrf.mxu0 }
  0xb1   : > { %v337_v29 = vmul.f32 %v4972_v21, %v317_v28  ;;  %v585_v28 = vadd.f32 %v577_v14, %v552_v13 }
  0xb3   : > { %v4997_v30 = vadd.f32 %v4975_v22, %v337_v29  ;;  %v602_v29 = vmul.f32 %v5062_v10, %v593_v17 }
  0xb5   : > { %v4710_v31 = vpop.eup %4709  ;;  %v3654_v32 = vmul.f32 -1.442695, %v4997_v30 }
  0xb6   : > { %v377_v33 = vadd.f32 1.0, %v4710_v31 }
  0xb7   : > { %4711 = vpow2.f32 %v3654_v32 }
  0xb8   : > { %4713 = vrcp.f32 %v377_v33  ;;  %v320_v34 = vpop.f32.mrf.mxu0  ;;  %v396_v45 = vand.u32 2147483648, %v377_v33  ;;  %v394_v47 = vand.u32 2147483647, %v377_v33  ;;  %vm390_vm1 = vweird.f32 %v377_v33 }
  0xb9   : > { %v338_v35 = vmul.f32 %v4972_v21, %v320_v34 }
  0xba   : > { %v397_v53 = vor.u32 1.1754944e-38, %v396_v45  ;;  %vm395_vm3 = vcmp.eq.f32.partialorder %v394_v47, 8.507059e+37  ;;  %v610_v45 = vadd.f32 %v602_v29, %v585_v28 }
  0xbb   : > { %v5010_v36 = vadd.f32 %v4975_v22, %v338_v35  ;;  %v5092_v35 = vperm.slane %v4969_v20, 6 }
  0xbd   : > { %v4712_v37 = vpop.eup %4711  ;;  %v3655_v38 = vmul.f32 -1.442695, %v5010_v36 }
  0xbe   : > { %v4714_v39 = vpop.eup %4713  ;;  %v5014_v40 = vadd.f32 1.0, %v4712_v37 }
  0xbf   : > { %v386_v41 = vmul.f32 %v4714_v39, %v377_v33  ;;  %4715 = vpow2.f32 %v3655_v38  ;;  %vm391_vm0 = vweird.f32 %v4714_v39 }
  0xc0   : > { %4717 = vrcp.f32 %v5014_v40  ;;  %v322_v42 = vpop.f32.mrf.mxu0  ;;  %vm392_vm2 = vmor %vm390_vm1, %vm391_vm0  ;;  %v409_v5 = vand.u32 2147483647, %v5014_v40  ;;  %v411_v6 = vand.u32 2147483648, %v5014_v40  ;;  %vm405_vm5 = vweird.f32 %v5014_v40 }
  0xc1   : > { %v387_v43 = vsub.f32 1.0, %v386_v41  ;;  %v339_v44 = vmul.f32 %v4972_v21, %v322_v42 }
  0xc2   : > { %v412_v18 = vor.u32 1.1754944e-38, %v411_v6  ;;  %vm410_vm7 = vcmp.eq.f32.partialorder %v409_v5, 8.507059e+37  ;;  %v5139_v5 = vperm.slane %v5120_v23, 1 }
  0xc3   : > { %v388_v46 = vmul.f32 %v4714_v39, %v387_v43  ;;  %v5024_v48 = vadd.f32 %v4975_v22, %v339_v44 }
  0xc5   : > { %v4716_v49 = vpop.eup %4715  ;;  %v389_v50 = vadd.f32 %v4714_v39, %v388_v46  ;;  %v3656_v51 = vmul.f32 -1.442695, %v5024_v48 }
  0xc6   : > { %v4718_v52 = vpop.eup %4717  ;;  %v5030_v54 = vadd.f32 1.0, %v4716_v49 }
  0xc7   : > { %v393_v55 = vsel %vm392_vm2, %v4714_v39, %v389_v50  ;;  %v401_v56 = vmul.f32 %v4718_v52, %v5014_v40  ;;  %4719 = vpow2.f32 %v3656_v51  ;;  %vm406_vm4 = vweird.f32 %v4718_v52 }
  0xc8   : > { %v398_v57 = vsel %vm395_vm3, %v397_v53, %v393_v55  ;;  %4721 = vrcp.f32 %v5030_v54  ;;  %v325_v58 = vpop.f32.mrf.mxu0  ;;  %vm5066_vm6 = vmor %vm405_vm5, %vm406_vm4  ;;  %v426_v27 = vand.u32 2147483648, %v5030_v54  ;;  %v424_v33 = vand.u32 2147483647, %v5030_v54 }
  0xc9   : > { %v5037_v59 = vmul.f32 %v398_v57, %v4983_v26  ;;  %v402_v60 = vsub.f32 1.0, %v401_v56  ;;  %v340_v61 = vmul.f32 %v4972_v21, %v325_v58  ;;  %vm420_vm9 = vweird.f32 %v5030_v54 }
  0xca   : > { %v427_v43 = vor.u32 1.1754944e-38, %v426_v27  ;;  %vm425_vm11 = vcmp.eq.f32.partialorder %v424_v33, 8.507059e+37 }
  0xcb   : > { %535 = vst [vmem:[#allocation2 + $0x11] sm:$0xff] %v5037_v59  ;;  %v403_v63 = vmul.f32 %v4718_v52, %v402_v60  ;;  %v5048_v0 = vadd.f32 %v4975_v22, %v340_v61  ;;  %v652_v61 = vmul.f32 %v5092_v35, %v5037_v59 }
  0xcd   : > { %v4720_v2 = vpop.eup %4719  ;;  %v404_v4 = vadd.f32 %v4718_v52, %v403_v63  ;;  %v3657_v9 = vmul.f32 -1.442695, %v5048_v0  ;;  %v5131_v63 = vperm.slane %v4969_v20, 7 }
  0xce   : > { %v4722_v7 = vpop.eup %4721  ;;  %v5058_v8 = vadd.f32 1.0, %v4720_v2 }
  0xcf   : > { %v416_v12 = vmul.f32 %v4722_v7, %v5030_v54  ;;  %v408_v15 = vsel %vm5066_vm6, %v4718_v52, %v404_v4  ;;  %vm421_vm8 = vweird.f32 %v4722_v7 }
  0xd0   : > { %4723 = vrcp.f32 %v5058_v8  ;;  %v327_v16 = vpop.f32.mrf.mxu0  ;;  %v413_v26 = vsel %vm410_vm7, %v412_v18, %v408_v15  ;;  %vm422_vm10 = vmor %vm420_vm9, %vm421_vm8  ;;  %v439_v51 = vand.u32 2147483647, %v5058_v8  ;;  %v441_v55 = vand.u32 2147483648, %v5058_v8 }
  0xd1   : > { %v417_v19 = vsub.f32 1.0, %v416_v12  ;;  %4725 = vpow2.f32 %v3657_v9  ;;  %v341_v25 = vmul.f32 %v4972_v21, %v327_v16  ;;  %v5097_v38 = vmul.f32 %v413_v26, %v4997_v30 }
  0xd2   : > { %v544_v31 = vld [vmem:[#allocation2 + $0x10] sm:$0xff]  ;;  %vm435_vm13 = vweird.f32 %v5058_v8  ;;  %vm440_vm15 = vcmp.eq.f32.partialorder %v439_v51, 8.507059e+37  ;;  %v442_v20 = vor.u32 1.1754944e-38, %v441_v55 }
  0xd3   : > { %v418_v32 = vmul.f32 %v4722_v7, %v417_v19  ;;  %v5089_v34 = vadd.f32 %v4975_v22, %v341_v25  ;;  %v627_v42 = vmul.f32 %v5079_v24, %v544_v31  ;;  %v553_v53 = vmul.f32 %v5044_v62, %v544_v31  ;;  %536 = vst [vmem:[#allocation2 + $0x21] sm:$0xff] %v5097_v38  ;;  %v594_v56 = vld [vmem:[#allocation2 + $0x12] sm:$0xff] }
  0xd4   : > { %v5149_v14 = vmul.f32 %v5092_v35, %v5097_v38  ;;  %v677_v26 = vmul.f32 %v5131_v63, %v594_v56  ;;  %v5163_v29 = vmul.f32 %v5139_v5, %v5097_v38  ;;  %v5166_v31 = vperm.slane %v5120_v23, 2 }
  0xd5   : > { %v419_v39 = vadd.f32 %v4722_v7, %v418_v32  ;;  %v3658_v40 = vmul.f32 -1.442695, %v5089_v34  ;;  %v635_v60 = vadd.f32 %v627_v42, %v610_v45 }
  0xd6   : > { %v4724_v37 = vpop.eup %4723 }
  0xd7   : > { %v4726_v41 = vpop.eup %4725  ;;  %v431_v44 = vmul.f32 %v4724_v37, %v5058_v8  ;;  %v423_v46 = vsel %vm422_vm10, %v4722_v7, %v419_v39  ;;  %4727 = vpow2.f32 %v3658_v40  ;;  %vm436_vm12 = vweird.f32 %v4724_v37 }
  0xd8   : > { %v5105_v30 = vadd.f32 1.0, %v4726_v41  ;;  %v330_v47 = vpop.f32.mrf.mxu0  ;;  %v428_v49 = vsel %vm425_vm11, %v427_v43, %v423_v46  ;;  %vm437_vm14 = vmor %vm435_vm13, %vm436_vm12  ;;  %v660_v12 = vadd.f32 %v652_v61, %v635_v60  ;;  %v579_v8 = vmul.f32 %v5051_v3, %v5097_v38  ;;  %v4545_v46 = vld [vmem:[%s6753_s1 + $0x78] sm:$0xff]  ;;  %v4544_v60 = vld [vmem:[%s6753_s1 + $0x70] sm:$0xff] }
  0xd9   : > { %v432_v50 = vsub.f32 1.0, %v431_v44  ;;  %v342_v52 = vmul.f32 %v4972_v21, %v330_v47  ;;  %v5113_v54 = vmul.f32 %v428_v49, %v5010_v36  ;;  %v578_v36 = vmul.f32 %v5051_v3, %v5037_v59  ;;  %1037 = vmatpush.bf16.msra.mxu1 %v4545_v46 }
  0xda   : > { %4729 = vrcp.f32 %v5105_v30  ;;  %v603_v59 = vmul.f32 %v5062_v10, %v594_v56  ;;  %v454_v16 = vand.u32 2147483647, %v5105_v30  ;;  %v5152_v18 = vld [vmem:[#allocation2 + $0x20] sm:$0xff]  ;;  %v456_v28 = vand.u32 2147483648, %v5105_v30 }
  0xdb   : > { %v433_v57 = vmul.f32 %v4724_v37, %v432_v50  ;;  %v5123_v58 = vadd.f32 %v4975_v22, %v342_v52  ;;  %537 = vst [vmem:[#allocation2 + $0x31] sm:$0xff] %v5113_v54  ;;  %v586_v7 = vadd.f32 %v578_v36, %v553_v53  ;;  %v5170_v32 = vld [vmem:[#allocation2 + $0x22] sm:$0xff]  ;;  %v5176_v40 = vadd.f32 %v677_v26, %v660_v12 }
  0xdc   : > { %v580_v38 = vmul.f32 %v5051_v3, %v5113_v54  ;;  %vm450_vm0 = vweird.f32 %v5105_v30  ;;  %vm5181_vm1 = vcmp.eq.f32.partialorder %v454_v16, 8.507059e+37  ;;  %v5187_v42 = vmul.f32 %v5092_v35, %v5113_v54 }
  0xdd   : > { %v434_v2 = vadd.f32 %v4724_v37, %v433_v57  ;;  %v3659_v4 = vmul.f32 -1.442695, %v5123_v58  ;;  %v4728_v6 = vpop.eup %4727  ;;  %v611_v27 = vadd.f32 %v603_v59, %v586_v7  ;;  %v604_v47 = vmul.f32 %v5062_v10, %v5170_v32  ;;  %1038 = vmatpush.bf16.msra.mxu1 %v4544_v60 }
  0xde   : > { %v5143_v11 = vadd.f32 1.0, %v4728_v6  ;;  %v457_v50 = vor.u32 1.1754944e-38, %v456_v28  ;;  %v5205_v52 = vmul.f32 %v5139_v5, %v5113_v54  ;;  %v703_v26 = vmul.f32 %v5134_v1, %v5152_v18 }
  0xdf   : > { %v438_v9 = vsel %vm437_vm14, %v4724_v37, %v434_v2  ;;  %4731 = vpow2.f32 %v3659_v4 }
  0xe0   : > { %v4730_v13 = vpop.eup %4729  ;;  %v443_v15 = vsel %vm440_vm15, %v442_v20, %v438_v9  ;;  %v332_v17 = vpop.f32.mrf.mxu0  ;;  %4733 = vrcp.f32 %v5143_v11  ;;  %vm465_vm4 = vweird.f32 %v5143_v11  ;;  %v469_v36 = vand.u32 2147483647, %v5143_v11 }
  0xe1   : > { %v5155_v19 = vmul.f32 %v443_v15, %v5024_v48  ;;  %v446_v25 = vmul.f32 %v4730_v13, %v5105_v30  ;;  %v554_v48 = vmul.f32 %v5044_v62, %v5152_v18  ;;  %v343_v39 = vmul.f32 %v4972_v21, %v332_v17 }
  0xe2   : > { %v5172_v33 = vld [vmem:[#allocation2 + $0x30] sm:$0xff]  ;;  %vm451_vm2 = vweird.f32 %v4730_v13  ;;  %v471_v20 = vand.u32 2147483648, %v5143_v11  ;;  %vm5244_vm6 = vcmp.eq.f32.partialorder %v469_v36, 8.507059e+37 }
  0xe3   : > { %538 = vst [vmem:[#allocation2 + $0x41] sm:$0xff] %v5155_v19  ;;  %v447_v37 = vsub.f32 1.0, %v446_v25  ;;  %v555_v44 = vmul.f32 %v5044_v62, %v5172_v33  ;;  %v5192_v45 = vadd.f32 %v4975_v22, %v343_v39  ;;  %v5199_v49 = vld [vmem:[#allocation2 + $0x32] sm:$0xff]  ;;  %v587_v55 = vadd.f32 %v579_v8, %v554_v48  ;;  %vm452_vm3 = vmor %vm450_vm0, %vm451_vm2 }
  0xe4   : > { %v628_v22 = vmul.f32 %v5079_v24, %v5152_v18  ;;  %v605_v61 = vmul.f32 %v5062_v10, %v5199_v49  ;;  %v629_v6 = vmul.f32 %v5079_v24, %v5172_v33  ;;  %v472_v41 = vor.u32 1.1754944e-38, %v471_v20 }
  0xe5   : > { %v4732_v43 = vpop.eup %4731  ;;  %v448_v21 = vmul.f32 %v4730_v13, %v447_v37  ;;  %v3660_v57 = vmul.f32 -1.442695, %v5192_v45  ;;  %v588_v4 = vadd.f32 %v580_v38, %v555_v44  ;;  %v612_v8 = vadd.f32 %v604_v47, %v587_v55  ;;  %v4542_v47 = vld [vmem:[%s6753_s1 + $0x60] sm:$0xff] }
  0xe6   : > { %v5201_v51 = vadd.f32 1.0, %v4732_v43  ;;  %v4734_v53 = vpop.eup %4733  ;;  %v636_v48 = vadd.f32 %v628_v22, %v611_v27  ;;  %v655_v44 = vmul.f32 %v5092_v35, %v5155_v19 }
  0xe7   : > { %v449_v56 = vadd.f32 %v4730_v13, %v448_v21  ;;  %v461_v54 = vmul.f32 %v4734_v53, %v5143_v11  ;;  %vm466_vm5 = vweird.f32 %v4734_v53  ;;  %v613_v28 = vadd.f32 %v605_v61, %v588_v4 }
  0xe8   : > { %4735 = vrcp.f32 %v5201_v51  ;;  %v484_v12 = vand.u32 2147483647, %v5201_v51  ;;  %v486_v17 = vand.u32 2147483648, %v5201_v51  ;;  %v637_v43 = vadd.f32 %v629_v6, %v612_v8  ;;  %vm467_vm7 = vmor %vm465_vm4, %vm466_vm5  ;;  %v4541_v6 = vld [vmem:[%s6753_s1 + $0x58] sm:$0xff] }
  0xe9   : > { %v453_v2 = vsel %vm452_vm3, %v4730_v13, %v449_v56  ;;  %4737 = vpow2.f32 %v3660_v57  ;;  %v462_v59 = vsub.f32 1.0, %v461_v54  ;;  %v4543_v13 = vld [vmem:[%s6753_s1 + $0x68] sm:$0xff]  ;;  %vm480_vm8 = vweird.f32 %v5201_v51 }
  0xea   : > { %v5224_v7 = vld [vmem:[#allocation2 + $0x40] sm:$0xff]  ;;  %v458_v30 = vsel %vm5181_vm1, %v457_v50, %v453_v2  ;;  %vm5257_vm9 = vcmp.eq.f32.partialorder %v484_v12, 8.507059e+37  ;;  %1039 = vmatpush.bf16.msra.mxu1 %v4543_v13  ;;  %v487_v22 = vor.u32 1.1754944e-38, %v486_v17  ;;  %v661_v36 = vadd.f32 %v5149_v14, %v636_v48  ;;  %v4540_v48 = vld [vmem:[%s6753_s1 + $0x50] sm:$0xff] }
  0xeb   : > { %v5230_v9 = vmul.f32 %v458_v30, %v5048_v0  ;;  %v556_v15 = vmul.f32 %v5044_v62, %v5224_v7  ;;  %v463_v16 = vmul.f32 %v4734_v53, %v462_v59  ;;  %v630_v25 = vmul.f32 %v5079_v24, %v5224_v7  ;;  %v5248_v39 = vld [vmem:[#allocation2 + $0x42] sm:$0xff] }
  0xec   : > { %v581_v0 = vmul.f32 %v5051_v3, %v5155_v19  ;;  %v606_v54 = vmul.f32 %v5062_v10, %v5248_v39  ;;  %v662_v2 = vadd.f32 %v5187_v42, %v637_v43  ;;  %v678_v14 = vmul.f32 %v5131_v63, %v5170_v32 }
  0xed   : > { %539 = vst [vmem:[#allocation2 + $0x51] sm:$0xff] %v5230_v9  ;;  %v464_v38 = vadd.f32 %v4734_v53, %v463_v16  ;;  %v638_v50 = vadd.f32 %v630_v25, %v613_v28  ;;  %v656_v20 = vmul.f32 %v5092_v35, %v5230_v9  ;;  %v679_v42 = vmul.f32 %v5131_v63, %v5199_v49 }
  0xee   : > { %v4736_v37 = vpop.eup %4735  ;;  %v589_v11 = vadd.f32 %v581_v0, %v556_v15  ;;  %1040 = vmatpush.bf16.msra.mxu1 %v4542_v47  ;;  %v680_v12 = vmul.f32 %v5131_v63, %v5248_v39  ;;  %v686_v16 = vadd.f32 %v678_v14, %v661_v36  ;;  %v705_v43 = vmul.f32 %v5134_v1, %v5224_v7 }
  0xef   : > { %v4738_v21 = vpop.eup %4737  ;;  %v476_v46 = vmul.f32 %v4736_v37, %v5201_v51  ;;  %v468_v55 = vsel %vm467_vm7, %v4734_v53, %v464_v38  ;;  %v582_v53 = vmul.f32 %v5051_v3, %v5230_v9  ;;  %vm481_vm10 = vweird.f32 %v4736_v37 }
  0xf0   : > { %v5264_v56 = vadd.f32 1.0, %v4738_v21  ;;  %v473_v57 = vsel %vm5244_vm6, %v472_v41, %v468_v55  ;;  %v663_v30 = vadd.f32 %v655_v44, %v638_v50  ;;  %v614_v59 = vadd.f32 %v606_v54, %v589_v11  ;;  %vm482_vm11 = vmor %vm480_vm8, %vm481_vm10 }
  0xf1   : > { %v477_v60 = vsub.f32 1.0, %v476_v46  ;;  %v5272_v61 = vmul.f32 %v473_v57, %v5089_v34  ;;  %v687_v0 = vadd.f32 %v679_v42, %v662_v2  ;;  %v704_v41 = vmul.f32 %v5134_v1, %v5172_v33 }
  0xf2   : > { %4739 = vrcp.f32 %v5264_v56  ;;  %v499_v8 = vand.u32 2147483647, %v5264_v56  ;;  %v501_v17 = vand.u32 2147483648, %v5264_v56  ;;  %vm495_vm12 = vweird.f32 %v5264_v56  ;;  %1041 = vmatpush.bf16.msra.mxu1 %v4541_v6 }
  0xf3   : > { %v478_v4 = vmul.f32 %v4736_v37, %v477_v60  ;;  %540 = vst [vmem:[#allocation2 + $0x61] sm:$0xff] %v5272_v61  ;;  %v688_v51 = vadd.f32 %v680_v12, %v663_v30  ;;  %v583_v33 = vmul.f32 %v5051_v3, %v5272_v61  ;;  %v657_v7 = vmul.f32 %v5092_v35, %v5272_v61  ;;  %v4539_v60 = vld [vmem:[%s6753_s1 + $0x48] sm:$0xff] }
  0xf4   : > { %v548_v34 = vld [vmem:[#allocation2 + $0x50] sm:$0xff]  ;;  %vm5316_vm13 = vcmp.eq.f32.partialorder %v499_v8, 8.507059e+37  ;;  %v502_v27 = vor.u32 1.1754944e-38, %v501_v17  ;;  %v711_v36 = vadd.f32 %v703_v26, %v5176_v40  ;;  %v713_v2 = vadd.f32 %v705_v43, %v687_v0 }
  0xf5   : > { %v479_v13 = vadd.f32 %v4736_v37, %v478_v4  ;;  %v557_v15 = vmul.f32 %v5044_v62, %v548_v34  ;;  %v631_v25 = vmul.f32 %v5079_v24, %v548_v34  ;;  %v5303_v38 = vld [vmem:[#allocation2 + $0x52] sm:$0xff]  ;;  %v706_v46 = vmul.f32 %v5134_v1, %v548_v34 }
  0xf6   : > { %1042 = vmatpush.bf16.msra.mxu1 %v4540_v48  ;;  %v730_v8 = vmul.f32 %v5139_v5, %v5155_v19  ;;  %v731_v40 = vmul.f32 %v5139_v5, %v5230_v9  ;;  %v732_v0 = vmul.f32 %v5139_v5, %v5272_v61 }
  0xf7   : > { %v483_v28 = vsel %vm482_vm11, %v4736_v37, %v479_v13  ;;  %v590_v37 = vadd.f32 %v582_v53, %v557_v15  ;;  %v639_v21 = vadd.f32 %v631_v25, %v614_v59  ;;  %v712_v53 = vadd.f32 %v704_v41, %v686_v16  ;;  %v4538_v16 = vld [vmem:[%s6753_s1 + $0x40] sm:$0xff] }
  0xf8   : > { %v4740_v44 = vpop.eup %4739  ;;  %v488_v18 = vsel %vm5257_vm9, %v487_v22, %v483_v28  ;;  %v607_v22 = vmul.f32 %v5062_v10, %v5303_v38  ;;  %v714_v14 = vadd.f32 %v706_v46, %v688_v51  ;;  %v736_v28 = vadd.f32 %v5163_v29, %v711_v36 }
  0xf9   : > { %v5313_v47 = vmul.f32 %v488_v18, %v5123_v58  ;;  %v491_v50 = vmul.f32 %v4740_v44, %v5264_v56  ;;  %v664_v11 = vadd.f32 %v656_v20, %v639_v21  ;;  %v681_v58 = vmul.f32 %v5131_v63, %v5303_v38 }
  0xfa   : > { %v549_v54 = vld [vmem:[#allocation2 + $0x60] sm:$0xff]  ;;  %v615_v6 = vadd.f32 %v607_v22, %v590_v37  ;;  %vm496_vm14 = vweird.f32 %v4740_v44  ;;  %1043 = vmatpush.bf16.msra.mxu1 %v4539_v60  ;;  %v737_v51 = vadd.f32 %v5205_v52, %v712_v53  ;;  %v738_v41 = vadd.f32 %v730_v8, %v713_v2 }
  0xfb   : > { %541 = vst [vmem:[#allocation2 + $0x71] sm:$0xff] %v5313_v47  ;;  %v492_v57 = vsub.f32 1.0, %v491_v50  ;;  %v558_v4 = vmul.f32 %v5044_v62, %v549_v54  ;;  %v632_v30 = vmul.f32 %v5079_v24, %v549_v54  ;;  %v599_v59 = vld [vmem:[#allocation2 + $0x62] sm:$0xff]  ;;  %v689_v20 = vadd.f32 %v681_v58, %v664_v11  ;;  %vm497_vm15 = vmor %vm495_vm12, %vm496_vm14 }
  0xfc   : > { %v707_v42 = vmul.f32 %v5134_v1, %v549_v54  ;;  %v584_v17 = vmul.f32 %v5051_v3, %v5313_v47  ;;  %v608_v19 = vmul.f32 %v5062_v10, %v599_v59  ;;  %v682_v9 = vmul.f32 %v5131_v63, %v599_v59 }
  0xfd   : > { %v493_v34 = vmul.f32 %v4740_v44, %v492_v57  ;;  %v591_v12 = vadd.f32 %v583_v33, %v558_v4  ;;  %v640_v13 = vadd.f32 %v632_v30, %v615_v6  ;;  %v739_v43 = vadd.f32 %v731_v40, %v714_v14 }
  0xfe   : > { %v715_v25 = vadd.f32 %v707_v42, %v689_v20  ;;  %v753_v56 = vmul.f32 %v5166_v31, %v5170_v32  ;;  %v754_v21 = vmul.f32 %v5166_v31, %v5199_v49  ;;  %1044 = vmatpush.bf16.msra.mxu1 %v4538_v16  ;;  %v756_v32 = vmul.f32 %v5166_v31, %v5303_v38 }
  0xff   : > { %v494_v15 = vadd.f32 %v4740_v44, %v493_v34  ;;  %v665_v26 = vadd.f32 %v657_v7, %v640_v13  ;;  %v616_v37 = vadd.f32 %v608_v19, %v591_v12  ;;  %v733_v7 = vmul.f32 %v5139_v5, %v5313_v47 }
 0x100   : > { %v740_v52 = vadd.f32 %v732_v0, %v715_v25  ;;  %v761_v22 = vadd.f32 %v753_v56, %v736_v28  ;;  %v658_v57 = vmul.f32 %v5092_v35, %v5313_v47  ;;  %v5376_v38 = vperm.slane %v5120_v23, 3  ;;  %v726_v56 = vld [vmem:[#allocation2 + $0x91] sm:$0xff] }
 0x101   : > { %v498_v48 = vsel %vm497_vm15, %v4740_v44, %v494_v15  ;;  %v755_v44 = vmul.f32 %v5166_v31, %v5248_v39  ;;  %v690_v55 = vadd.f32 %v682_v9, %v665_v26  ;;  %v762_v39 = vadd.f32 %v754_v21, %v737_v51 }
 0x102   : > { %v503_v3 = vsel %vm5316_vm13, %v502_v27, %v498_v48  ;;  %v550_v18 = vld [vmem:[#allocation2 + $0x70] sm:$0xff]  ;;  %v757_v27 = vmul.f32 %v5166_v31, %v599_v59  ;;  %v5380_v2 = vperm.slane %v5120_v23, 4  ;;  %v770_v6 = vmul.f32 %v5376_v38, %v761_v22 }
 0x103   : > { %v5360_v46 = vmul.f32 %v503_v3, %v5192_v45  ;;  %v633_v29 = vmul.f32 %v5079_v24, %v550_v18  ;;  %v559_v50 = vmul.f32 %v5044_v62, %v550_v18  ;;  %v708_v33 = vmul.f32 %v5134_v1, %v550_v18  ;;  %v600_v49 = vld [vmem:[#allocation2 + $0x72] sm:$0xff] }
 0x104   : > { %v763_v58 = vadd.f32 %v755_v44, %v738_v41  ;;  %v764_v62 = vadd.f32 %v756_v32, %v739_v43  ;;  %v765_v60 = vadd.f32 %v757_v27, %v740_v52  ;;  %v758_v53 = vmul.f32 %v5166_v31, %v600_v49 }
 0x105   : > { %542 = vst [vmem:[#allocation2 + $0x81] sm:$0xff] %v5360_v46  ;;  %v641_v45 = vadd.f32 %v633_v29, %v616_v37  ;;  %v716_v11 = vadd.f32 %v708_v33, %v690_v55  ;;  %v592_v54 = vadd.f32 %v584_v17, %v559_v50  ;;  %v771_v30 = vmul.f32 %v5376_v38, %v762_v39  ;;  %v751_v50 = vld [vmem:[#allocation2 + $0x92] sm:$0xff] }
 0x106   : > { %v772_v14 = vmul.f32 %v5376_v38, %v763_v58  ;;  %v609_v34 = vmul.f32 %v5062_v10, %v600_v49  ;;  %v773_v20 = vmul.f32 %v5376_v38, %v764_v62  ;;  %v774_v42 = vmul.f32 %v5376_v38, %v765_v60 }
 0x107   : > { %v741_v36 = vadd.f32 %v733_v7, %v716_v11  ;;  %v666_v4 = vadd.f32 %v658_v57, %v641_v45  ;;  %v683_v12 = vmul.f32 %v5131_v63, %v600_v49  ;;  %v5390_v13 = vadd.f32 %v5380_v2, %v770_v6 }
 0x108   : > { %v5393_v8 = vadd.f32 %v5380_v2, %v771_v30  ;;  %v5396_v40 = vadd.f32 %v5380_v2, %v772_v14  ;;  %v617_v15 = vadd.f32 %v609_v34, %v592_v54  ;;  %v710_v10 = vmul.f32 0.0, %v5134_v1 }
 0x109   : > { %v766_v59 = vadd.f32 %v758_v53, %v741_v36  ;;  %v5401_v25 = vadd.f32 %v5380_v2, %v773_v20  ;;  %v691_v26 = vadd.f32 %v683_v12, %v666_v4  ;;  %v5406_v28 = vadd.f32 %v5380_v2, %v774_v42 }
 0x10a   : > { %v659_v48 = vmul.f32 %v5092_v35, %v5360_v46  ;;  %v3661_v51 = vmul.f32 -1.442695, %v5390_v13  ;;  %v3662_v41 = vmul.f32 -1.442695, %v5393_v8  ;;  %v3663_v43 = vmul.f32 -1.442695, %v5396_v40 }
 0x10b   : > { %v775_v17 = vmul.f32 %v5376_v38, %v766_v59  ;;  %v3664_v37 = vmul.f32 -1.442695, %v5401_v25  ;;  %v3665_v44 = vmul.f32 -1.442695, %v5406_v28  ;;  %v735_v33 = vmul.f32 %v5139_v5, %v726_v56 }
 0x10c   : > { %v625_v16 = vld [vmem:[#allocation2 + $0x80] sm:$0xff]  ;;  %4741 = vpow2.f32 %v3661_v51  ;;  %v760_v45 = vmul.f32 %v5166_v31, %v751_v50 }
 0x10d   : > { %v634_v0 = vmul.f32 %v5079_v24, %v625_v16  ;;  %v675_v19 = vld [vmem:[#allocation2 + $0x82] sm:$0xff]  ;;  %v709_v9 = vmul.f32 %v5134_v1, %v625_v16  ;;  %v734_v24 = vmul.f32 %v5139_v5, %v5360_v46  ;;  %v5419_v35 = vadd.f32 %v5380_v2, %v775_v17 }
 0x10e   : > { %v684_v1 = vmul.f32 %v5131_v63, %v675_v19  ;;  %v759_v21 = vmul.f32 %v5166_v31, %v675_v19  ;;  %4743 = vpow2.f32 %v3662_v41 }
 0x10f   : > { %v642_v3 = vadd.f32 %v634_v0, %v617_v15  ;;  %v717_v18 = vadd.f32 %v709_v9, %v691_v26  ;;  %4745 = vpow2.f32 %v3663_v43  ;;  %v3666_v63 = vmul.f32 -1.442695, %v5419_v35 }
 0x110   : > { %4747 = vpow2.f32 %v3664_v37 }
 0x111   : > { %v667_v29 = vadd.f32 %v659_v48, %v642_v3  ;;  %v742_v52 = vadd.f32 %v734_v24, %v717_v18  ;;  %4749 = vpow2.f32 %v3665_v44 }
 0x112   : > { %v4742_v27 = vpop.eup %4741  ;;  %4751 = vpow2.f32 %v3666_v63 }
 0x113   : > { %v692_v55 = vadd.f32 %v684_v1, %v667_v29  ;;  %v767_v32 = vadd.f32 %v759_v21, %v742_v52  ;;  %v5429_v58 = vadd.f32 1.0, %v4742_v27 }
 0x114   : > { %v4744_v22 = vpop.eup %4743 }
 0x115   : > { %v718_v49 = vadd.f32 %v710_v10, %v692_v55  ;;  %v776_v7 = vmul.f32 %v5376_v38, %v767_v32  ;;  %v4746_v62 = vpop.eup %4745  ;;  %v5431_v5 = vadd.f32 1.0, %v4744_v22  ;;  %4753 = vrcp.f32 %v5429_v58 }
 0x116   : > { %v4748_v57 = vpop.eup %4747  ;;  %v5434_v31 = vadd.f32 1.0, %v4746_v62  ;;  %v830_v20 = vand.u32 2147483648, %v5429_v58  ;;  %vm824_vm0 = vweird.f32 %v5429_v58  ;;  %v828_v0 = vand.u32 2147483647, %v5429_v58 }
 0x117   : > { %v743_v11 = vadd.f32 %v735_v33, %v718_v49  ;;  %v5427_v39 = vadd.f32 %v5380_v2, %v776_v7  ;;  %v5437_v36 = vadd.f32 1.0, %v4748_v57  ;;  %v4750_v53 = vpop.eup %4749  ;;  %v843_v10 = vand.u32 2147483647, %v5431_v5 }
 0x118   : > { %v4752_v30 = vpop.eup %4751  ;;  %v5445_v14 = vadd.f32 1.0, %v4750_v53  ;;  %v5465_v19 = vor.u32 1.1754944e-38, %v830_v20  ;;  %vm839_vm1 = vweird.f32 %v5431_v5  ;;  %vm854_vm2 = vweird.f32 %v5434_v31 }
 0x119   : > { %v768_v60 = vadd.f32 %v760_v45, %v743_v11  ;;  %v3667_v54 = vmul.f32 -1.442695, %v5427_v39  ;;  %v5457_v15 = vadd.f32 1.0, %v4752_v30  ;;  %v858_v51 = vand.u32 2147483647, %v5434_v31 }
 0x11a   : > { %v860_v41 = vand.u32 2147483648, %v5434_v31  ;;  %vm5481_vm4 = vcmp.eq.f32.partialorder %v843_v10, 8.507059e+37  ;;  %vm869_vm5 = vweird.f32 %v5437_v36  ;;  %v873_v56 = vand.u32 2147483647, %v5437_v36 }
 0x11b   : > { %v777_v4 = vmul.f32 %v5376_v38, %v768_v60  ;;  %4755 = vpow2.f32 %v3667_v54  ;;  %v5448_v34 = vpop.eup %4753  ;;  %vm5490_vm6 = vcmp.eq.f32.partialorder %v828_v0, 8.507059e+37  ;;  %v875_v55 = vand.u32 2147483648, %v5437_v36 }
 0x11c   : > { %4757 = vrcp.f32 %v5431_v5  ;;  %v820_v38 = vmul.f32 %v5448_v34, %v5429_v58  ;;  %vm825_vm3 = vweird.f32 %v5448_v34  ;;  %vm5500_vm8 = vcmp.eq.f32.partialorder %v858_v51, 8.507059e+37 }
 0x11d   : > { %v5442_v6 = vadd.f32 %v5380_v2, %v777_v4  ;;  %4759 = vrcp.f32 %v5434_v31  ;;  %v845_v2 = vand.u32 2147483648, %v5431_v5  ;;  %v861_v49 = vor.u32 1.1754944e-38, %v860_v41  ;;  %vm5530_vm13 = vmor %vm824_vm0, %vm825_vm3 }
 0x11e   : > { %4761 = vrcp.f32 %v5437_v36  ;;  %v821_v16 = vsub.f32 1.0, %v820_v38  ;;  %vm884_vm9 = vweird.f32 %v5445_v14  ;;  %vm5512_vm11 = vcmp.eq.f32.partialorder %v873_v56, 8.507059e+37 }
 0x11f   : > { %v3668_v59 = vmul.f32 -1.442695, %v5442_v6  ;;  %v846_v18 = vor.u32 1.1754944e-38, %v845_v2  ;;  %v888_v57 = vand.u32 2147483647, %v5445_v14  ;;  %v876_v53 = vor.u32 1.1754944e-38, %v875_v55 }
 0x120   : > { %v822_v43 = vmul.f32 %v5448_v34, %v821_v16  ;;  %v890_v38 = vand.u32 2147483648, %v5445_v14  ;;  %v903_v16 = vand.u32 2147483647, %v5457_v15  ;;  %vm899_vm3 = vweird.f32 %v5457_v15 }
 0x121   : > { %v4756_v42 = vpop.eup %4755  ;;  %4763 = vpow2.f32 %v3668_v59 }
 0x122   : > { %v5455_v12 = vpop.eup %4757  ;;  %4765 = vrcp.f32 %v5445_v14  ;;  %v5488_v29 = vadd.f32 1.0, %v4756_v42  ;;  %v823_v45 = vadd.f32 %v5448_v34, %v822_v43  ;;  %v891_v43 = vor.u32 1.1754944e-38, %v890_v38 }
 0x123   : > { %v5461_v17 = vpop.eup %4759  ;;  %v835_v26 = vmul.f32 %v5455_v12, %v5431_v5  ;;  %4767 = vrcp.f32 %v5457_v15  ;;  %vm840_vm7 = vweird.f32 %v5455_v12 }
 0x124   : > { %v5470_v9 = vpop.eup %4761  ;;  %v850_v48 = vmul.f32 %v5461_v17, %v5434_v31  ;;  %vm855_vm10 = vweird.f32 %v5461_v17  ;;  %vm5521_vm12 = vmor %vm839_vm1, %vm840_vm7  ;;  %4769 = vrcp.f32 %v5488_v29  ;;  %v827_v42 = vsel %vm5530_vm13, %v5448_v34, %v823_v45 }
 0x125   : > { %v836_v3 = vsub.f32 1.0, %v835_v26  ;;  %v865_v24 = vmul.f32 %v5470_v9, %v5437_v36  ;;  %vm870_vm14 = vweird.f32 %v5470_v9  ;;  %vm5547_vm15 = vmor %vm854_vm2, %vm855_vm10  ;;  %vm5558_vm1 = vcmp.eq.f32.partialorder %v888_v57, 8.507059e+37 }
 0x126   : > { %v851_v1 = vsub.f32 1.0, %v850_v48  ;;  %v905_v31 = vand.u32 2147483648, %v5457_v15  ;;  %vm5567_vm2 = vmor %vm869_vm5, %vm870_vm14  ;;  %v832_v51 = vsel %vm5490_vm6, %v5465_v19, %v827_v42  ;;  %vm5588_vm6 = vcmp.eq.f32.partialorder %v903_v16, 8.507059e+37  ;;  %v4550_v19 = vld [vmem:[%s6753_s1 + $0xa0] sm:$0xff] }
 0x127   : > { %v4764_v21 = vpop.eup %4763  ;;  %v837_v44 = vmul.f32 %v5455_v12, %v836_v3  ;;  %v866_v50 = vsub.f32 1.0, %v865_v24  ;;  %v918_v52 = vand.u32 2147483647, %v5488_v29  ;;  %v5606_v55 = vmul.f32 %v832_v51, %v5390_v13 }
 0x128   : > { %v5496_v33 = vpop.eup %4765  ;;  %v852_v32 = vmul.f32 %v5461_v17, %v851_v1  ;;  %v5517_v60 = vadd.f32 1.0, %v4764_v21  ;;  %v906_v37 = vor.u32 1.1754944e-38, %v905_v31 }
 0x129   : > { %v838_v7 = vadd.f32 %v5455_v12, %v837_v44  ;;  %v867_v27 = vmul.f32 %v5470_v9, %v866_v50  ;;  %v880_v22 = vmul.f32 %v5496_v33, %v5445_v14  ;;  %v4768_v30 = vpop.eup %4767  ;;  %vm885_vm0 = vweird.f32 %v5496_v33 }
 0x12a   : > { %v853_v11 = vadd.f32 %v5461_v17, %v852_v32  ;;  %4771 = vrcp.f32 %v5517_v60  ;;  %v4770_v36 = vpop.eup %4769  ;;  %vm900_vm5 = vweird.f32 %v4768_v30  ;;  %v920_v44 = vand.u32 2147483648, %v5488_v29 }
 0x12b   : > { %v881_v4 = vsub.f32 1.0, %v880_v22  ;;  %v842_v5 = vsel %vm5521_vm12, %v5455_v12, %v838_v7  ;;  %v868_v20 = vadd.f32 %v5470_v9, %v867_v27  ;;  %v895_v12 = vmul.f32 %v4768_v30, %v5457_v15  ;;  %vm901_vm7 = vmor %vm899_vm3, %vm900_vm5 }
 0x12c   : > { %v857_v10 = vsel %vm5547_vm15, %v5461_v17, %v853_v11  ;;  %v847_v0 = vsel %vm5481_vm4, %v846_v18, %v842_v5  ;;  %vm5584_vm4 = vmor %vm884_vm9, %vm885_vm0  ;;  %v910_v1 = vmul.f32 %v4770_v36, %v5488_v29  ;;  %vm914_vm9 = vweird.f32 %v5488_v29  ;;  %v4552_v18 = vld [vmem:[%s6753_s1 + $0xb0] sm:$0xff] }
 0x12d   : > { %v882_v2 = vmul.f32 %v5496_v33, %v881_v4  ;;  %v896_v17 = vsub.f32 1.0, %v895_v12  ;;  %v872_v41 = vsel %vm5567_vm2, %v5470_v9, %v868_v20  ;;  %v862_v3 = vsel %vm5500_vm8, %v861_v49, %v857_v10 }
 0x12e   : > { %v5597_v56 = vmul.f32 %v847_v0, %v5393_v8  ;;  %v877_v14 = vsel %vm5512_vm11, %v876_v53, %v872_v41  ;;  %v911_v50 = vsub.f32 1.0, %v910_v1  ;;  %vm915_vm8 = vweird.f32 %v4770_v36 }
 0x12f   : > { %v883_v48 = vadd.f32 %v5496_v33, %v882_v2  ;;  %v897_v24 = vmul.f32 %v4768_v30, %v896_v17  ;;  %v4896_v49 = vmov 64.0   ;;  %v5615_v15 = vmul.f32 %v877_v14, %v5401_v25  ;;  %vm916_vm11 = vmor %vm914_vm9, %vm915_vm8  ;;  %v4548_v14 = vld [vmem:[%s6753_s1 + $0x90] sm:$0xff] }
 0x130   : > { %v4772_v8 = vpop.eup %4771  ;;  %4773 = vrcp.f32 %v4896_v49  ;;  %v912_v45 = vmul.f32 %v4770_v36, %v911_v50  ;;  %v947_v13 = vadd.f32 %v5597_v56, %v5606_v55  ;;  %vm919_vm10 = vcmp.eq.f32.partialorder %v918_v52, 8.507059e+37 }
 0x131   : > { %v887_v9 = vsel %vm5584_vm4, %v5496_v33, %v883_v48  ;;  %v898_v21 = vadd.f32 %v4768_v30, %v897_v24  ;;  %v5609_v33 = vmul.f32 %v862_v3, %v5396_v40  ;;  %v925_v7 = vmul.f32 %v4772_v8, %v5517_v60  ;;  %v4551_v24 = vld [vmem:[%s6753_s1 + $0xa8] sm:$0xff] }
 0x132   : > { %v892_v32 = vsel %vm5558_vm1, %v891_v43, %v887_v9  ;;  %v913_v27 = vadd.f32 %v4770_v36, %v912_v45  ;;  %v921_v57 = vor.u32 1.1754944e-38, %v920_v44  ;;  %vm930_vm12 = vweird.f32 %v4772_v8  ;;  %v4549_v9 = vld [vmem:[%s6753_s1 + $0x98] sm:$0xff]  ;;  %v4547_v44 = vld [vmem:[%s6753_s1 + $0x88] sm:$0xff] }
 0x133   : > { %v902_v63 = vsel %vm901_vm7, %v4768_v30, %v898_v21  ;;  %v926_v22 = vsub.f32 1.0, %v925_v7  ;;  %v5623_v11 = vmul.f32 %v892_v32, %v5406_v28  ;;  %v948_v62 = vadd.f32 %v947_v13, %v5609_v33 }
 0x134   : > { %v907_v40 = vsel %vm5588_vm6, %v906_v37, %v902_v63  ;;  %v933_v25 = vand.u32 2147483647, %v5517_v60  ;;  %v935_v54 = vand.u32 2147483648, %v5517_v60  ;;  %v917_v53 = vsel %vm916_vm11, %v4770_v36, %v913_v27 }
 0x135   : > { %v927_v4 = vmul.f32 %v4772_v8, %v926_v22  ;;  %v5629_v30 = vmul.f32 %v907_v40, %v5419_v35  ;;  %v949_v29 = vadd.f32 %v948_v62, %v5615_v15  ;;  %v922_v5 = vsel %vm919_vm10, %v921_v57, %v917_v53 }
 0x136   : > { %v4774_v59 = vpop.eup %4773  ;;  %vm929_vm13 = vweird.f32 %v5517_v60  ;;  %v5634_v20 = vmul.f32 %v922_v5, %v5427_v39  ;;  %v936_v42 = vor.u32 1.1754944e-38, %v935_v54  ;;  %vm934_vm15 = vcmp.eq.f32.partialorder %v933_v25, 8.507059e+37 }
 0x137   : > { %v928_v28 = vadd.f32 %v4772_v8, %v927_v4  ;;  %v950_v38 = vadd.f32 %v949_v29, %v5623_v11  ;;  %vm931_vm14 = vmor %vm929_vm13, %vm930_vm12  ;;  %v961_v58 = vmul.f32 64.0, %v4774_v59  ;;  %vm965_vm0 = vweird.f32 %v4774_v59  ;;  %v4561_v29 = vld [vmem:[%s6753_s1 + $0xf8] sm:$0xff] }
 0x138   : > { %v1035_v37 = vrot.slane %v5120_v23, 5  ;;  %v1136_v4 = vrot.slane %v5120_v23, 6  ;;  %1248 = vmatpush.bf16.msra.mxu3 %v4561_v29  ;;  %v4558_v23 = vld [vmem:[%s6753_s1 + $0xe0] sm:$0xff] }
 0x139   : > { %v932_v2 = vsel %vm931_vm14, %v4772_v8, %v928_v28  ;;  %v951_v35 = vadd.f32 %v950_v38, %v5629_v30  ;;  %v962_v34 = vsub.f32 1.0, %v961_v58  ;;  %v4546_v8 = vld [vmem:[%s6753_s1 + $0x80] sm:$0xff]  ;;  %v4560_v28 = vld [vmem:[%s6753_s1 + $0xf0] sm:$0xff] }
 0x13a   : > { %v937_v12 = vsel %vm934_vm15, %v936_v42, %v932_v2  ;;  %v4559_v42 = vld [vmem:[%s6753_s1 + $0xe8] sm:$0xff] }
 0x13b   : > { %v5639_v16 = vmul.f32 %v937_v12, %v5442_v6  ;;  %v952_v10 = vadd.f32 %v951_v35, %v5634_v20  ;;  %v963_v31 = vmul.f32 %v4774_v59, %v962_v34  ;;  %v4553_v6 = vld [vmem:[%s6753_s1 + $0xb8] sm:$0xff] }
 0x13c   : > { %1138 = vmatpush.bf16.msra.mxu2 %v4553_v6  ;;  %1249 = vmatpush.bf16.msra.mxu3 %v4560_v28  ;;  %v4557_v12 = vld [vmem:[%s6753_s1 + $0xd8] sm:$0xff] }
 0x13d   : > { %v953_v60 = vadd.f32 %v952_v10, %v5639_v16  ;;  %v964_v48 = vadd.f32 %v4774_v59, %v963_v31  ;;  %v4556_v10 = vld [vmem:[%s6753_s1 + $0xd0] sm:$0xff] }
 0x13f   : > { %v954_v39 = vrot.slane %v953_v60, 4  ;;  %v966_v41 = vsel %vm965_vm0, %v4774_v59, %v964_v48 }
 0x140   : > { %1139 = vmatpush.bf16.msra.mxu2 %v4552_v18  ;;  %1250 = vmatpush.bf16.msra.mxu3 %v4559_v42  ;;  %v4884_v42 = vld [vmem:[#allocation2 + $0x31] sm:$0xff] }
 0x141   : > { %v955_v0 = vadd.f32 %v954_v39, %v953_v60  ;;  %v4555_v39 = vld [vmem:[%s6753_s1 + $0xc8] sm:$0xff] }
 0x143   : > { %v956_v26 = vrot.slane %v955_v0, 2 }
 0x144   : > { %1140 = vmatpush.bf16.msra.mxu2 %v4551_v24  ;;  %1251 = vmatpush.bf16.msra.mxu3 %v4558_v23  ;;  %v4885_v23 = vld [vmem:[#allocation2 + $0x41] sm:$0xff] }
 0x145   : > { %v957_v17 = vadd.f32 %v956_v26, %v955_v0 }
 0x147   : > { %v958_v51 = vrot.slane %v957_v17, 1 }
 0x148   : > { %1141 = vmatpush.bf16.msra.mxu2 %v4550_v19  ;;  %1252 = vmatpush.bf16.msra.mxu3 %v4557_v12 }
 0x149   : > { %v959_v43 = vadd.f32 %v958_v51, %v957_v17  ;;  %v4554_v17 = vld [vmem:[%s6753_s1 + $0xc0] sm:$0xff] }
 0x14b   : > { %v967_v36 = vmul.f32 %v966_v41, %v959_v43 }
 0x14c   : > { %1142 = vmatpush.bf16.msra.mxu2 %v4549_v9  ;;  %1253 = vmatpush.bf16.msra.mxu3 %v4556_v10 }
 0x14d   : > { %v968_v3 = vpack.c.bf16 %v967_v36, %v967_v36 }
 0x14f   : > { %1045 = vmatmul.bf16.vlgmr.msra.gmra.mxu1 %v968_v3 }
 0x150   : > { %1143 = vmatpush.bf16.msra.mxu2 %v4548_v14  ;;  %1254 = vmatpush.bf16.msra.mxu3 %v4555_v39  ;;  %v4568_v14 = vld [vmem:[%s6753_s1 + $0x130] sm:$0xff] }
 0x154   : > { %1144 = vmatpush.bf16.msra.mxu2 %v4547_v44  ;;  %1255 = vmatpush.bf16.msra.mxu3 %v4554_v17 }
 0x158   : > { %1145 = vmatpush.bf16.msra.mxu2 %v4546_v8  ;;  %v4563_v8 = vld [vmem:[%s6753_s1 + $0x108] sm:$0xff] }
 0x1cc   : > { %v1046_v1 = vpop.f32.mrf.mxu1 }
 0x1cd   : > { %v1047_v21 = vadd.f32 %v1046_v1, %v1035_v37  ;;  %v4569_v1 = vld [vmem:[%s6753_s1 + $0x138] sm:$0xff] }
 0x1ce   : > { %1372 = vmatpush.bf16.msrb.mxu1 %v4569_v1 }
 0x1cf   : > { %v3717_v52 = vmul.f32 -1.442695, %v1047_v21 }
 0x1d1   : > { %4775 = vpow2.f32 %v3717_v52 }
 0x1d2   : > { %1373 = vmatpush.bf16.msrb.mxu1 %v4568_v14 }
 0x1d4   : > { %v1048_v50 = vpop.f32.mrf.mxu1 }
 0x1d7   : > { %v4776_v32 = vpop.eup %4775 }
 0x1d8   : > { %v1053_v63 = vadd.f32 1.0, %v4776_v32  ;;  %v4881_v32 = vld [vmem:[%s6754_s2 + $0x8] sm:$0xff] }
 0x1da   : > { %4777 = vrcp.f32 %v1053_v63  ;;  %v1065_v13 = vand.u32 2147483648, %v1053_v63  ;;  %v1063_v27 = vand.u32 2147483647, %v1053_v63  ;;  %vm1059_vm2 = vweird.f32 %v1053_v63 }
 0x1dc   : > { %v1066_v62 = vor.u32 1.1754944e-38, %v1065_v13  ;;  %vm1064_vm4 = vcmp.eq.f32.partialorder %v1063_v27, 8.507059e+37 }
 0x1e0   : > { %v4778_v49 = vpop.eup %4777 }
 0x1e1   : > { %v1055_v45 = vmul.f32 %v4778_v49, %v1053_v63  ;;  %vm1060_vm1 = vweird.f32 %v4778_v49  ;;  %v1277_v63 = vperm.slane %v4881_v32, 7 }
 0x1e2   : > { %vm1061_vm3 = vmor %vm1059_vm2, %vm1060_vm1 }
 0x1e3   : > { %v1056_v7 = vsub.f32 1.0, %v1055_v45 }
 0x1e5   : > { %v1057_v40 = vmul.f32 %v4778_v49, %v1056_v7 }
 0x1e7   : > { %v1058_v22 = vadd.f32 %v4778_v49, %v1057_v40 }
 0x1e9   : > { %v1062_v57 = vsel %vm1061_vm3, %v4778_v49, %v1058_v22  ;;  %v5731_v49 = vld [vmem:[%s6754_s2 + $0x10] sm:$0xff] }
 0x1ea   : > { %v1067_v25 = vsel %vm1064_vm4, %v1066_v62, %v1062_v57  ;;  %v1286_v7 = vperm.slane %v5731_v49, 0  ;;  %v4882_v62 = vld [vmem:[#allocation2 + $0x11] sm:$0xff] }
 0x1eb   : > { %v1069_v54 = vmul.f32 %v1067_v25, %v1047_v21  ;;  %v4883_v25 = vld [vmem:[#allocation2 + $0x21] sm:$0xff] }
 0x1ed   : > { %v1070_v53 = vpack.c.bf16 %v1069_v54, %v1069_v54 }
 0x1ef   : > { %1146 = vmatmul.bf16.vlgmr.msra.gmra.mxu2 %v1070_v53 }
 0x272   : > { %v1147_v59 = vpop.f32.mrf.mxu2 }
 0x273   : > { %v1148_v5 = vadd.f32 %v1147_v59, %v1136_v4 }
 0x275   : > { %v3766_v38 = vmul.f32 -1.442695, %v1148_v5 }
 0x277   : > { %4779 = vpow2.f32 %v3766_v38 }
 0x27a   : > { %v1149_v58 = vpop.f32.mrf.mxu2 }
 0x27d   : > { %v4780_v2 = vpop.eup %4779 }
 0x27e   : > { %v1154_v35 = vadd.f32 1.0, %v4780_v2 }
 0x280   : > { %4781 = vrcp.f32 %v1154_v35  ;;  %v1166_v0 = vand.u32 2147483648, %v1154_v35  ;;  %v1164_v48 = vand.u32 2147483647, %v1154_v35  ;;  %vm1160_vm6 = vweird.f32 %v1154_v35 }
 0x282   : > { %v1167_v41 = vor.u32 1.1754944e-38, %v1166_v0  ;;  %vm1165_vm8 = vcmp.eq.f32.partialorder %v1164_v48, 8.507059e+37  ;;  %v4886_v0 = vld [vmem:[#allocation2 + $0x51] sm:$0xff] }
 0x286   : > { %v4782_v34 = vpop.eup %4781 }
 0x287   : > { %v1156_v60 = vmul.f32 %v4782_v34, %v1154_v35  ;;  %vm1161_vm5 = vweird.f32 %v4782_v34 }
 0x288   : > { %vm1162_vm7 = vmor %vm1160_vm6, %vm1161_vm5 }
 0x289   : > { %v1157_v31 = vsub.f32 1.0, %v1156_v60 }
 0x28b   : > { %v1158_v26 = vmul.f32 %v4782_v34, %v1157_v31 }
 0x28d   : > { %v1159_v51 = vadd.f32 %v4782_v34, %v1158_v26 }
 0x28f   : > { %v1163_v43 = vsel %vm1162_vm7, %v4782_v34, %v1159_v51 }
 0x290   : > { %v1168_v36 = vsel %vm1165_vm8, %v1167_v41, %v1163_v43 }
 0x291   : > { %v1170_v3 = vperm.slane %v1168_v36, 0 }
 0x293   : > { %v1171_v6 = vmul.f32 %v1170_v3, %v5606_v55  ;;  %v1172_v18 = vmul.f32 %v1170_v3, %v5597_v56  ;;  %v1173_v19 = vmul.f32 %v1170_v3, %v5609_v33  ;;  %v1174_v9 = vmul.f32 %v1170_v3, %v5615_v15  ;;  %v4567_v56 = vld [vmem:[%s6753_s1 + $0x128] sm:$0xff]  ;;  %v4566_v15 = vld [vmem:[%s6753_s1 + $0x120] sm:$0xff] }
 0x294   : > { %v1175_v55 = vmul.f32 %v1170_v3, %v5623_v11  ;;  %v1176_v33 = vmul.f32 %v1170_v3, %v5629_v30  ;;  %1374 = vmatpush.bf16.msrb.mxu1 %v4567_v56  ;;  %v1177_v52 = vmul.f32 %v1170_v3, %v5634_v20  ;;  %v1178_v44 = vmul.f32 %v1170_v3, %v5639_v16  ;;  %v4565_v11 = vld [vmem:[%s6753_s1 + $0x118] sm:$0xff]  ;;  %v4564_v30 = vld [vmem:[%s6753_s1 + $0x110] sm:$0xff]  ;;  %v4562_v20 = vld [vmem:[%s6753_s1 + $0x100] sm:$0xff] }
 0x295   : > { %v1179_v24 = vpack.c.bf16 %v1172_v18, %v1171_v6  ;;  %v1180_v37 = vpack.c.bf16 %v1174_v9, %v1173_v19  ;;  %v5738_v9 = vperm.slane %v5731_v49, 1 }
 0x296   : > { %v1181_v21 = vpack.c.bf16 %v1176_v33, %v1175_v55  ;;  %v1182_v50 = vpack.c.bf16 %v1178_v44, %v1177_v52 }
 0x297   : > { %1256 = vmatmul.bf16.vlgmr.msra.gmra.mxu3 %v1179_v24 }
 0x298   : > { %1375 = vmatpush.bf16.msrb.mxu1 %v4566_v15 }
 0x29c   : > { %1376 = vmatpush.bf16.msrb.mxu1 %v4565_v11 }
 0x2a0   : > { %1377 = vmatpush.bf16.msrb.mxu1 %v4564_v30 }
 0x2a4   : > { %1378 = vmatpush.bf16.msrb.mxu1 %v4563_v8 }
 0x2a7   : > { %1261 = vmatmul.bf16.gmra.mxu3 %v1180_v37  ;;  %v5741_v37 = vperm.slane %v5731_v49, 2 }
 0x2a8   : > { %1379 = vmatpush.bf16.msrb.mxu1 %v4562_v20 }
 0x2b7   : > { %1266 = vmatmul.bf16.gmra.mxu3 %v1181_v21 }
 0x2c7   : > { %1271 = vmatmul.bf16.gmra.mxu3 %v1182_v50 }
 0x31a   : > { %v1257_v16 = vpop.f32.mrf.mxu3 }
 0x31b   : > { %v1278_v45 = vmul.f32 %v1277_v63, %v1257_v16 }
 0x31d   : > { %v1287_v40 = vadd.f32 %v1286_v7, %v1278_v45 }
 0x31f   : > { %v1295_v57 = vadd.f32 %v4882_v62, %v1287_v40 }
 0x322   : > { %v1259_v13 = vpop.f32.mrf.mxu3 }
 0x323   : > { %v1279_v27 = vmul.f32 %v1277_v63, %v1259_v13 }
 0x325   : > { %v1288_v22 = vadd.f32 %v1286_v7, %v1279_v27  ;;  %v5756_v27 = vperm.slane %v5731_v49, 3 }
 0x327   : > { %v1296_v54 = vadd.f32 %v4883_v25, %v1288_v22  ;;  %v5759_v22 = vperm.slane %v5731_v49, 4  ;;  %v5762_v25 = vperm.slane %v5731_v49, 5 }
 0x329   : > { %v1303_v53 = vpack.c.bf16 %v1296_v54, %v1295_v57 }
 0x32a   : > { %v1262_v4 = vpop.f32.mrf.mxu3 }
 0x32b   : > { %1380 = vmatmul.bf16.vlgmr.msrb.gmra.mxu1 %v1303_v53  ;;  %v1280_v29 = vmul.f32 %v1277_v63, %v1262_v4  ;;  %v1609_v4 = vld [vmem:[#allocation3] ss:$2 sm:$0x1f] }
 0x32d   : > { %v1289_v5 = vadd.f32 %v1286_v7, %v1280_v29  ;;  %v1619_v29 = vld [vmem:[#allocation3 + $0x1] ss:$2 sm:$0x1f] }
 0x32f   : > { %v1297_v58 = vadd.f32 %v4884_v42, %v1289_v5  ;;  %v1653_v42 = vmul.f32 %v5759_v22, %v1619_v29 }
 0x332   : > { %v1264_v59 = vpop.f32.mrf.mxu3 }
 0x333   : > { %v1281_v28 = vmul.f32 %v1277_v63, %v1264_v59 }
 0x335   : > { %v1290_v38 = vadd.f32 %v1286_v7, %v1281_v28 }
 0x337   : > { %v1298_v2 = vadd.f32 %v4885_v23, %v1290_v38  ;;  %v1644_v38 = vmul.f32 %v5756_v27, %v1609_v4 }
 0x339   : > { %v1304_v35 = vpack.c.bf16 %v1298_v2, %v1297_v58  ;;  %v1662_v58 = vmul.f32 %v5762_v25, %v1609_v4 }
 0x33a   : > { %v1267_v12 = vpop.f32.mrf.mxu3 }
 0x33b   : > { %1385 = vmatmul.bf16.gmra.mxu1 %v1304_v35  ;;  %v1282_v10 = vmul.f32 %v1277_v63, %v1267_v12 }
 0x33d   : > { %v1291_v60 = vadd.f32 %v1286_v7, %v1282_v10 }
 0x33f   : > { %v1299_v26 = vadd.f32 %v4886_v0, %v1291_v60  ;;  %v1670_v60 = vrot.slane %v1662_v58, 1  ;;  %v5774_v0 = vperm.slane %v5731_v49, 6 }
 0x342   : > { %v1269_v34 = vpop.f32.mrf.mxu3 }
 0x343   : > { %v1283_v39 = vmul.f32 %v1277_v63, %v1269_v34  ;;  %v1657_v34 = vadd.f32 %v1653_v42, %v1644_v38 }
 0x345   : > { %v1292_v31 = vadd.f32 %v1286_v7, %v1283_v39 }
 0x347   : > { %v1300_v48 = vadd.f32 %v1292_v31, %v5272_v61 }
 0x349   : > { %v1305_v17 = vpack.c.bf16 %v1300_v48, %v1299_v26 }
 0x34a   : > { %v1272_v51 = vpop.f32.mrf.mxu3 }
 0x34b   : > { %1390 = vmatmul.bf16.gmra.mxu1 %v1305_v17  ;;  %v1284_v41 = vmul.f32 %v1277_v63, %v1272_v51 }
 0x34d   : > { %v1293_v36 = vadd.f32 %v1286_v7, %v1284_v41 }
 0x34f   : > { %v1301_v18 = vadd.f32 %v1293_v36, %v5313_v47  ;;  %v5782_v36 = vld [vmem:[%s6754_s2 + $0x18] sm:$0xff] }
 0x352   : > { %v1274_v43 = vpop.f32.mrf.mxu3 }
 0x353   : > { %v1285_v3 = vmul.f32 %v1277_v63, %v1274_v43 }
 0x355   : > { %v1294_v6 = vadd.f32 %v1286_v7, %v1285_v3  ;;  %v1678_v3 = vadd.f32 %v1670_v60, %v1657_v34 }
 0x357   : > { %v1302_v24 = vadd.f32 %v1294_v6, %v5360_v46 }
 0x359   : > { %v1306_v19 = vpack.c.bf16 %v1302_v24, %v1301_v18 }
 0x35b   : > { %1395 = vmatmul.bf16.gmra.mxu1 %v1306_v19 }
 0x3a8   : > { %v1381_v61 = vpop.f32.mrf.mxu1 }
 0x3a9   : > { %v1402_v1 = vmul.f32 %v5738_v9, %v1381_v61 }
 0x3ab   : > { %v1411_v14 = vadd.f32 %v5741_v37, %v1402_v1 }
 0x3ad   : > { %v3863_v56 = vmul.f32 -1.442695, %v1411_v14 }
 0x3af   : > { %4783 = vpow2.f32 %v3863_v56 }
 0x3b0   : > { %v1383_v47 = vpop.f32.mrf.mxu1 }
 0x3b1   : > { %v1403_v46 = vmul.f32 %v5738_v9, %v1383_v47 }
 0x3b3   : > { %v5747_v15 = vadd.f32 %v5741_v37, %v1403_v46 }
 0x3b5   : > { %v4784_v55 = vpop.eup %4783  ;;  %v3864_v21 = vmul.f32 -1.442695, %v5747_v15 }
 0x3b6   : > { %v1443_v33 = vadd.f32 1.0, %v4784_v55  ;;  %v5789_v55 = vperm.slane %v5731_v49, 7 }
 0x3b8   : > { %4785 = vrcp.f32 %v1443_v33  ;;  %v1386_v44 = vpop.f32.mrf.mxu1  ;;  %v1462_v20 = vand.u32 2147483648, %v1443_v33  ;;  %v1460_v63 = vand.u32 2147483647, %v1443_v33  ;;  %vm1456_vm10 = vweird.f32 %v1443_v33 }
 0x3b9   : > { %4787 = vpow2.f32 %v3864_v21  ;;  %v1404_v11 = vmul.f32 %v5738_v9, %v1386_v44 }
 0x3ba   : > { %v1463_v40 = vor.u32 1.1754944e-38, %v1462_v20  ;;  %vm1461_vm12 = vcmp.eq.f32.partialorder %v1460_v63, 8.507059e+37 }
 0x3bb   : > { %v5752_v8 = vadd.f32 %v5741_v37, %v1404_v11 }
 0x3bd   : > { %v3865_v45 = vmul.f32 -1.442695, %v5752_v8 }
 0x3be   : > { %v4786_v52 = vpop.eup %4785 }
 0x3bf   : > { %v1452_v50 = vmul.f32 %v4786_v52, %v1443_v33  ;;  %v4788_v16 = vpop.eup %4787  ;;  %vm1457_vm9 = vweird.f32 %v4786_v52  ;;  %4789 = vpow2.f32 %v3865_v45  ;;  %v5792_v33 = vperm.slane %v5782_v36, 0 }
 0x3c0   : > { %v1444_v7 = vadd.f32 1.0, %v4788_v16  ;;  %vm1458_vm11 = vmor %vm1456_vm10, %vm1457_vm9  ;;  %v1388_v62 = vpop.f32.mrf.mxu1  ;;  %v5803_v45 = vperm.slane %v5782_v36, 1 }
 0x3c1   : > { %v1453_v30 = vsub.f32 1.0, %v1452_v50  ;;  %v1405_v54 = vmul.f32 %v5738_v9, %v1388_v62 }
 0x3c2   : > { %4791 = vrcp.f32 %v1444_v7  ;;  %v1477_v26 = vand.u32 2147483648, %v1444_v7  ;;  %v1475_v17 = vand.u32 2147483647, %v1444_v7  ;;  %vm1471_vm14 = vweird.f32 %v1444_v7 }
 0x3c3   : > { %v1454_v32 = vmul.f32 %v4786_v52, %v1453_v30  ;;  %v5766_v5 = vadd.f32 %v5741_v37, %v1405_v54  ;;  %v5810_v54 = vperm.slane %v5782_v36, 3 }
 0x3c4   : > { %v1478_v19 = vor.u32 1.1754944e-38, %v1477_v26  ;;  %vm1476_vm0 = vcmp.eq.f32.partialorder %v1475_v17, 8.507059e+37 }
 0x3c5   : > { %v1455_v13 = vadd.f32 %v4786_v52, %v1454_v32  ;;  %v4790_v28 = vpop.eup %4789  ;;  %v3866_v23 = vmul.f32 -1.442695, %v5766_v5 }
 0x3c6   : > { %v1445_v35 = vadd.f32 1.0, %v4790_v28 }
 0x3c7   : > { %v1459_v57 = vsel %vm1458_vm11, %v4786_v52, %v1455_v13  ;;  %4793 = vpow2.f32 %v3866_v23 }
 0x3c8   : > { %v1464_v53 = vsel %vm1461_vm12, %v1463_v40, %v1459_v57  ;;  %v4792_v2 = vpop.eup %4791  ;;  %4795 = vrcp.f32 %v1445_v35  ;;  %v1391_v10 = vpop.f32.mrf.mxu1  ;;  %v1492_v11 = vand.u32 2147483648, %v1445_v35  ;;  %v1490_v49 = vand.u32 2147483647, %v1445_v35 }
 0x3c9   : > { %v1571_v59 = vmul.f32 %v1464_v53, %v1411_v14  ;;  %v1467_v12 = vmul.f32 %v4792_v2, %v1444_v7  ;;  %v1406_v31 = vmul.f32 %v5738_v9, %v1391_v10  ;;  %vm1472_vm13 = vweird.f32 %v4792_v2 }
 0x3ca   : > { %vm1473_vm15 = vmor %vm1471_vm14, %vm1472_vm13  ;;  %vm1486_vm2 = vweird.f32 %v1445_v35  ;;  %v5806_v40 = vperm.slane %v5782_v36, 2  ;;  %v1493_v62 = vor.u32 1.1754944e-38, %v1492_v11  ;;  %vm1491_vm4 = vcmp.eq.f32.partialorder %v1490_v49, 8.507059e+37 }
 0x3cb   : > { %1601 = vst [vmem:[#allocation3 + $0x11] sm:$0xff] %v1571_v59  ;;  %v1468_v39 = vsub.f32 1.0, %v1467_v12  ;;  %v5777_v51 = vadd.f32 %v5741_v37, %v1406_v31 }
 0x3cd   : > { %v1469_v48 = vmul.f32 %v4792_v2, %v1468_v39  ;;  %v4794_v43 = vpop.eup %4793  ;;  %v3867_v1 = vmul.f32 -1.442695, %v5777_v51 }
 0x3ce   : > { %v4796_v18 = vpop.eup %4795  ;;  %v5785_v61 = vadd.f32 1.0, %v4794_v43  ;;  %v5826_v43 = vperm.slane %v5782_v36, 4 }
 0x3cf   : > { %v1470_v6 = vadd.f32 %v4792_v2, %v1469_v48  ;;  %v1482_v56 = vmul.f32 %v4796_v18, %v1445_v35  ;;  %vm1487_vm1 = vweird.f32 %v4796_v18 }
 0x3d0   : > { %4797 = vrcp.f32 %v5785_v61  ;;  %v1393_v46 = vpop.f32.mrf.mxu1  ;;  %vm1488_vm3 = vmor %vm1486_vm2, %vm1487_vm1  ;;  %v1505_v38 = vand.u32 2147483647, %v5785_v61  ;;  %vm1501_vm6 = vweird.f32 %v5785_v61 }
 0x3d1   : > { %v1474_v14 = vsel %vm1473_vm15, %v4792_v2, %v1470_v6  ;;  %v1483_v44 = vsub.f32 1.0, %v1482_v56  ;;  %4799 = vpow2.f32 %v3867_v1  ;;  %v1407_v30 = vmul.f32 %v5738_v9, %v1393_v46 }
 0x3d2   : > { %v1628_v41 = vld [vmem:[#allocation3 + $0x10] ss:$2 sm:$0x1f]  ;;  %v1479_v47 = vsel %vm1476_vm0, %v1478_v19, %v1474_v14  ;;  %v1636_v21 = vld [vmem:[#allocation3 + $0x11] ss:$2 sm:$0x1f] }
 0x3d3   : > { %v1683_v24 = vmul.f32 %v5774_v0, %v1628_v41  ;;  %v1572_v52 = vmul.f32 %v1479_v47, %v5747_v15  ;;  %v1484_v20 = vmul.f32 %v4796_v18, %v1483_v44  ;;  %v1692_v16 = vmul.f32 %v5789_v55, %v1636_v21 }
 0x3d4   : > { %v1701_v32 = vmul.f32 %v5792_v33, %v1628_v41  ;;  %v5800_v63 = vadd.f32 %v5741_v37, %v1407_v30  ;;  %v1507_v2 = vand.u32 2147483648, %v5785_v61  ;;  %v5833_v46 = vperm.slane %v5782_v36, 5 }
 0x3d5   : > { %v1687_v50 = vadd.f32 %v1683_v24, %v1678_v3  ;;  %1602 = vst [vmem:[#allocation3 + $0x21] sm:$0xff] %v1572_v52  ;;  %v1485_v15 = vadd.f32 %v4796_v18, %v1484_v20  ;;  %vm1506_vm8 = vcmp.eq.f32.partialorder %v1505_v38, 8.507059e+37 }
 0x3d6   : > { %v4798_v7 = vpop.eup %4797  ;;  %v3868_v57 = vmul.f32 -1.442695, %v5800_v63  ;;  %v1709_v59 = vrot.slane %v1701_v32, 1  ;;  %v1508_v19 = vor.u32 1.1754944e-38, %v1507_v2 }
 0x3d7   : > { %v1696_v13 = vadd.f32 %v1692_v16, %v1687_v50  ;;  %v1489_v53 = vsel %vm1488_vm3, %v4796_v18, %v1485_v15  ;;  %v1497_v4 = vmul.f32 %v4798_v7, %v5785_v61  ;;  %v4800_v29 = vpop.eup %4799  ;;  %vm1502_vm5 = vweird.f32 %v4798_v7 }
 0x3d8   : > { %v1494_v28 = vsel %vm1491_vm4, %v1493_v62, %v1489_v53  ;;  %4801 = vpow2.f32 %v3868_v57  ;;  %v1396_v42 = vpop.f32.mrf.mxu1  ;;  %v5816_v35 = vadd.f32 1.0, %v4800_v29  ;;  %vm1503_vm7 = vmor %vm1501_vm6, %vm1502_vm5 }
 0x3d9   : > { %v1573_v58 = vmul.f32 %v1494_v28, %v5752_v8  ;;  %v1498_v23 = vsub.f32 1.0, %v1497_v4  ;;  %v1717_v12 = vadd.f32 %v1709_v59, %v1696_v13  ;;  %v1408_v3 = vmul.f32 %v5738_v9, %v1396_v42 }
 0x3da   : > { %4803 = vrcp.f32 %v5816_v35  ;;  %v1520_v62 = vand.u32 2147483647, %v5816_v35  ;;  %v1522_v4 = vand.u32 2147483648, %v5816_v35  ;;  %vm1516_vm11 = vweird.f32 %v5816_v35 }
 0x3db   : > { %1603 = vst [vmem:[#allocation3 + $0x31] sm:$0xff] %v1573_v58  ;;  %v1499_v8 = vmul.f32 %v4798_v7, %v1498_v23  ;;  %v5837_v11 = vadd.f32 %v5741_v37, %v1408_v3 }
 0x3dc   : > { %v1611_v10 = vld [vmem:[#allocation3 + $0x20] ss:$2 sm:$0x1f]  ;;  %v1621_v34 = vld [vmem:[#allocation3 + $0x21] ss:$2 sm:$0x1f] }
 0x3dd   : > { %v1645_v60 = vmul.f32 %v5756_v27, %v1611_v10  ;;  %v1654_v39 = vmul.f32 %v5759_v22, %v1621_v34  ;;  %v1663_v31 = vmul.f32 %v5762_v25, %v1611_v10  ;;  %v1722_v26 = vmul.f32 %v5803_v45, %v1611_v10 }
 0x3de   : > { %v1740_v48 = vmul.f32 %v5810_v54, %v1611_v10  ;;  %v1731_v41 = vmul.f32 %v5806_v40, %v1621_v34  ;;  %v4802_v6 = vpop.eup %4801  ;;  %v1500_v24 = vadd.f32 %v4798_v7, %v1499_v8  ;;  %vm5858_vm10 = vcmp.eq.f32.partialorder %v1520_v62, 8.507059e+37 }
 0x3df   : > { %v1726_v17 = vadd.f32 %v1722_v26, %v1717_v12  ;;  %v1658_v18 = vadd.f32 %v1654_v39, %v1645_v60  ;;  %v1671_v1 = vrot.slane %v1663_v31, 1  ;;  %v5830_v47 = vadd.f32 1.0, %v4802_v6 }
 0x3e0   : > { %v1748_v56 = vrot.slane %v1740_v48, 1  ;;  %v1504_v21 = vsel %vm1503_vm7, %v4798_v7, %v1500_v24  ;;  %v1398_v52 = vpop.f32.mrf.mxu1  ;;  %v4804_v61 = vpop.eup %4803 }
 0x3e1   : > { %v1735_v14 = vadd.f32 %v1731_v41, %v1726_v17  ;;  %v1509_v50 = vsel %vm1506_vm8, %v1508_v19, %v1504_v21  ;;  %4805 = vrcp.f32 %v5830_v47  ;;  %v1409_v49 = vmul.f32 %v5738_v9, %v1398_v52 }
 0x3e2   : > { %v1630_v30 = vld [vmem:[#allocation3 + $0x30] ss:$2 sm:$0x1f]  ;;  %v1574_v20 = vmul.f32 %v1509_v50, %v5766_v5  ;;  %v1638_v32 = vld [vmem:[#allocation3 + $0x31] ss:$2 sm:$0x1f]  ;;  %v1679_v15 = vadd.f32 %v1671_v1, %v1658_v18  ;;  %v1512_v13 = vmul.f32 %v4804_v61, %v5816_v35  ;;  %vm1517_vm9 = vweird.f32 %v4804_v61 }
 0x3e3   : > { %v1756_v44 = vadd.f32 %v1748_v56, %v1735_v14  ;;  %v1684_v7 = vmul.f32 %v5774_v0, %v1630_v30  ;;  %v3869_v5 = vmul.f32 -1.442695, %v5837_v11  ;;  %v1693_v9 = vmul.f32 %v5789_v55, %v1638_v32  ;;  %vm1518_vm12 = vmor %vm1516_vm11, %vm1517_vm9 }
 0x3e4   : > { %1604 = vst [vmem:[#allocation3 + $0x41] sm:$0xff] %v1574_v20  ;;  %v1702_v29 = vmul.f32 %v5792_v33, %v1630_v30  ;;  %v1513_v59 = vsub.f32 1.0, %v1512_v13  ;;  %v5853_v28 = vadd.f32 %v5741_v37, %v1409_v49  ;;  %v1523_v37 = vor.u32 1.1754944e-38, %v1522_v4 }
 0x3e5   : > { %v1761_v16 = vmul.f32 %v5826_v43, %v1756_v44  ;;  %v1688_v53 = vadd.f32 %v1684_v7, %v1679_v15  ;;  %4807 = vpow2.f32 %v3869_v5  ;;  %vm1531_vm13 = vweird.f32 %v5830_v47 }
 0x3e6   : > { %v1514_v23 = vmul.f32 %v4804_v61, %v1513_v59  ;;  %v3870_v12 = vmul.f32 -1.442695, %v5853_v28  ;;  %v1710_v34 = vrot.slane %v1702_v29, 1  ;;  %v1537_v17 = vand.u32 2147483648, %v5830_v47 }
 0x3e7   : > { %v5846_v57 = vadd.f32 %v5833_v46, %v1761_v16  ;;  %v4806_v38 = vpop.eup %4805  ;;  %v1697_v58 = vadd.f32 %v1693_v9, %v1688_v53  ;;  %v1535_v1 = vand.u32 2147483647, %v5830_v47 }
 0x3e8   : > { %v1527_v2 = vmul.f32 %v4806_v38, %v5830_v47  ;;  %v1515_v60 = vadd.f32 %v4804_v61, %v1514_v23  ;;  %vm1532_vm14 = vweird.f32 %v4806_v38  ;;  %v1538_v15 = vor.u32 1.1754944e-38, %v1537_v17 }
 0x3e9   : > { %v3871_v42 = vmul.f32 -1.442695, %v5846_v57  ;;  %v1718_v48 = vadd.f32 %v1710_v34, %v1697_v58  ;;  %vm1533_vm15 = vmor %vm1531_vm13, %vm1532_vm14  ;;  %vm1536_vm0 = vcmp.eq.f32.partialorder %v1535_v1, 8.507059e+37 }
 0x3ea   : > { %v1528_v39 = vsub.f32 1.0, %v1527_v2  ;;  %v1519_v6 = vsel %vm1518_vm12, %v4804_v61, %v1515_v60 }
 0x3eb   : > { %4809 = vpow2.f32 %v3871_v42  ;;  %v1613_v31 = vld [vmem:[#allocation3 + $0x40] ss:$2 sm:$0x1f]  ;;  %v1623_v26 = vld [vmem:[#allocation3 + $0x41] ss:$2 sm:$0x1f]  ;;  %v4808_v41 = vpop.eup %4807  ;;  %v1524_v35 = vsel %vm5858_vm10, %v1523_v37, %v1519_v6 }
 0x3ec   : > { %4811 = vpow2.f32 %v3870_v12  ;;  %v1723_v8 = vmul.f32 %v5803_v45, %v1613_v31  ;;  %v1741_v3 = vmul.f32 %v5810_v54, %v1613_v31  ;;  %v1529_v18 = vmul.f32 %v4806_v38, %v1528_v39 }
 0x3ed   : > { %v1732_v19 = vmul.f32 %v5806_v40, %v1623_v26  ;;  %v1646_v56 = vmul.f32 %v5756_v27, %v1613_v31  ;;  %v1575_v21 = vmul.f32 %v1524_v35, %v5777_v51  ;;  %v5873_v44 = vadd.f32 1.0, %v4808_v41 }
 0x3ee   : > { %v1727_v24 = vadd.f32 %v1723_v8, %v1718_v48  ;;  %v1530_v52 = vadd.f32 %v4806_v38, %v1529_v18  ;;  %v1655_v61 = vmul.f32 %v5759_v22, %v1623_v26  ;;  %v1664_v30 = vmul.f32 %v5762_v25, %v1613_v31 }
 0x3ef   : > { %v1749_v16 = vrot.slane %v1741_v3, 1  ;;  %1605 = vst [vmem:[#allocation3 + $0x51] sm:$0xff] %v1575_v21  ;;  %4813 = vrcp.f32 %v5873_v44  ;;  %v1550_v29 = vand.u32 2147483647, %v5873_v44  ;;  %vm1546_vm1 = vweird.f32 %v5873_v44 }
 0x3f0   : > { %v1736_v20 = vadd.f32 %v1732_v19, %v1727_v24  ;;  %v1534_v32 = vsel %vm1533_vm15, %v4806_v38, %v1530_v52  ;;  %v1659_v13 = vadd.f32 %v1655_v61, %v1646_v56  ;;  %v1672_v62 = vrot.slane %v1664_v30, 1 }
 0x3f1   : > { %v4810_v14 = vpop.eup %4809  ;;  %v1539_v7 = vsel %vm1536_vm0, %v1538_v15, %v1534_v32  ;;  %v1552_v39 = vand.u32 2147483648, %v5873_v44  ;;  %vm5896_vm4 = vcmp.eq.f32.partialorder %v1550_v29, 8.507059e+37 }
 0x3f2   : > { %v1782_v50 = vadd.f32 1.0, %v4810_v14  ;;  %v4812_v49 = vpop.eup %4811  ;;  %v1757_v51 = vadd.f32 %v1749_v16, %v1736_v20  ;;  %v1576_v53 = vmul.f32 %v1539_v7, %v5800_v63  ;;  %v1680_v58 = vadd.f32 %v1672_v62, %v1659_v13 }
 0x3f3   : > { %v5881_v4 = vadd.f32 1.0, %v4812_v49  ;;  %v1553_v30 = vor.u32 1.1754944e-38, %v1552_v39 }
 0x3f4   : > { %4815 = vrcp.f32 %v1782_v50  ;;  %v1762_v47 = vmul.f32 %v5826_v43, %v1757_v51  ;;  %1606 = vst [vmem:[#allocation3 + $0x61] sm:$0xff] %v1576_v53  ;;  %v1795_v2 = vand.u32 2147483647, %v1782_v50  ;;  %v1797_v34 = vand.u32 2147483648, %v1782_v50 }
 0x3f5   : > { %4817 = vrcp.f32 %v5881_v4  ;;  %v4814_v5 = vpop.eup %4813  ;;  %vm1791_vm2 = vweird.f32 %v1782_v50  ;;  %v1565_v16 = vand.u32 2147483647, %v5881_v4  ;;  %v1567_v32 = vand.u32 2147483648, %v5881_v4 }
 0x3f6   : > { %v5886_v9 = vadd.f32 %v5833_v46, %v1762_v47  ;;  %v1632_v38 = vld [vmem:[#allocation3 + $0x50] ss:$2 sm:$0x1f]  ;;  %v1640_v42 = vld [vmem:[#allocation3 + $0x51] ss:$2 sm:$0x1f]  ;;  %v1542_v23 = vmul.f32 %v4814_v5, %v5873_v44  ;;  %vm1547_vm6 = vweird.f32 %v4814_v5  ;;  %vm1561_vm10 = vweird.f32 %v5881_v4 }
 0x3f7   : > { %v1685_v10 = vmul.f32 %v5774_v0, %v1632_v38  ;;  %v1703_v60 = vmul.f32 %v5792_v33, %v1632_v38  ;;  %v1694_v48 = vmul.f32 %v5789_v55, %v1640_v42  ;;  %vm5901_vm5 = vcmp.eq.f32.partialorder %v1795_v2, 8.507059e+37  ;;  %vm1548_vm8 = vmor %vm1546_vm1, %vm1547_vm6 }
 0x3f8   : > { %v3872_v12 = vmul.f32 -1.442695, %v5886_v9  ;;  %v1543_v37 = vsub.f32 1.0, %v1542_v23  ;;  %v1798_v1 = vor.u32 1.1754944e-38, %v1797_v34  ;;  %v1568_v2 = vor.u32 1.1754944e-38, %v1567_v32 }
 0x3f9   : > { %v1689_v26 = vadd.f32 %v1685_v10, %v1680_v58  ;;  %v1711_v18 = vrot.slane %v1703_v60, 1  ;;  %vm1566_vm12 = vcmp.eq.f32.partialorder %v1565_v16, 8.507059e+37 }
 0x3fa   : > { %v4816_v59 = vpop.eup %4815  ;;  %4819 = vpow2.f32 %v3872_v12  ;;  %v1544_v17 = vmul.f32 %v4814_v5, %v1543_v37 }
 0x3fb   : > { %v1787_v63 = vmul.f32 %v4816_v59, %v1782_v50  ;;  %v4818_v8 = vpop.eup %4817  ;;  %vm1792_vm3 = vweird.f32 %v4816_v59  ;;  %v1698_v6 = vadd.f32 %v1694_v48, %v1689_v26  ;;  %v1615_v24 = vld [vmem:[#allocation3 + $0x60] ss:$2 sm:$0x1f]  ;;  %v1625_v14 = vld [vmem:[#allocation3 + $0x61] ss:$2 sm:$0x1f] }
 0x3fc   : > { %v1557_v19 = vmul.f32 %v4818_v8, %v5881_v4  ;;  %v1724_v56 = vmul.f32 %v5803_v45, %v1615_v24  ;;  %v1742_v61 = vmul.f32 %v5810_v54, %v1615_v24  ;;  %vm1793_vm7 = vmor %vm1791_vm2, %vm1792_vm3  ;;  %v1545_v20 = vadd.f32 %v4814_v5, %v1544_v17 }
 0x3fd   : > { %v1788_v31 = vsub.f32 1.0, %v1787_v63  ;;  %v1719_v52 = vadd.f32 %v1711_v18, %v1698_v6  ;;  %v1733_v13 = vmul.f32 %v5806_v40, %v1625_v14  ;;  %vm1562_vm9 = vweird.f32 %v4818_v8 }
 0x3fe   : > { %v1558_v49 = vsub.f32 1.0, %v1557_v19  ;;  %v1750_v53 = vrot.slane %v1742_v61, 1  ;;  %v1549_v47 = vsel %vm1548_vm8, %v4814_v5, %v1545_v20  ;;  %v1647_v63 = vmul.f32 %v5756_v27, %v1615_v24  ;;  %vm1563_vm11 = vmor %vm1561_vm10, %vm1562_vm9 }
 0x3ff   : > { %v1789_v3 = vmul.f32 %v4816_v59, %v1788_v31  ;;  %v1728_v7 = vadd.f32 %v1724_v56, %v1719_v52  ;;  %v1656_v5 = vmul.f32 %v5759_v22, %v1625_v14 }
 0x400   : > { %v4820_v15 = vpop.eup %4819  ;;  %v1559_v42 = vmul.f32 %v4818_v8, %v1558_v49 }
 0x401   : > { %v1790_v21 = vadd.f32 %v4816_v59, %v1789_v3  ;;  %v1783_v50 = vadd.f32 1.0, %v4820_v15  ;;  %v1737_v38 = vadd.f32 %v1733_v13, %v1728_v7  ;;  %v1660_v27 = vadd.f32 %v1656_v5, %v1647_v63  ;;  %v4574_v63 = vld [vmem:[%s6753_s1 + $0x160] sm:$0xff] }
 0x402   : > { %v1560_v23 = vadd.f32 %v4818_v8, %v1559_v42  ;;  %v4575_v42 = vld [vmem:[%s6753_s1 + $0x168] sm:$0xff] }
 0x403   : > { %v1794_v51 = vsel %vm1793_vm7, %v4816_v59, %v1790_v21  ;;  %v1554_v59 = vsel %vm5896_vm4, %v1553_v30, %v1549_v47  ;;  %4821 = vrcp.f32 %v1783_v50  ;;  %v1758_v44 = vadd.f32 %v1750_v53, %v1737_v38 }
 0x404   : > { %v1799_v62 = vsel %vm5901_vm5, %v1798_v1, %v1794_v51  ;;  %v1577_v58 = vmul.f32 %v1554_v59, %v5837_v11  ;;  %v1564_v10 = vsel %vm1563_vm11, %v4818_v8, %v1560_v23  ;;  %v1810_v31 = vand.u32 2147483647, %v1783_v50 }
 0x405   : > { %v5917_v29 = vmul.f32 %v1799_v62, %v5846_v57  ;;  %v1665_v57 = vmul.f32 %v5762_v25, %v1615_v24  ;;  %v1763_v12 = vmul.f32 %v5826_v43, %v1758_v44  ;;  %v1569_v34 = vsel %vm1566_vm12, %v1568_v2, %v1564_v10  ;;  %v4572_v2 = vld [vmem:[%s6753_s1 + $0x150] sm:$0xff] }
 0x406   : > { %1607 = vst [vmem:[#allocation3 + $0x71] sm:$0xff] %v1577_v58  ;;  %v1578_v4 = vmul.f32 %v1569_v34, %v5853_v28  ;;  %v1812_v26 = vand.u32 2147483648, %v1783_v50  ;;  %vm1806_vm14 = vweird.f32 %v1783_v50  ;;  %vm1811_vm0 = vcmp.eq.f32.partialorder %v1810_v31, 8.507059e+37 }
 0x407   : > { %1854 = vst [vmem:[#allocation1] ss:$2 sm:$0xff] %v5917_v29  ;;  %v5930_v11 = vadd.f32 %v5833_v46, %v1763_v12  ;;  %v1673_v37 = vrot.slane %v1665_v57, 1  ;;  %v4573_v57 = vld [vmem:[%s6753_s1 + $0x158] sm:$0xff] }
 0x408   : > { %1608 = vst [vmem:[#allocation3 + $0x81] sm:$0xff] %v1578_v4  ;;  %v1813_v19 = vor.u32 1.1754944e-38, %v1812_v26 }
 0x409   : > { %v4822_v60 = vpop.eup %4821  ;;  %v3873_v25 = vmul.f32 -1.442695, %v5930_v11  ;;  %v1681_v17 = vadd.f32 %v1673_v37, %v1660_v27 }
 0x40a   : > { %v1802_v22 = vmul.f32 %v4822_v60, %v1783_v50  ;;  %vm1807_vm13 = vweird.f32 %v4822_v60 }
 0x40b   : > { %4823 = vpow2.f32 %v3873_v25  ;;  %vm1808_vm15 = vmor %vm1806_vm14, %vm1807_vm13  ;;  %v4897_v25 = vmov 16.0  }
 0x40c   : > { %v1803_v39 = vsub.f32 1.0, %v1802_v22  ;;  %v4570_v22 = vld [vmem:[%s6753_s1 + $0x140] sm:$0xff] }
 0x40d   : > { %v1634_v48 = vld [vmem:[#allocation3 + $0x70] ss:$2 sm:$0x1f]  ;;  %v1642_v8 = vld [vmem:[#allocation3 + $0x71] ss:$2 sm:$0x1f] }
 0x40e   : > { %v1804_v41 = vmul.f32 %v4822_v60, %v1803_v39  ;;  %v1686_v3 = vmul.f32 %v5774_v0, %v1634_v48  ;;  %v1704_v28 = vmul.f32 %v5792_v33, %v1634_v48  ;;  %v1695_v24 = vmul.f32 %v5789_v55, %v1642_v8  ;;  %v4585_v39 = vld [vmem:[%s6753_s1 + $0x1b8] sm:$0xff]  ;;  %v4584_v48 = vld [vmem:[%s6753_s1 + $0x1b0] sm:$0xff] }
 0x40f   : > { %v1617_v35 = vld [vmem:[#allocation3 + $0x80] ss:$2 sm:$0x1f]  ;;  %v1627_v0 = vld [vmem:[#allocation3 + $0x81] ss:$2 sm:$0x1f]  ;;  %2050 = vmatpush.bf16.msrb.mxu0 %v4585_v39 }
 0x410   : > { %v1805_v6 = vadd.f32 %v4822_v60, %v1804_v41  ;;  %v1690_v18 = vadd.f32 %v1686_v3, %v1681_v17  ;;  %v1712_v21 = vrot.slane %v1704_v28, 1  ;;  %v1725_v52 = vmul.f32 %v5803_v45, %v1617_v35  ;;  %v4583_v3 = vld [vmem:[%s6753_s1 + $0x1a8] sm:$0xff]  ;;  %v4600_v39 = vld [vmem:[%s6753_s1 + $0x230] sm:$0xff] }
 0x411   : > { %v4824_v1 = vpop.eup %4823  ;;  %v1743_v49 = vmul.f32 %v5810_v54, %v1617_v35  ;;  %v1734_v16 = vmul.f32 %v5806_v40, %v1627_v0  ;;  %v4577_v54 = vld [vmem:[%s6753_s1 + $0x178] sm:$0xff]  ;;  %v4576_v40 = vld [vmem:[%s6753_s1 + $0x170] sm:$0xff] }
 0x412   : > { %v1809_v14 = vsel %vm1808_vm15, %v4822_v60, %v1805_v6  ;;  %v1699_v56 = vadd.f32 %v1695_v24, %v1690_v18  ;;  %v1784_v30 = vadd.f32 1.0, %v4824_v1  ;;  %1949 = vmatpush.bf16.msrb.mxu2 %v4577_v54  ;;  %v4582_v6 = vld [vmem:[%s6753_s1 + $0x1a0] sm:$0xff] }
 0x413   : > { %v1814_v61 = vsel %vm1811_vm0, %v1813_v19, %v1809_v14  ;;  %v1751_v15 = vrot.slane %v1743_v49, 1  ;;  %2051 = vmatpush.bf16.msrb.mxu0 %v4584_v48  ;;  %v4578_v54 = vld [vmem:[%s6753_s1 + $0x180] sm:$0xff]  ;;  %v4588_v48 = vld [vmem:[%s6753_s1 + $0x1d0] sm:$0xff] }
 0x414   : > { %v5939_v33 = vmul.f32 %v1814_v61, %v5886_v9  ;;  %v1720_v20 = vadd.f32 %v1712_v21, %v1699_v56  ;;  %4825 = vrcp.f32 %v1784_v30  ;;  %v1827_v50 = vand.u32 2147483648, %v1784_v30 }
 0x415   : > { %v1825_v47 = vand.u32 2147483647, %v1784_v30  ;;  %vm1821_vm2 = vweird.f32 %v1784_v30 }
 0x416   : > { %1856 = vst [vmem:[#allocation1 + $0x1] ss:$2 sm:$0xff] %v5939_v33  ;;  %v1729_v55 = vadd.f32 %v1725_v52, %v1720_v20  ;;  %1950 = vmatpush.bf16.msrb.mxu2 %v4576_v40 }
 0x417   : > { %vm1826_vm4 = vcmp.eq.f32.partialorder %v1825_v47, 8.507059e+37  ;;  %2052 = vmatpush.bf16.msrb.mxu0 %v4583_v3 }
 0x418   : > { %v1738_v32 = vadd.f32 %v1734_v16, %v1729_v55  ;;  %v1947_v16 = vrot.slane %v5782_v36, 6 }
 0x41a   : > { %v1759_v51 = vadd.f32 %v1751_v15, %v1738_v32  ;;  %v4826_v7 = vpop.eup %4825  ;;  %1951 = vmatpush.bf16.msrb.mxu2 %v4575_v42 }
 0x41b   : > { %v1817_v45 = vmul.f32 %v4826_v7, %v1784_v30  ;;  %vm1822_vm1 = vweird.f32 %v4826_v7  ;;  %2053 = vmatpush.bf16.msrb.mxu0 %v4582_v6 }
 0x41c   : > { %v1764_v13 = vmul.f32 %v5826_v43, %v1759_v51  ;;  %vm1823_vm3 = vmor %vm1821_vm2, %vm1822_vm1  ;;  %v1828_v43 = vor.u32 1.1754944e-38, %v1827_v50  ;;  %v4581_v51 = vld [vmem:[%s6753_s1 + $0x198] sm:$0xff] }
 0x41d   : > { %v1818_v62 = vsub.f32 1.0, %v1817_v45  ;;  %v1861_v18 = vld.sshfl [vmem:[#allocation1] sm:$0xff pattern:$0x75316420]  ;;  %v4580_v45 = vld [vmem:[%s6753_s1 + $0x190] sm:$0xff] }
 0x41e   : > { %v1769_v9 = vadd.f32 %v5833_v46, %v1764_v13  ;;  %1952 = vmatpush.bf16.msrb.mxu2 %v4574_v63  ;;  %v4579_v13 = vld [vmem:[%s6753_s1 + $0x188] sm:$0xff] }
 0x41f   : > { %v1819_v53 = vmul.f32 %v4826_v7, %v1818_v62  ;;  %2054 = vmatpush.bf16.msrb.mxu0 %v4581_v51 }
 0x420   : > { %v3874_v38 = vmul.f32 -1.442695, %v1769_v9 }
 0x421   : > { %v1820_v59 = vadd.f32 %v4826_v7, %v1819_v53 }
 0x422   : > { %4827 = vpow2.f32 %v3874_v38  ;;  %1953 = vmatpush.bf16.msrb.mxu2 %v4573_v57  ;;  %v2048_v57 = vrot.slane %v5782_v36, 7 }
 0x423   : > { %v1824_v46 = vsel %vm1823_vm3, %v4826_v7, %v1820_v59  ;;  %2055 = vmatpush.bf16.msrb.mxu0 %v4580_v45 }
 0x424   : > { %v1829_v44 = vsel %vm1826_vm4, %v1828_v43, %v1824_v46 }
 0x425   : > { %v5956_v58 = vmul.f32 %v1829_v44, %v5930_v11  ;;  %v4571_v11 = vld [vmem:[%s6753_s1 + $0x148] sm:$0xff] }
 0x426   : > { %1954 = vmatpush.bf16.msrb.mxu2 %v4572_v2 }
 0x427   : > { %1858 = vst [vmem:[#allocation1 + $0x10] ss:$2 sm:$0xff] %v5956_v58  ;;  %2056 = vmatpush.bf16.msrb.mxu0 %v4579_v13 }
 0x428   : > { %v4828_v23 = vpop.eup %4827 }
 0x429   : > { %v1785_v5 = vadd.f32 1.0, %v4828_v23 }
 0x42a   : > { %1955 = vmatpush.bf16.msrb.mxu2 %v4571_v11  ;;  %v4592_v11 = vld [vmem:[%s6753_s1 + $0x1f0] sm:$0xff] }
 0x42b   : > { %4829 = vrcp.f32 %v1785_v5  ;;  %v1842_v4 = vand.u32 2147483648, %v1785_v5  ;;  %v1840_v27 = vand.u32 2147483647, %v1785_v5  ;;  %vm1836_vm6 = vweird.f32 %v1785_v5  ;;  %2057 = vmatpush.bf16.msrb.mxu0 %v4578_v54 }
 0x42c   : > { %4831 = vrcp.f32 %v4897_v25  ;;  %v4589_v25 = vld [vmem:[%s6753_s1 + $0x1d8] sm:$0xff] }
 0x42d   : > { %v1843_v31 = vor.u32 1.1754944e-38, %v1842_v4  ;;  %vm1841_vm8 = vcmp.eq.f32.partialorder %v1840_v27, 8.507059e+37 }
 0x42e   : > { %1956 = vmatpush.bf16.msrb.mxu2 %v4570_v22  ;;  %v4601_v22 = vld [vmem:[%s6753_s1 + $0x238] sm:$0xff] }
 0x42f   : > { %2257 = vmatpush.bf16.msrb.mxu3 %v4601_v22 }
 0x431   : > { %v4830_v12 = vpop.eup %4829 }
 0x432   : > { %v1832_v10 = vmul.f32 %v4830_v12, %v1785_v5  ;;  %vm1837_vm5 = vweird.f32 %v4830_v12  ;;  %v4832_v41 = vpop.eup %4831 }
 0x433   : > { %vm1838_vm7 = vmor %vm1836_vm6, %vm1837_vm5  ;;  %v1873_v28 = vmul.f32 16.0, %v4832_v41  ;;  %vm1877_vm9 = vweird.f32 %v4832_v41  ;;  %2258 = vmatpush.bf16.msrb.mxu3 %v4600_v39 }
 0x434   : > { %v1833_v34 = vsub.f32 1.0, %v1832_v10 }
 0x435   : > { %v1874_v19 = vsub.f32 1.0, %v1873_v28 }
 0x436   : > { %v1834_v60 = vmul.f32 %v4830_v12, %v1833_v34  ;;  %v4593_v34 = vld [vmem:[%s6753_s1 + $0x1f8] sm:$0xff] }
 0x437   : > { %v1875_v14 = vmul.f32 %v4832_v41, %v1874_v19  ;;  %2171 = vmatpush.bf16.msra.mxu2 %v4593_v34 }
 0x438   : > { %v1835_v37 = vadd.f32 %v4830_v12, %v1834_v60  ;;  %v4591_v60 = vld [vmem:[%s6753_s1 + $0x1e8] sm:$0xff] }
 0x439   : > { %v1876_v52 = vadd.f32 %v4832_v41, %v1875_v14 }
 0x43a   : > { %v1839_v26 = vsel %vm1838_vm7, %v4830_v12, %v1835_v37  ;;  %v4590_v37 = vld [vmem:[%s6753_s1 + $0x1e0] sm:$0xff] }
 0x43b   : > { %v1844_v8 = vsel %vm1841_vm8, %v1843_v31, %v1839_v26  ;;  %v5989_v0 = vsel %vm1877_vm9, %v4832_v41, %v1876_v52  ;;  %2172 = vmatpush.bf16.msra.mxu2 %v4592_v11 }
 0x43c   : > { %v5980_v17 = vmul.f32 %v1844_v8, %v1769_v9  ;;  %v4599_v8 = vld [vmem:[%s6753_s1 + $0x228] sm:$0xff] }
 0x43d   : > { %2259 = vmatpush.bf16.msrb.mxu3 %v4599_v8 }
 0x43e   : > { %1860 = vst [vmem:[#allocation1 + $0x11] ss:$2 sm:$0xff] %v5980_v17 }
 0x43f   : > { %2173 = vmatpush.bf16.msra.mxu2 %v4591_v60 }
 0x443   : > { %2174 = vmatpush.bf16.msra.mxu2 %v4590_v37 }
 0x445   : > { %v1862_v24 = vld.sshfl [vmem:[#allocation1 + $0x10] sm:$0xff pattern:$0x75316420] }
 0x446   : > { %v1865_v35 = vadd.f32 %v1862_v24, %v1861_v18  ;;  %v4587_v18 = vld [vmem:[%s6753_s1 + $0x1c8] sm:$0xff]  ;;  %v4598_v24 = vld [vmem:[%s6753_s1 + $0x220] sm:$0xff] }
 0x447   : > { %2175 = vmatpush.bf16.msra.mxu2 %v4589_v25  ;;  %2260 = vmatpush.bf16.msrb.mxu3 %v4598_v24  ;;  %v2365_v24 = vld [vmem:[#allocation4 + $0x2] sm:$0xf] }
 0x448   : > { %v1866_v1 = vrot.slane %v1865_v35, 4 }
 0x44a   : > { %v1867_v56 = vadd.f32 %v1866_v1, %v1865_v35 }
 0x44b   : > { %2176 = vmatpush.bf16.msra.mxu2 %v4588_v48 }
 0x44c   : > { %v1868_v21 = vrot.slane %v1867_v56, 2 }
 0x44e   : > { %v1869_v61 = vadd.f32 %v1868_v21, %v1867_v56  ;;  %v4586_v56 = vld [vmem:[%s6753_s1 + $0x1c0] sm:$0xff]  ;;  %v4597_v21 = vld [vmem:[%s6753_s1 + $0x218] sm:$0xff] }
 0x44f   : > { %2177 = vmatpush.bf16.msra.mxu2 %v4587_v18  ;;  %2261 = vmatpush.bf16.msrb.mxu3 %v4597_v21 }
 0x450   : > { %v1870_v30 = vrot.slane %v1869_v61, 1 }
 0x452   : > { %v1871_v20 = vadd.f32 %v1870_v30, %v1869_v61 }
 0x453   : > { %2178 = vmatpush.bf16.msra.mxu2 %v4586_v56 }
 0x454   : > { %v1879_v49 = vmul.f32 %v5989_v0, %v1871_v20 }
 0x456   : > { %v1880_v55 = vpack.c.bf16 %v1879_v49, %v1879_v49  ;;  %v4596_v49 = vld [vmem:[%s6753_s1 + $0x210] sm:$0xff] }
 0x457   : > { %2262 = vmatpush.bf16.msrb.mxu3 %v4596_v49 }
 0x458   : > { %1957 = vmatmul.bf16.vlgmr.msrb.gmra.mxu2 %v1880_v55 }
 0x4db   : > { %v1958_v32 = vpop.f32.mrf.mxu2 }
 0x4dc   : > { %v1959_v15 = vadd.f32 %v1958_v32, %v1947_v16 }
 0x4de   : > { %v3923_v7 = vmul.f32 -1.442695, %v1959_v15 }
 0x4e0   : > { %4833 = vpow2.f32 %v3923_v7 }
 0x4e3   : > { %v1960_v62 = vpop.f32.mrf.mxu2 }
 0x4e6   : > { %v4834_v9 = vpop.eup %4833 }
 0x4e7   : > { %v1965_v50 = vadd.f32 1.0, %v4834_v9 }
 0x4e9   : > { %4835 = vrcp.f32 %v1965_v50  ;;  %v1977_v40 = vand.u32 2147483648, %v1965_v50  ;;  %v1975_v43 = vand.u32 2147483647, %v1965_v50  ;;  %vm1971_vm11 = vweird.f32 %v1965_v50 }
 0x4eb   : > { %v1978_v42 = vor.u32 1.1754944e-38, %v1977_v40  ;;  %vm1976_vm13 = vcmp.eq.f32.partialorder %v1975_v43, 8.507059e+37 }
 0x4ef   : > { %v4836_v53 = vpop.eup %4835 }
 0x4f0   : > { %v1967_v47 = vmul.f32 %v4836_v53, %v1965_v50  ;;  %vm1972_vm10 = vweird.f32 %v4836_v53 }
 0x4f1   : > { %vm1973_vm12 = vmor %vm1971_vm11, %vm1972_vm10 }
 0x4f2   : > { %v1968_v38 = vsub.f32 1.0, %v1967_v47 }
 0x4f4   : > { %v1969_v59 = vmul.f32 %v4836_v53, %v1968_v38 }
 0x4f6   : > { %v1970_v46 = vadd.f32 %v4836_v53, %v1969_v59 }
 0x4f8   : > { %v1974_v44 = vsel %vm1973_vm12, %v4836_v53, %v1970_v46 }
 0x4f9   : > { %v1979_v23 = vsel %vm1976_vm13, %v1978_v42, %v1974_v44 }
 0x4fa   : > { %v1981_v63 = vmul.f32 %v1979_v23, %v1959_v15 }
 0x4fc   : > { %v1982_v5 = vpack.c.bf16 %v1981_v63, %v1981_v63 }
 0x4fe   : > { %2058 = vmatmul.bf16.vlgmr.msrb.gmra.mxu0 %v1982_v5 }
 0x57b   : > { %v2059_v2 = vpop.f32.mrf.mxu0 }
 0x57c   : > { %v2060_v12 = vadd.f32 %v2059_v2, %v2048_v57 }
 0x57e   : > { %v3972_v10 = vmul.f32 -1.442695, %v2060_v12 }
 0x580   : > { %4837 = vpow2.f32 %v3972_v10 }
 0x583   : > { %v2061_v4 = vpop.f32.mrf.mxu0 }
 0x586   : > { %v4838_v36 = vpop.eup %4837 }
 0x587   : > { %v2066_v27 = vadd.f32 1.0, %v4838_v36 }
 0x589   : > { %4839 = vrcp.f32 %v2066_v27  ;;  %v2078_v3 = vand.u32 2147483648, %v2066_v27  ;;  %v2076_v6 = vand.u32 2147483647, %v2066_v27  ;;  %vm2072_vm15 = vweird.f32 %v2066_v27 }
 0x58b   : > { %v2079_v35 = vor.u32 1.1754944e-38, %v2078_v3  ;;  %vm2077_vm1 = vcmp.eq.f32.partialorder %v2076_v6, 8.507059e+37 }
 0x58f   : > { %v4840_v31 = vpop.eup %4839 }
 0x590   : > { %v2068_v26 = vmul.f32 %v4840_v31, %v2066_v27  ;;  %vm2073_vm14 = vweird.f32 %v4840_v31 }
 0x591   : > { %vm2074_vm0 = vmor %vm2072_vm15, %vm2073_vm14 }
 0x592   : > { %v2069_v41 = vsub.f32 1.0, %v2068_v26  ;;  %v2352_v26 = vld [vmem:[#allocation4 + $0x1] sm:$0xf] }
 0x594   : > { %v2070_v28 = vmul.f32 %v4840_v31, %v2069_v41 }
 0x596   : > { %v2071_v19 = vadd.f32 %v4840_v31, %v2070_v28 }
 0x598   : > { %v2075_v1 = vsel %vm2074_vm0, %v4840_v31, %v2071_v19  ;;  %v2339_v31 = vld [vmem:[#allocation4] sm:$0xf] }
 0x599   : > { %v2080_v14 = vsel %vm2077_vm1, %v2079_v35, %v2075_v1 }
 0x59a   : > { %v2082_v52 = vperm.slane %v2080_v14, 0 }
 0x59c   : > { %v2084_v61 = vrot.slane %v2082_v52, 4  ;;  %v2086_v30 = vmul.f32 %v2082_v52, %v5917_v29  ;;  %v2088_v20 = vmul.f32 %v2082_v52, %v5956_v58  ;;  %v4595_v29 = vld [vmem:[%s6753_s1 + $0x208] sm:$0xff] }
 0x59d   : > { %2263 = vmatpush.bf16.msrb.mxu3 %v4595_v29 }
 0x59e   : > { %v2087_v55 = vmul.f32 %v2084_v61, %v5939_v33  ;;  %v2089_v16 = vmul.f32 %v2084_v61, %v5980_v17  ;;  %2094 = vst [vmem:[#allocation1] ss:$2 sm:$0xff] %v2086_v30  ;;  %v4594_v33 = vld [vmem:[%s6753_s1 + $0x200] sm:$0xff]  ;;  %v6091_v30 = vld [vmem:[%s6754_s2 + $0x28] sm:$0xff] }
 0x59f   : > { %2098 = vst [vmem:[#allocation1 + $0x10] ss:$2 sm:$0xff] %v2088_v20  ;;  %v6061_v17 = vld [vmem:[%s6754_s2 + $0x20] sm:$0xff]  ;;  %v6097_v29 = vperm.slane %v6091_v30, 0 }
 0x5a0   : > { %2096 = vst [vmem:[#allocation1 + $0x1] ss:$2 sm:$0xff] %v2087_v55  ;;  %v2185_v7 = vperm.slane %v6061_v17, 0  ;;  %v2188_v13 = vperm.slane %v6061_v17, 1  ;;  %v2271_v47 = vperm.slane %v6061_v17, 2  ;;  %v2274_v38 = vperm.slane %v6061_v17, 3 }
 0x5a1   : > { %2100 = vst [vmem:[#allocation1 + $0x11] ss:$2 sm:$0xff] %v2089_v16  ;;  %2264 = vmatpush.bf16.msrb.mxu3 %v4594_v33  ;;  %v6077_v22 = vperm.slane %v6061_v17, 4  ;;  %v6080_v25 = vperm.slane %v6061_v17, 5  ;;  %v6085_v19 = vperm.slane %v6061_v17, 6  ;;  %v6094_v55 = vperm.slane %v6061_v17, 7 }
 0x5a3   : > { %v2344_v6 = vmul.f32 %v6077_v22, %v2339_v31  ;;  %v2357_v18 = vmul.f32 %v6080_v25, %v2352_v26  ;;  %v2370_v61 = vmul.f32 %v6085_v19, %v2365_v24  ;;  %v6121_v26 = vperm.slane %v6091_v30, 4 }
 0x5a4   : > { %v6126_v24 = vperm.slane %v6091_v30, 5 }
 0x5a5   : > { %v2361_v52 = vadd.f32 %v2357_v18, %v2344_v6 }
 0x5a7   : > { %v2101_v58 = vld.sshfl [vmem:[#allocation1] sm:$0xff pattern:$0x75316420]  ;;  %v2374_v33 = vadd.f32 %v2370_v61, %v2361_v52 }
 0x5a8   : > { %v2102_v32 = vld.sshfl [vmem:[#allocation1 + $0x10] sm:$0xff pattern:$0x75316420] }
 0x5a9   : > { %v2105_v15 = vpack.c.bf16 %v2102_v32, %v2101_v58 }
 0x5ab   : > { %2179 = vmatmul.bf16.vlgmr.msra.gmra.mxu2 %v2105_v15 }
 0x62e   : > { %v2180_v51 = vpop.f32.mrf.mxu2 }
 0x62f   : > { %v2186_v45 = vmul.f32 %v2185_v7, %v2180_v51 }
 0x631   : > { %v6065_v54 = vadd.f32 %v2188_v13, %v2186_v45 }
 0x636   : > { %v2182_v62 = vpop.f32.mrf.mxu2 }
 0x637   : > { %v2187_v9 = vmul.f32 %v2185_v7, %v2182_v62  ;;  %v6102_v62 = vperm.slane %v6091_v30, 1 }
 0x639   : > { %v6067_v50 = vadd.f32 %v2188_v13, %v2187_v9 }
 0x63b   : > { %v2191_v53 = vpack.c.bf16 %v6067_v50, %v6065_v54 }
 0x63d   : > { %2265 = vmatmul.bf16.vlgmr.msrb.gmra.mxu3 %v2191_v53 }
 0x6c0   : > { %v2266_v40 = vpop.f32.mrf.mxu3 }
 0x6c1   : > { %v2272_v59 = vmul.f32 %v2271_v47, %v2266_v40 }
 0x6c3   : > { %v2275_v43 = vadd.f32 %v2274_v38, %v2272_v59 }
 0x6c5   : > { %v4069_v46 = vmul.f32 -1.442695, %v2275_v43 }
 0x6c7   : > { %4841 = vpow2.f32 %v4069_v46 }
 0x6c8   : > { %v2268_v42 = vpop.f32.mrf.mxu3 }
 0x6c9   : > { %v2273_v44 = vmul.f32 %v2271_v47, %v2268_v42 }
 0x6cb   : > { %v6073_v23 = vadd.f32 %v2274_v38, %v2273_v44 }
 0x6cd   : > { %v4842_v63 = vpop.eup %4841  ;;  %v4070_v5 = vmul.f32 -1.442695, %v6073_v23 }
 0x6ce   : > { %v2283_v57 = vadd.f32 1.0, %v4842_v63  ;;  %v6109_v63 = vperm.slane %v6091_v30, 2 }
 0x6cf   : > { %4843 = vpow2.f32 %v4070_v5 }
 0x6d0   : > { %4845 = vrcp.f32 %v2283_v57  ;;  %v2296_v4 = vand.u32 2147483648, %v2283_v57  ;;  %v2294_v36 = vand.u32 2147483647, %v2283_v57  ;;  %vm2290_vm3 = vweird.f32 %v2283_v57 }
 0x6d2   : > { %v2297_v39 = vor.u32 1.1754944e-38, %v2296_v4  ;;  %vm2295_vm5 = vcmp.eq.f32.partialorder %v2294_v36, 8.507059e+37 }
 0x6d5   : > { %v4844_v2 = vpop.eup %4843 }
 0x6d6   : > { %v4846_v12 = vpop.eup %4845  ;;  %v2284_v10 = vadd.f32 1.0, %v4844_v2 }
 0x6d7   : > { %v2286_v34 = vmul.f32 %v4846_v12, %v2283_v57  ;;  %vm2291_vm2 = vweird.f32 %v4846_v12 }
 0x6d8   : > { %4847 = vrcp.f32 %v2284_v10  ;;  %vm2292_vm4 = vmor %vm2290_vm3, %vm2291_vm2  ;;  %v2311_v35 = vand.u32 2147483648, %v2284_v10  ;;  %v2309_v56 = vand.u32 2147483647, %v2284_v10  ;;  %vm2305_vm7 = vweird.f32 %v2284_v10 }
 0x6d9   : > { %v2287_v11 = vsub.f32 1.0, %v2286_v34 }
 0x6da   : > { %v2312_v20 = vor.u32 1.1754944e-38, %v2311_v35  ;;  %vm2310_vm9 = vcmp.eq.f32.partialorder %v2309_v56, 8.507059e+37 }
 0x6db   : > { %v2288_v60 = vmul.f32 %v4846_v12, %v2287_v11 }
 0x6dd   : > { %v2289_v27 = vadd.f32 %v4846_v12, %v2288_v60 }
 0x6de   : > { %v4848_v37 = vpop.eup %4847 }
 0x6df   : > { %v2293_v48 = vsel %vm2292_vm4, %v4846_v12, %v2289_v27  ;;  %v2301_v8 = vmul.f32 %v4848_v37, %v2284_v10  ;;  %vm2306_vm6 = vweird.f32 %v4848_v37  ;;  %v6114_v12 = vperm.slane %v6091_v30, 3 }
 0x6e0   : > { %v2298_v41 = vsel %vm2295_vm5, %v2297_v39, %v2293_v48  ;;  %vm2307_vm8 = vmor %vm2305_vm7, %vm2306_vm6 }
 0x6e1   : > { %v2315_v3 = vmul.f32 %v2298_v41, %v2275_v43  ;;  %v2302_v28 = vsub.f32 1.0, %v2301_v8 }
 0x6e3   : > { %v2319_v1 = vrot.slane %v2315_v3, 4  ;;  %2335 = vst [vmem:[#allocation4 + $0x9] sm:$0xf] %v2315_v3  ;;  %v2303_v14 = vmul.f32 %v4848_v37, %v2302_v28 }
 0x6e5   : > { %2336 = vst [vmem:[#allocation4 + $0x11] sm:$0xf] %v2319_v1  ;;  %v2304_v21 = vadd.f32 %v4848_v37, %v2303_v14 }
 0x6e7   : > { %v2308_v49 = vsel %vm2307_vm8, %v4848_v37, %v2304_v21 }
 0x6e8   : > { %v2313_v16 = vsel %vm2310_vm9, %v2312_v20, %v2308_v49 }
 0x6e9   : > { %v2316_v17 = vmul.f32 %v2313_v16, %v6073_v23 }
 0x6ea   : > { %v2340_v58 = vld [vmem:[#allocation4 + $0x8] sm:$0xf] }
 0x6eb   : > { %v2353_v32 = vld [vmem:[#allocation4 + $0x9] sm:$0xf]  ;;  %v2345_v51 = vmul.f32 %v6077_v22, %v2340_v58  ;;  %2337 = vst [vmem:[#allocation4 + $0x19] sm:$0xf] %v2316_v17  ;;  %v2320_v4 = vrot.slane %v2316_v17, 4 }
 0x6ec   : > { %v2366_v15 = vld [vmem:[#allocation4 + $0xa] sm:$0xf]  ;;  %v2358_v7 = vmul.f32 %v6080_v25, %v2353_v32  ;;  %v2341_v47 = vld [vmem:[#allocation4 + $0x10] sm:$0xf] }
 0x6ed   : > { %v2378_v45 = vld [vmem:[#allocation4 + $0x8] sm:$0xf]  ;;  %v2354_v38 = vld [vmem:[#allocation4 + $0x11] sm:$0xf]  ;;  %v2371_v59 = vmul.f32 %v6085_v19, %v2366_v15  ;;  %v2346_v10 = vmul.f32 %v6077_v22, %v2341_v47  ;;  %2338 = vst [vmem:[#allocation4 + $0x21] sm:$0xf] %v2320_v4 }
 0x6ee   : > { %v2391_v13 = vld [vmem:[#allocation4 + $0x9] sm:$0xf]  ;;  %v2383_v9 = vmul.f32 %v6094_v55, %v2378_v45  ;;  %v2362_v40 = vadd.f32 %v2358_v7, %v2345_v51  ;;  %v2379_v43 = vld [vmem:[#allocation4 + $0x10] sm:$0xf]  ;;  %v2359_v34 = vmul.f32 %v6080_v25, %v2354_v38 }
 0x6ef   : > { %v2404_v53 = vld [vmem:[#allocation4 + $0xa] sm:$0xf]  ;;  %v2392_v42 = vld [vmem:[#allocation4 + $0x11] sm:$0xf]  ;;  %v2396_v44 = vmul.f32 %v6097_v29, %v2391_v13  ;;  %v2384_v57 = vmul.f32 %v6094_v55, %v2379_v43 }
 0x6f0   : > { %v2387_v46 = vadd.f32 %v2383_v9, %v2374_v33  ;;  %v2375_v5 = vadd.f32 %v2371_v59, %v2362_v40  ;;  %v2409_v23 = vmul.f32 %v6102_v62, %v2404_v53  ;;  %v2418_v2 = vld [vmem:[#allocation4 + $0x10] sm:$0xf]  ;;  %v2397_v36 = vmul.f32 %v6097_v29, %v2392_v42 }
 0x6f1   : > { %v2431_v27 = vld [vmem:[#allocation4 + $0x11] sm:$0xf]  ;;  %v2423_v31 = vmul.f32 %v6109_v63, %v2418_v2  ;;  %v2363_v3 = vadd.f32 %v2359_v34, %v2346_v10  ;;  %v2462_v33 = vperm.slane %v6091_v30, 6  ;;  %v2421_v10 = vld [vmem:[#allocation4 + $0x28] sm:$0xf] }
 0x6f2   : > { %v2400_v11 = vadd.f32 %v2396_v44, %v2387_v46  ;;  %v2388_v60 = vadd.f32 %v2384_v57, %v2375_v5  ;;  %v2405_v37 = vld [vmem:[#allocation4 + $0x12] sm:$0xf]  ;;  %v2436_v6 = vmul.f32 %v6114_v12, %v2431_v27  ;;  %v2342_v56 = vld [vmem:[#allocation4 + $0x18] sm:$0xf] }
 0x6f3   : > { %v2367_v48 = vld [vmem:[#allocation4 + $0x12] sm:$0xf]  ;;  %v2410_v18 = vmul.f32 %v6102_v62, %v2405_v37  ;;  %v2355_v21 = vld [vmem:[#allocation4 + $0x19] sm:$0xf]  ;;  %v2347_v20 = vmul.f32 %v6077_v22, %v2342_v56 }
 0x6f4   : > { %v2413_v39 = vadd.f32 %v2409_v23, %v2400_v11  ;;  %v2401_v8 = vadd.f32 %v2397_v36, %v2388_v60  ;;  %v2444_v41 = vld [vmem:[#allocation4 + $0x12] sm:$0xf]  ;;  %v2372_v35 = vmul.f32 %v6085_v19, %v2367_v48  ;;  %v2368_v52 = vld [vmem:[#allocation4 + $0x1a] sm:$0xf]  ;;  %v2360_v49 = vmul.f32 %v6080_v25, %v2355_v21  ;;  %v2381_v9 = vld [vmem:[#allocation4 + $0x20] sm:$0xf] }
 0x6f5   : > { %v2449_v14 = vmul.f32 %v6121_v26, %v2444_v41  ;;  %v2380_v16 = vld [vmem:[#allocation4 + $0x18] sm:$0xf]  ;;  %v2373_v17 = vmul.f32 %v6085_v19, %v2368_v52  ;;  %v2394_v38 = vld [vmem:[#allocation4 + $0x21] sm:$0xf]  ;;  %v2386_v46 = vmul.f32 %v6094_v55, %v2381_v9  ;;  %v4608_v9 = vld [vmem:[%s6753_s1 + $0x270] sm:$0xff] }
 0x6f6   : > { %v2427_v28 = vadd.f32 %v2423_v31, %v2413_v39  ;;  %v2414_v61 = vadd.f32 %v2410_v18, %v2401_v8  ;;  %v2393_v58 = vld [vmem:[#allocation4 + $0x19] sm:$0xf]  ;;  %v2376_v32 = vadd.f32 %v2372_v35, %v2363_v3  ;;  %v2385_v51 = vmul.f32 %v6094_v55, %v2380_v16  ;;  %v2420_v42 = vld [vmem:[#allocation4 + $0x20] sm:$0xf]  ;;  %v2434_v39 = vld [vmem:[#allocation4 + $0x29] sm:$0xf] }
 0x6f7   : > { %v2419_v7 = vld [vmem:[#allocation4 + $0x18] sm:$0xf]  ;;  %v2364_v13 = vadd.f32 %v2360_v49, %v2347_v20  ;;  %v2398_v40 = vmul.f32 %v6097_v29, %v2393_v58  ;;  %v2407_v23 = vld [vmem:[#allocation4 + $0x22] sm:$0xf]  ;;  %v2399_v11 = vmul.f32 %v6097_v29, %v2394_v38  ;;  %v2425_v37 = vmul.f32 %v6109_v63, %v2420_v42 }
 0x6f8   : > { %v2440_v1 = vadd.f32 %v2436_v6, %v2427_v28  ;;  %v2432_v45 = vld [vmem:[#allocation4 + $0x19] sm:$0xf]  ;;  %v2424_v47 = vmul.f32 %v6109_v63, %v2419_v7  ;;  %v2389_v25 = vadd.f32 %v2385_v51, %v2376_v32  ;;  %v2433_v4 = vld [vmem:[#allocation4 + $0x21] sm:$0xf]  ;;  %v2412_v48 = vmul.f32 %v6102_v62, %v2407_v23  ;;  %v2447_v6 = vld [vmem:[#allocation4 + $0x2a] sm:$0xf] }
 0x6f9   : > { %v2406_v53 = vld [vmem:[#allocation4 + $0x1a] sm:$0xf]  ;;  %v2377_v43 = vadd.f32 %v2373_v17, %v2364_v13  ;;  %v2437_v5 = vmul.f32 %v6114_v12, %v2432_v45  ;;  %v2426_v8 = vmul.f32 %v6109_v63, %v2421_v10  ;;  %v2446_v41 = vld [vmem:[#allocation4 + $0x22] sm:$0xf]  ;;  %v2438_v29 = vmul.f32 %v6114_v12, %v2433_v4  ;;  %v4609_v7 = vld [vmem:[%s6753_s1 + $0x278] sm:$0xff] }
 0x6fa   : > { %v2453_v15 = vadd.f32 %v2449_v14, %v2440_v1  ;;  %v2445_v59 = vld [vmem:[#allocation4 + $0x1a] sm:$0xf]  ;;  %v2428_v44 = vadd.f32 %v2424_v47, %v2414_v61  ;;  %v2402_v19 = vadd.f32 %v2398_v40, %v2389_v25  ;;  %v2411_v2 = vmul.f32 %v6102_v62, %v2406_v53  ;;  %2639 = vmatpush.bf16.msra.mxu0 %v4609_v7  ;;  %v4605_v4 = vld [vmem:[%s6753_s1 + $0x258] sm:$0xff] }
 0x6fb   : > { %v2390_v34 = vadd.f32 %v2386_v46, %v2377_v43  ;;  %v2450_v36 = vmul.f32 %v6121_v26, %v2445_v59  ;;  %v2439_v35 = vmul.f32 %v6114_v12, %v2434_v39  ;;  %v2451_v56 = vmul.f32 %v6121_v26, %v2446_v41  ;;  %v4606_v42 = vld [vmem:[%s6753_s1 + $0x260] sm:$0xff] }
 0x6fc   : > { %v2458_v22 = vmul.f32 %v6126_v24, %v2453_v15  ;;  %v2441_v60 = vadd.f32 %v2437_v5, %v2428_v44  ;;  %v2415_v27 = vadd.f32 %v2411_v2, %v2402_v19  ;;  %v2452_v62 = vmul.f32 %v6121_v26, %v2447_v6 }
 0x6fd   : > { %v2403_v31 = vadd.f32 %v2399_v11, %v2390_v34 }
 0x6fe   : > { %v6140_v57 = vadd.f32 %v2462_v33, %v2458_v22  ;;  %v2454_v3 = vadd.f32 %v2450_v36, %v2441_v60  ;;  %v2429_v28 = vadd.f32 %v2425_v37, %v2415_v27  ;;  %2640 = vmatpush.bf16.msra.mxu0 %v4608_v9  ;;  %v4607_v22 = vld [vmem:[%s6753_s1 + $0x268] sm:$0xff] }
 0x6ff   : > { %v2416_v18 = vadd.f32 %v2412_v48, %v2403_v31 }
 0x700   : > { %v4071_v55 = vmul.f32 -1.442695, %v6140_v57  ;;  %v2459_v1 = vmul.f32 %v6126_v24, %v2454_v3  ;;  %v2442_v14 = vadd.f32 %v2438_v29, %v2429_v28 }
 0x701   : > { %v2430_v21 = vadd.f32 %v2426_v8, %v2416_v18 }
 0x702   : > { %4849 = vpow2.f32 %v4071_v55  ;;  %v6154_v52 = vadd.f32 %v2462_v33, %v2459_v1  ;;  %v2455_v63 = vadd.f32 %v2451_v56, %v2442_v14  ;;  %2641 = vmatpush.bf16.msra.mxu0 %v4607_v22  ;;  %v4603_v56 = vld [vmem:[%s6753_s1 + $0x248] sm:$0xff] }
 0x703   : > { %v2443_v61 = vadd.f32 %v2439_v35, %v2430_v21 }
 0x704   : > { %v4072_v20 = vmul.f32 -1.442695, %v6154_v52  ;;  %v2460_v16 = vmul.f32 %v6126_v24, %v2455_v63 }
 0x705   : > { %v2456_v32 = vadd.f32 %v2452_v62, %v2443_v61 }
 0x706   : > { %4851 = vpow2.f32 %v4072_v20  ;;  %v6158_v12 = vadd.f32 %v2462_v33, %v2460_v16  ;;  %2642 = vmatpush.bf16.msra.mxu0 %v4606_v42 }
 0x707   : > { %v2461_v15 = vmul.f32 %v6126_v24, %v2456_v32  ;;  %v4617_v32 = vld [vmem:[%s6753_s1 + $0x2b8] sm:$0xff] }
 0x708   : > { %v4850_v49 = vpop.eup %4849  ;;  %v4073_v51 = vmul.f32 -1.442695, %v6158_v12  ;;  %2738 = vmatpush.bf16.msra.mxu1 %v4617_v32  ;;  %v4619_v32 = vld [vmem:[%s6753_s1 + $0x2c8] sm:$0xff] }
 0x709   : > { %v2479_v58 = vadd.f32 1.0, %v4850_v49  ;;  %v6162_v26 = vadd.f32 %v2462_v33, %v2461_v15 }
 0x70a   : > { %2643 = vmatpush.bf16.msra.mxu0 %v4605_v4 }
 0x70b   : > { %4853 = vrcp.f32 %v2479_v58  ;;  %v4074_v13 = vmul.f32 -1.442695, %v6162_v26  ;;  %v2494_v25 = vand.u32 2147483648, %v2479_v58  ;;  %v2492_v59 = vand.u32 2147483647, %v2479_v58 }
 0x70c   : > { %4855 = vpow2.f32 %v4073_v51  ;;  %v4852_v45 = vpop.eup %4851  ;;  %vm2488_vm11 = vweird.f32 %v2479_v58 }
 0x70d   : > { %v2480_v17 = vadd.f32 1.0, %v4852_v45  ;;  %4857 = vpow2.f32 %v4074_v13  ;;  %v2495_v5 = vor.u32 1.1754944e-38, %v2494_v25  ;;  %vm2493_vm13 = vcmp.eq.f32.partialorder %v2492_v59, 8.507059e+37  ;;  %v4615_v13 = vld [vmem:[%s6753_s1 + $0x2a8] sm:$0xff] }
 0x70f   : > { %4859 = vrcp.f32 %v2480_v17  ;;  %v2507_v36 = vand.u32 2147483647, %v2480_v17  ;;  %v2509_v55 = vand.u32 2147483648, %v2480_v17  ;;  %vm2503_vm15 = vweird.f32 %v2480_v17 }
 0x711   : > { %v4854_v53 = vpop.eup %4853  ;;  %vm2508_vm1 = vcmp.eq.f32.partialorder %v2507_v36, 8.507059e+37  ;;  %v2510_v8 = vor.u32 1.1754944e-38, %v2509_v55 }
 0x712   : > { %v2484_v24 = vmul.f32 %v4854_v53, %v2479_v58  ;;  %v4856_v33 = vpop.eup %4855  ;;  %vm2489_vm10 = vweird.f32 %v4854_v53  ;;  %v4602_v58 = vld [vmem:[%s6753_s1 + $0x240] sm:$0xff] }
 0x713   : > { %v2481_v38 = vadd.f32 1.0, %v4856_v33  ;;  %v4858_v43 = vpop.eup %4857  ;;  %vm2490_vm12 = vmor %vm2488_vm11, %vm2489_vm10 }
 0x714   : > { %v2485_v47 = vsub.f32 1.0, %v2484_v24  ;;  %v2482_v19 = vadd.f32 1.0, %v4858_v43  ;;  %v2637_v43 = vrot.slane %v6091_v30, 7 }
 0x715   : > { %4861 = vrcp.f32 %v2481_v38  ;;  %v4860_v44 = vpop.eup %4859  ;;  %v2522_v41 = vand.u32 2147483647, %v2481_v38  ;;  %v2524_v3 = vand.u32 2147483648, %v2481_v38  ;;  %vm2518_vm3 = vweird.f32 %v2481_v38 }
 0x716   : > { %v2486_v40 = vmul.f32 %v4854_v53, %v2485_v47  ;;  %v2499_v2 = vmul.f32 %v4860_v44, %v2480_v17  ;;  %4863 = vrcp.f32 %v2482_v19  ;;  %vm2504_vm14 = vweird.f32 %v4860_v44  ;;  %v4614_v17 = vld [vmem:[%s6753_s1 + $0x2a0] sm:$0xff] }
 0x717   : > { %vm2505_vm0 = vmor %vm2503_vm15, %vm2504_vm14  ;;  %vm2523_vm5 = vcmp.eq.f32.partialorder %v2522_v41, 8.507059e+37  ;;  %v2525_v21 = vor.u32 1.1754944e-38, %v2524_v3  ;;  %v2539_v62 = vand.u32 2147483648, %v2482_v19  ;;  %v2537_v20 = vand.u32 2147483647, %v2482_v19  ;;  %v6234_v3 = vld [vmem:[%s6754_s2 + $0x30] sm:$0xff] }
 0x718   : > { %v2487_v46 = vadd.f32 %v4854_v53, %v2486_v40  ;;  %v2500_v11 = vsub.f32 1.0, %v2499_v2  ;;  %vm2533_vm7 = vweird.f32 %v2482_v19 }
 0x719   : > { %v2540_v15 = vor.u32 1.1754944e-38, %v2539_v62  ;;  %vm2538_vm9 = vcmp.eq.f32.partialorder %v2537_v20, 8.507059e+37  ;;  %v4620_v20 = vld [vmem:[%s6753_s1 + $0x2d0] sm:$0xff] }
 0x71a   : > { %v2491_v23 = vsel %vm2490_vm12, %v4854_v53, %v2487_v46  ;;  %v2501_v27 = vmul.f32 %v4860_v44, %v2500_v11 }
 0x71b   : > { %v2496_v10 = vsel %vm2493_vm13, %v2495_v5, %v2491_v23  ;;  %v4862_v60 = vpop.eup %4861  ;;  %v4611_v23 = vld [vmem:[%s6753_s1 + $0x288] sm:$0xff] }
 0x71c   : > { %v6178_v34 = vmul.f32 %v2496_v10, %v6140_v57  ;;  %v2514_v37 = vmul.f32 %v4862_v60, %v2481_v38  ;;  %v2502_v39 = vadd.f32 %v4860_v44, %v2501_v27  ;;  %v4604_v57 = vld [vmem:[%s6753_s1 + $0x250] sm:$0xff]  ;;  %v4864_v48 = vpop.eup %4863  ;;  %vm2519_vm2 = vweird.f32 %v4862_v60  ;;  %v4610_v10 = vld [vmem:[%s6753_s1 + $0x280] sm:$0xff] }
 0x71d   : > { %v2529_v6 = vmul.f32 %v4864_v48, %v2482_v19  ;;  %2644 = vmatpush.bf16.msra.mxu0 %v4604_v57  ;;  %vm2520_vm4 = vmor %vm2518_vm3, %vm2519_vm2  ;;  %vm2534_vm6 = vweird.f32 %v4864_v48  ;;  %v4612_v19 = vld [vmem:[%s6753_s1 + $0x290] sm:$0xff] }
 0x71e   : > { %2551 = vst [vmem:[#allocation1] ss:$2 sm:$0xff] %v6178_v34  ;;  %v2515_v31 = vsub.f32 1.0, %v2514_v37  ;;  %v2506_v28 = vsel %vm2505_vm0, %v4860_v44, %v2502_v39  ;;  %vm2535_vm8 = vmor %vm2533_vm7, %vm2534_vm6  ;;  %v4613_v44 = vld [vmem:[%s6753_s1 + $0x298] sm:$0xff] }
 0x71f   : > { %v2511_v18 = vsel %vm2508_vm1, %v2510_v8, %v2506_v28  ;;  %v2530_v1 = vsub.f32 1.0, %v2529_v6  ;;  %v4625_v28 = vld [vmem:[%s6753_s1 + $0x2f8] sm:$0xff] }
 0x720   : > { %v2516_v29 = vmul.f32 %v4862_v60, %v2515_v31  ;;  %v6188_v14 = vmul.f32 %v2511_v18, %v6154_v52  ;;  %2859 = vmatpush.bf16.msrb.mxu2 %v4625_v28  ;;  %v4624_v18 = vld [vmem:[%s6753_s1 + $0x2f0] sm:$0xff] }
 0x721   : > { %v2531_v61 = vmul.f32 %v4864_v48, %v2530_v1  ;;  %2645 = vmatpush.bf16.msra.mxu0 %v4603_v56  ;;  %v4623_v1 = vld [vmem:[%s6753_s1 + $0x2e8] sm:$0xff] }
 0x722   : > { %v2517_v35 = vadd.f32 %v4862_v60, %v2516_v29  ;;  %2553 = vst [vmem:[#allocation1 + $0x1] ss:$2 sm:$0xff] %v6188_v14 }
 0x723   : > { %v2532_v16 = vadd.f32 %v4864_v48, %v2531_v61  ;;  %v4621_v61 = vld [vmem:[%s6753_s1 + $0x2d8] sm:$0xff] }
 0x724   : > { %v2521_v63 = vsel %vm2520_vm4, %v4862_v60, %v2517_v35  ;;  %2860 = vmatpush.bf16.msrb.mxu2 %v4624_v18 }
 0x725   : > { %v2526_v49 = vsel %vm2523_vm5, %v2525_v21, %v2521_v63  ;;  %v2536_v51 = vsel %vm2535_vm8, %v4864_v48, %v2532_v16  ;;  %2646 = vmatpush.bf16.msra.mxu0 %v4602_v58  ;;  %v4622_v21 = vld [vmem:[%s6753_s1 + $0x2e0] sm:$0xff]  ;;  %v4632_v16 = vld [vmem:[%s6753_s1 + $0x330] sm:$0xff] }
 0x726   : > { %v6195_v52 = vmul.f32 %v2526_v49, %v6158_v12  ;;  %v4616_v12 = vld [vmem:[%s6753_s1 + $0x2b0] sm:$0xff]  ;;  %v2541_v7 = vsel %vm2538_vm9, %v2540_v15, %v2536_v51  ;;  %v4633_v49 = vld [vmem:[%s6753_s1 + $0x338] sm:$0xff]  ;;  %v4631_v51 = vld [vmem:[%s6753_s1 + $0x328] sm:$0xff] }
 0x727   : > { %v6208_v45 = vmul.f32 %v2541_v7, %v6162_v26  ;;  %2739 = vmatpush.bf16.msra.mxu1 %v4616_v12  ;;  %2947 = vmatpush.bf16.msra.mxu3 %v4633_v49 }
 0x728   : > { %2555 = vst [vmem:[#allocation1 + $0x10] ss:$2 sm:$0xff] %v6195_v52  ;;  %2861 = vmatpush.bf16.msrb.mxu2 %v4623_v1 }
 0x729   : > { %2557 = vst [vmem:[#allocation1 + $0x11] ss:$2 sm:$0xff] %v6208_v45  ;;  %v2558_v9 = vld.sshfl [vmem:[#allocation1] sm:$0xff pattern:$0x75316420] }
 0x72b   : > { %2740 = vmatpush.bf16.msra.mxu1 %v4615_v13  ;;  %2948 = vmatpush.bf16.msra.mxu3 %v4632_v16  ;;  %v4618_v13 = vld [vmem:[%s6753_s1 + $0x2c0] sm:$0xff] }
 0x72c   : > { %2862 = vmatpush.bf16.msrb.mxu2 %v4622_v21  ;;  %v4682_v21 = vld [vmem:[%s6755_s3 + $0x184] sm:$0xf] }
 0x72f   : > { %2741 = vmatpush.bf16.msra.mxu1 %v4614_v17  ;;  %2949 = vmatpush.bf16.msra.mxu3 %v4631_v51 }
 0x730   : > { %v2559_v53 = vld.sshfl [vmem:[#allocation1 + $0x10] sm:$0xff pattern:$0x75316420]  ;;  %2863 = vmatpush.bf16.msrb.mxu2 %v4621_v61  ;;  %v4473_v61 = vld [vmem:[%s6755_s3 + $0x188] sm:$0xf] }
 0x731   : > { %v2562_v24 = vadd.f32 %v2559_v53, %v2558_v9  ;;  %v4630_v53 = vld [vmem:[%s6753_s1 + $0x320] sm:$0xff] }
 0x733   : > { %v2563_v33 = vrot.slane %v2562_v24, 4  ;;  %2742 = vmatpush.bf16.msra.mxu1 %v4613_v44  ;;  %2950 = vmatpush.bf16.msra.mxu3 %v4630_v53  ;;  %v4435_v53 = vld [vmem:[%s6755_s3 + $0x160] sm:$0xf0] }
 0x734   : > { %2864 = vmatpush.bf16.msrb.mxu2 %v4620_v20  ;;  %v4687_v20 = vld [vmem:[%s6755_s3 + $0x1a4] sm:$0xf0] }
 0x735   : > { %v2564_v26 = vadd.f32 %v2563_v33, %v2562_v24 }
 0x737   : > { %v2565_v47 = vrot.slane %v2564_v26, 2  ;;  %2743 = vmatpush.bf16.msra.mxu1 %v4612_v19  ;;  %v2873_v19 = vperm.slane %v6234_v3, 1 }
 0x738   : > { %2865 = vmatpush.bf16.msrb.mxu2 %v4619_v32  ;;  %v4683_v32 = vld [vmem:[%s6755_s3 + $0x18c] sm:$0xf] }
 0x739   : > { %v2566_v22 = vadd.f32 %v2565_v47, %v2564_v26 }
 0x73b   : > { %v2567_v25 = vrot.slane %v2566_v22, 1  ;;  %2744 = vmatpush.bf16.msra.mxu1 %v4611_v23 }
 0x73c   : > { %2866 = vmatpush.bf16.msrb.mxu2 %v4618_v13  ;;  %v4678_v13 = vld [vmem:[%s6755_s3 + $0x15c] sm:$0xf0] }
 0x73d   : > { %v2568_v38 = vadd.f32 %v2567_v25, %v2566_v22 }
 0x73f   : > { %v2569_v40 = vmul.f32 %v2568_v38, %v5989_v0  ;;  %2745 = vmatpush.bf16.msra.mxu1 %v4610_v10 }
 0x741   : > { %v2570_v59 = vpack.c.bf16 %v2569_v40, %v2569_v40 }
 0x743   : > { %2647 = vmatmul.bf16.vlgmr.msra.gmra.mxu0 %v2570_v59 }
 0x7c0   : > { %v2648_v46 = vpop.f32.mrf.mxu0 }
 0x7c1   : > { %v2649_v42 = vadd.f32 %v2648_v46, %v2637_v43 }
 0x7c3   : > { %v4123_v5 = vmul.f32 -1.442695, %v2649_v42 }
 0x7c5   : > { %4865 = vpow2.f32 %v4123_v5  ;;  %v4629_v5 = vld [vmem:[%s6753_s1 + $0x318] sm:$0xff] }
 0x7c6   : > { %2951 = vmatpush.bf16.msra.mxu3 %v4629_v5  ;;  %v4403_v5 = vld [vmem:[%s6755_s3 + $0x120] sm:$0xf0] }
 0x7c8   : > { %v2650_v2 = vpop.f32.mrf.mxu0 }
 0x7c9   : > { %v2876_v2 = vperm.slane %v6234_v3, 2 }
 0x7cb   : > { %v4866_v30 = vpop.eup %4865 }
 0x7cc   : > { %v2655_v11 = vadd.f32 1.0, %v4866_v30 }
 0x7ce   : > { %4867 = vrcp.f32 %v2655_v11  ;;  %v2667_v55 = vand.u32 2147483648, %v2655_v11  ;;  %v2665_v37 = vand.u32 2147483647, %v2655_v11  ;;  %vm2661_vm11 = vweird.f32 %v2655_v11 }
 0x7d0   : > { %v2668_v31 = vor.u32 1.1754944e-38, %v2667_v55  ;;  %vm2666_vm13 = vcmp.eq.f32.partialorder %v2665_v37, 8.507059e+37  ;;  %v4497_v37 = vld [vmem:[%s6755_s3 + $0x1c0] sm:$0xf] }
 0x7d4   : > { %v4868_v4 = vpop.eup %4867 }
 0x7d5   : > { %v2657_v60 = vmul.f32 %v4868_v4, %v2655_v11  ;;  %vm2662_vm10 = vweird.f32 %v4868_v4 }
 0x7d6   : > { %vm2663_vm12 = vmor %vm2661_vm11, %vm2662_vm10  ;;  %vm3537_vm10 = vcmask 1040384   ;;  %vm3539_vm11 = vcmask 1042434  }
 0x7d7   : > { %v2658_v36 = vsub.f32 1.0, %v2657_v60 }
 0x7d9   : > { %v2659_v27 = vmul.f32 %v4868_v4, %v2658_v36 }
 0x7db   : > { %v2660_v39 = vadd.f32 %v4868_v4, %v2659_v27  ;;  %v2961_v27 = vperm.slane %v6234_v3, 3 }
 0x7dd   : > { %v2664_v57 = vsel %vm2663_vm12, %v4868_v4, %v2660_v39  ;;  %v4694_v39 = vld [vmem:[%s6755_s3 + $0x1dc] sm:$0xf0]  ;;  %vm3541_vm12 = vcmask 1041408  }
 0x7de   : > { %v2669_v48 = vsel %vm2666_vm13, %v2668_v31, %v2664_v57  ;;  %v4690_v31 = vld [vmem:[%s6755_s3 + $0x1c4] sm:$0xf]  ;;  %v4498_v57 = vor.u32 %v4694_v39, %v4497_v37  ;;  %vm3543_vm13 = vcmask 1044484  }
 0x7df   : > { %v2671_v8 = vmul.f32 %v2669_v48, %v2649_v42  ;;  %v4695_v48 = vld [vmem:[%s6755_s3 + $0x1e4] sm:$0xf0]  ;;  %v4371_v37 = vld [vmem:[%s6755_s3 + $0xe0] sm:$0xf0] }
 0x7e0   : > { %3418 = vmatpush.bf16.msrb.mxu0 %v4498_v57  ;;  %v4663_v57 = vld [vmem:[%s6755_s3 + $0xe4] sm:$0xf0] }
 0x7e1   : > { %v2672_v41 = vpack.c.bf16 %v2671_v8, %v2671_v8  ;;  %v2964_v8 = vperm.slane %v6234_v3, 4 }
 0x7e3   : > { %2746 = vmatmul.bf16.vlgmr.msra.gmra.mxu1 %v2672_v41 }
 0x860   : > { %v2747_v29 = vpop.f32.mrf.mxu1 }
 0x861   : > { %v2748_v6 = vadd.f32 %v2747_v29, %v6234_v3  ;;  %v4691_v29 = vld [vmem:[%s6755_s3 + $0x1cc] sm:$0xf]  ;;  %v4465_v3 = vld [vmem:[%s6755_s3 + $0x180] sm:$0xf] }
 0x863   : > { %v4172_v35 = vmul.f32 -1.442695, %v2748_v6  ;;  %v4507_v6 = vld [vmem:[%s6755_s3 + $0x1e8] sm:$0xf0] }
 0x865   : > { %4869 = vpow2.f32 %v4172_v35  ;;  %v4510_v35 = vor.u32 %v4691_v29, %v4507_v6  ;;  %v4650_v29 = vld [vmem:[%s6755_s3 + $0x84] sm:$0xf] }
 0x868   : > { %v2749_v56 = vpop.f32.mrf.mxu1 }
 0x869   : > { %v4686_v56 = vld [vmem:[%s6755_s3 + $0x19c] sm:$0xf0] }
 0x86b   : > { %v4870_v62 = vpop.eup %4869 }
 0x86c   : > { %v2754_v63 = vadd.f32 1.0, %v4870_v62  ;;  %v4466_v62 = vor.u32 %v4686_v56, %v4465_v3  ;;  %v4655_v3 = vld [vmem:[%s6755_s3 + $0xa4] sm:$0xf0]  ;;  %v4651_v56 = vld [vmem:[%s6755_s3 + $0x8c] sm:$0xf] }
 0x86e   : > { %4871 = vrcp.f32 %v2754_v63  ;;  %v2766_v7 = vand.u32 2147483648, %v2754_v63  ;;  %v2764_v9 = vand.u32 2147483647, %v2754_v63  ;;  %vm2760_vm15 = vweird.f32 %v2754_v63  ;;  %3419 = vmatpush.bf16.msrb.mxu0 %v4466_v62 }
 0x870   : > { %v2767_v33 = vor.u32 1.1754944e-38, %v2766_v7  ;;  %vm2765_vm1 = vcmp.eq.f32.partialorder %v2764_v9, 8.507059e+37  ;;  %v4433_v7 = vld [vmem:[%s6755_s3 + $0x140] sm:$0xf]  ;;  %v4674_v9 = vld [vmem:[%s6755_s3 + $0x144] sm:$0xf] }
 0x874   : > { %v4872_v58 = vpop.eup %4871 }
 0x875   : > { %v2756_v15 = vmul.f32 %v4872_v58, %v2754_v63  ;;  %vm2761_vm14 = vweird.f32 %v4872_v58  ;;  %v4467_v63 = vld [vmem:[%s6755_s3 + $0x1a0] sm:$0xf0] }
 0x876   : > { %vm2762_vm0 = vmor %vm2760_vm15, %vm2761_vm14  ;;  %v4470_v16 = vor.u32 %v4682_v21, %v4467_v63  ;;  %v4347_v21 = vld [vmem:[%s6755_s3 + $0xa8] sm:$0xf0]  ;;  %vm3545_vm14 = vcmask 1046534   ;;  %vm3547_vm15 = vcmask 1045508  }
 0x877   : > { %v2757_v12 = vsub.f32 1.0, %v2756_v15  ;;  %v4475_v15 = vld [vmem:[%s6755_s3 + $0x1a8] sm:$0xf0]  ;;  %v4350_v63 = vor.u32 %v4651_v56, %v4347_v21  ;;  %v4489_v56 = vld [vmem:[%s6755_s3 + $0x198] sm:$0xf] }
 0x878   : > { %v4478_v51 = vor.u32 %v4683_v32, %v4475_v15 }
 0x879   : > { %v2758_v17 = vmul.f32 %v4872_v58, %v2757_v12 }
 0x87b   : > { %v2759_v24 = vadd.f32 %v4872_v58, %v2758_v17  ;;  %v4434_v17 = vor.u32 %v4678_v13, %v4433_v7  ;;  %v4307_v7 = vld [vmem:[%s6755_s3 + $0x60] sm:$0xf0]  ;;  %v4313_v13 = vld [vmem:[%s6755_s3 + $0x48] sm:$0xf] }
 0x87d   : > { %v2763_v26 = vsel %vm2762_vm0, %v4872_v58, %v2759_v24  ;;  %v4474_v58 = vor.u32 %v4687_v20, %v4473_v61  ;;  %v4441_v24 = vld [vmem:[%s6755_s3 + $0x148] sm:$0xf]  ;;  %3420 = vmatpush.bf16.msrb.mxu0 %v4434_v17  ;;  %v4305_v20 = vld [vmem:[%s6755_s3 + $0x40] sm:$0xf]  ;;  %vm3549_vm0 = vcmask 1043456  }
 0x87e   : > { %v2768_v47 = vsel %vm2765_vm1, %v2767_v33, %v2763_v26  ;;  %v4438_v33 = vor.u32 %v4674_v9, %v4435_v53  ;;  %v4679_v26 = vld [vmem:[%s6755_s3 + $0x164] sm:$0xf0] }
 0x87f   : > { %v2770_v22 = vperm.slane %v2768_v47, 0  ;;  %v4675_v47 = vld [vmem:[%s6755_s3 + $0x14c] sm:$0xf]  ;;  %v4647_v53 = vld [vmem:[%s6755_s3 + $0x64] sm:$0xf0] }
 0x881   : > { %v2772_v25 = vrot.slane %v2770_v22, 4  ;;  %v2774_v38 = vmul.f32 %v2770_v22, %v6178_v34  ;;  %v2776_v40 = vmul.f32 %v2770_v22, %v6195_v52  ;;  %v4628_v34 = vld [vmem:[%s6753_s1 + $0x310] sm:$0xff]  ;;  %v4626_v52 = vld [vmem:[%s6753_s1 + $0x300] sm:$0xff]  ;;  %v4443_v22 = vld [vmem:[%s6755_s3 + $0x168] sm:$0xf0] }
 0x882   : > { %2952 = vmatpush.bf16.msra.mxu3 %v4628_v34  ;;  %v4409_v34 = vld [vmem:[%s6755_s3 + $0x108] sm:$0xf] }
 0x883   : > { %v2775_v59 = vmul.f32 %v2772_v25, %v6188_v14  ;;  %v2777_v43 = vmul.f32 %v2772_v25, %v6208_v45  ;;  %2782 = vst [vmem:[#allocation1] ss:$2 sm:$0xff] %v2774_v38  ;;  %v4627_v14 = vld [vmem:[%s6753_s1 + $0x308] sm:$0xff]  ;;  %v4442_v38 = vor.u32 %v4679_v26, %v4441_v24 }
 0x884   : > { %2786 = vst [vmem:[#allocation1 + $0x10] ss:$2 sm:$0xff] %v2776_v40  ;;  %v4446_v40 = vor.u32 %v4675_v47, %v4443_v22  ;;  %v4643_v24 = vld [vmem:[%s6755_s3 + $0x4c] sm:$0xf]  ;;  %v4314_v22 = vor.u32 %v4647_v53, %v4313_v13  ;;  %v4451_v53 = vld [vmem:[%s6755_s3 + $0x170] sm:$0xf0] }
 0x885   : > { %2784 = vst [vmem:[#allocation1 + $0x1] ss:$2 sm:$0xff] %v2775_v59 }
 0x886   : > { %2788 = vst [vmem:[#allocation1 + $0x11] ss:$2 sm:$0xff] %v2777_v43  ;;  %2953 = vmatpush.bf16.msra.mxu3 %v4627_v14  ;;  %v4401_v43 = vld [vmem:[%s6755_s3 + $0x100] sm:$0xf]  ;;  %v4671_v14 = vld [vmem:[%s6755_s3 + $0x124] sm:$0xf0] }
 0x88a   : > { %2954 = vmatpush.bf16.msra.mxu3 %v4626_v52 }
 0x88c   : > { %v2789_v46 = vld.sshfl [vmem:[#allocation1] sm:$0xff pattern:$0x75316420] }
 0x88d   : > { %v2790_v42 = vld.sshfl [vmem:[#allocation1 + $0x10] sm:$0xff pattern:$0x75316420] }
 0x88e   : > { %v2793_v44 = vpack.c.bf16 %v2790_v42, %v2789_v46  ;;  %3457 = vmatpush.bf16.msrb.mxu3 %v4510_v35  ;;  %v4670_v46 = vld [vmem:[%s6755_s3 + $0x11c] sm:$0xf0]  ;;  %v4666_v42 = vld [vmem:[%s6755_s3 + $0x104] sm:$0xf]  ;;  %v4345_v35 = vld [vmem:[%s6755_s3 + $0x88] sm:$0xf] }
 0x88f   : > { %v4346_v62 = vor.u32 %v4655_v3, %v4345_v35  ;;  %v4483_v3 = vld [vmem:[%s6755_s3 + $0x1b0] sm:$0xf0] }
 0x890   : > { %2867 = vmatmul.bf16.vlgmr.msrb.gmra.mxu2 %v2793_v44  ;;  %v4402_v44 = vor.u32 %v4670_v46, %v4401_v43 }
 0x892   : > { %3458 = vmatpush.bf16.msrb.mxu3 %v4478_v51  ;;  %3421 = vmatpush.bf16.msrb.mxu0 %v4402_v44  ;;  %v4275_v44 = vld [vmem:[%s6755_s3 + $0x20] sm:$0xf0] }
 0x896   : > { %3459 = vmatpush.bf16.msrb.mxu3 %v4446_v40  ;;  %v4638_v40 = vld [vmem:[%s6755_s3 + $0x1c] sm:$0xf0] }
 0x913   : > { %v2868_v45 = vpop.f32.mrf.mxu2 }
 0x914   : > { %v2874_v23 = vmul.f32 %v2873_v19, %v2868_v45  ;;  %v4406_v45 = vor.u32 %v4666_v42, %v4403_v5  ;;  %v4634_v42 = vld [vmem:[%s6755_s3 + $0x4] sm:$0xf] }
 0x916   : > { %v2877_v10 = vadd.f32 %v2876_v2, %v2874_v23  ;;  %v4667_v23 = vld [vmem:[%s6755_s3 + $0x10c] sm:$0xf] }
 0x918   : > { %v2879_v60 = vadd.f32 %v2877_v10, %v6065_v54  ;;  %v4499_v54 = vld [vmem:[%s6755_s3 + $0x1e0] sm:$0xf0] }
 0x919   : > { %v4502_v41 = vor.u32 %v4690_v31, %v4499_v54  ;;  %v4377_v31 = vld [vmem:[%s6755_s3 + $0xc8] sm:$0xf]  ;;  %v4659_v54 = vld [vmem:[%s6755_s3 + $0xcc] sm:$0xf] }
 0x91b   : > { %v2870_v30 = vpop.f32.mrf.mxu2  ;;  %3431 = vmatpush.bf16.msrb.mxu1 %v4502_v41  ;;  %v4337_v41 = vld [vmem:[%s6755_s3 + $0x80] sm:$0xf] }
 0x91c   : > { %v2875_v11 = vmul.f32 %v2873_v19, %v2870_v30  ;;  %v4410_v19 = vor.u32 %v4671_v14, %v4409_v34  ;;  %v4278_v34 = vor.u32 %v4634_v42, %v4275_v44  ;;  %v4281_v14 = vld [vmem:[%s6755_s3 + $0x8] sm:$0xf] }
 0x91e   : > { %v2878_v4 = vadd.f32 %v2876_v2, %v2875_v11  ;;  %v4411_v2 = vld [vmem:[%s6755_s3 + $0x128] sm:$0xf0] }
 0x91f   : > { %3432 = vmatpush.bf16.msrb.mxu1 %v4470_v16  ;;  %v4414_v30 = vor.u32 %v4667_v23, %v4411_v2  ;;  %v4646_v16 = vld [vmem:[%s6755_s3 + $0x5c] sm:$0xf0]  ;;  %v4283_v2 = vld [vmem:[%s6755_s3 + $0x28] sm:$0xf0] }
 0x920   : > { %v2880_v36 = vadd.f32 %v2878_v4, %v6067_v50  ;;  %v4505_v50 = vld [vmem:[%s6755_s3 + $0x1c8] sm:$0xf]  ;;  %v4369_v4 = vld [vmem:[%s6755_s3 + $0xc0] sm:$0xf] }
 0x921   : > { %v4506_v28 = vor.u32 %v4695_v48, %v4505_v50  ;;  %3460 = vmatpush.bf16.msrb.mxu3 %v4414_v30  ;;  %v4379_v50 = vld [vmem:[%s6755_s3 + $0xe8] sm:$0xf0]  ;;  %v4378_v48 = vor.u32 %v4663_v57, %v4377_v31  ;;  %v4513_v30 = vld [vmem:[%s6755_s3 + $0x1d0] sm:$0xf]  ;;  %v4697_v57 = vld [vmem:[%s6755_s3 + $0x1f4] sm:$0xf0] }
 0x922   : > { %v2881_v55 = vpack.c.bf16 %v2880_v36, %v2879_v60  ;;  %v4662_v60 = vld [vmem:[%s6755_s3 + $0xdc] sm:$0xf0] }
 0x923   : > { %3444 = vmatpush.bf16.msra.mxu2 %v4506_v28  ;;  %3433 = vmatpush.bf16.msrb.mxu1 %v4438_v33  ;;  %v4654_v28 = vld [vmem:[%s6755_s3 + $0x9c] sm:$0xf0]  ;;  %v4315_v33 = vld [vmem:[%s6755_s3 + $0x68] sm:$0xf0] }
 0x924   : > { %2955 = vmatmul.bf16.vlgmr.msra.gmra.mxu3 %v2881_v55  ;;  %v4370_v55 = vor.u32 %v4662_v60, %v4369_v4  ;;  %v4338_v6 = vor.u32 %v4654_v28, %v4337_v41  ;;  %v4481_v41 = vld [vmem:[%s6755_s3 + $0x190] sm:$0xf] }
 0x925   : > { %v4688_v28 = vld [vmem:[%s6755_s3 + $0x1ac] sm:$0xf0] }
 0x926   : > { %3422 = vmatpush.bf16.msrb.mxu0 %v4370_v55  ;;  %v4692_v55 = vld [vmem:[%s6755_s3 + $0x1d4] sm:$0xf] }
 0x927   : > { %3445 = vmatpush.bf16.msra.mxu2 %v4474_v58  ;;  %3434 = vmatpush.bf16.msrb.mxu1 %v4406_v45  ;;  %v4642_v58 = vld [vmem:[%s6755_s3 + $0x44] sm:$0xf]  ;;  %v4639_v45 = vld [vmem:[%s6755_s3 + $0x24] sm:$0xf0] }
 0x928   : > { %v4310_v9 = vor.u32 %v4642_v58, %v4307_v7  ;;  %v4282_v23 = vor.u32 %v4639_v45, %v4281_v14  ;;  %v4673_v14 = vld [vmem:[%s6755_s3 + $0x134] sm:$0xf0] }
 0x92a   : > { %3423 = vmatpush.bf16.msrb.mxu0 %v4338_v6  ;;  %v4355_v6 = vld [vmem:[%s6755_s3 + $0xb0] sm:$0xf0] }
 0x92b   : > { %3446 = vmatpush.bf16.msra.mxu2 %v4442_v38  ;;  %v4273_v38 = vld [vmem:[%s6755_s3] sm:$0xf] }
 0x92c   : > { %v4274_v46 = vor.u32 %v4638_v40, %v4273_v38  ;;  %v4417_v40 = vld [vmem:[%s6755_s3 + $0x110] sm:$0xf] }
 0x92f   : > { %3447 = vmatpush.bf16.msra.mxu2 %v4410_v19  ;;  %v4635_v19 = vld [vmem:[%s6755_s3 + $0xc] sm:$0xf] }
 0x930   : > { %v4286_v4 = vor.u32 %v4635_v19, %v4283_v2  ;;  %v4427_v19 = vld [vmem:[%s6755_s3 + $0x138] sm:$0xf0] }
 0x933   : > { %3448 = vmatpush.bf16.msra.mxu2 %v4378_v48 }
 0x937   : > { %3449 = vmatpush.bf16.msra.mxu2 %v4346_v62 }
 0x93b   : > { %3450 = vmatpush.bf16.msra.mxu2 %v4314_v22  ;;  %v4459_v22 = vld [vmem:[%s6755_s3 + $0x178] sm:$0xf0] }
 0x93f   : > { %3451 = vmatpush.bf16.msra.mxu2 %v4282_v23 }
 0x9a7   : > { %v2956_v18 = vpop.f32.mrf.mxu3 }
 0x9a8   : > { %v2962_v1 = vmul.f32 %v2961_v27, %v2956_v18  ;;  %v4339_v18 = vld [vmem:[%s6755_s3 + $0xa0] sm:$0xf0] }
 0x9aa   : > { %v6337_v49 = vadd.f32 %v2964_v8, %v2962_v1  ;;  %v4342_v1 = vor.u32 %v4650_v29, %v4339_v18  ;;  %v4684_v29 = vld [vmem:[%s6755_s3 + $0x194] sm:$0xf] }
 0x9ac   : > { %v4269_v12 = vmul.f32 -1.442695, %v6337_v49 }
 0x9ae   : > { %4873 = vpow2.f32 %v4269_v12  ;;  %v4306_v12 = vor.u32 %v4646_v16, %v4305_v20  ;;  %v4689_v20 = vld [vmem:[%s6755_s3 + $0x1b4] sm:$0xf0]  ;;  %v4685_v16 = vld [vmem:[%s6755_s3 + $0x19c] sm:$0xf] }
 0x9af   : > { %v2958_v25 = vpop.f32.mrf.mxu3  ;;  %v4490_v58 = vor.u32 %v4689_v20, %v4489_v56  ;;  %v4653_v56 = vld [vmem:[%s6755_s3 + $0x9c] sm:$0xf]  ;;  %v4648_v20 = vld [vmem:[%s6755_s3 + $0x6c] sm:$0xf0] }
 0x9b0   : > { %v2963_v59 = vmul.f32 %v2961_v27, %v2958_v25  ;;  %v4658_v27 = vld [vmem:[%s6755_s3 + $0xc4] sm:$0xf]  ;;  %3424 = vmatpush.bf16.msrb.mxu0 %v4306_v12  ;;  %v4318_v25 = vor.u32 %v4643_v24, %v4315_v33  ;;  %v4680_v12 = vld [vmem:[%s6755_s3 + $0x16c] sm:$0xf0]  ;;  %v4457_v24 = vld [vmem:[%s6755_s3 + $0x158] sm:$0xf] }
 0x9b1   : > { %v4374_v39 = vor.u32 %v4658_v27, %v4371_v37  ;;  %v4515_v27 = vld [vmem:[%s6755_s3 + $0x1f0] sm:$0xf0]  ;;  %v4521_v37 = vld [vmem:[%s6755_s3 + $0x1d8] sm:$0xf] }
 0x9b2   : > { %v6388_v52 = vadd.f32 %v2964_v8, %v2963_v59  ;;  %v4382_v8 = vor.u32 %v4659_v54, %v4379_v50  ;;  %v4518_v31 = vor.u32 %v4692_v55, %v4515_v27  ;;  %v4693_v54 = vld [vmem:[%s6755_s3 + $0x1dc] sm:$0xf]  ;;  %v4664_v55 = vld [vmem:[%s6755_s3 + $0xec] sm:$0xf0]  ;;  %v4660_v27 = vld [vmem:[%s6755_s3 + $0xd4] sm:$0xf] }
 0x9b3   : > { %3435 = vmatpush.bf16.msrb.mxu1 %v4374_v39  ;;  %v4523_v50 = vld [vmem:[%s6755_s3 + $0x1f8] sm:$0xf0] }
 0x9b4   : > { %v4874_v10 = vpop.eup %4873  ;;  %v4270_v11 = vmul.f32 -1.442695, %v6388_v52  ;;  %3461 = vmatpush.bf16.msrb.mxu3 %v4382_v8  ;;  %3425 = vmatpush.bf16.msrb.mxu0 %v4274_v46  ;;  %v4526_v35 = vor.u32 %v4693_v54, %v4523_v50  ;;  %v4668_v46 = vld [vmem:[%s6755_s3 + $0x114] sm:$0xf]  ;;  %v4395_v54 = vld [vmem:[%s6755_s3 + $0xf8] sm:$0xf0] }
 0x9b5   : > { %v6403_v36 = vadd.f32 1.0, %v4874_v10  ;;  %v4696_v10 = vld [vmem:[%s6755_s3 + $0x1ec] sm:$0xf0] }
 0x9b6   : > { %4875 = vpow2.f32 %v4270_v11  ;;  %v4514_v60 = vor.u32 %v4696_v10, %v4513_v30  ;;  %v4385_v10 = vld [vmem:[%s6755_s3 + $0xd0] sm:$0xf] }
 0x9b7   : > { %4877 = vrcp.f32 %v6403_v36  ;;  %3436 = vmatpush.bf16.msrb.mxu1 %v4342_v1  ;;  %v2986_v15 = vand.u32 2147483648, %v6403_v36  ;;  %v2984_v26 = vand.u32 2147483647, %v6403_v36  ;;  %vm2980_vm4 = vweird.f32 %v6403_v36 }
 0x9b8   : > { %3462 = vmatpush.bf16.msrb.mxu3 %v4350_v63  ;;  %3470 = vmatpush.bf16.msra.mxu0 %v4514_v60  ;;  %v4482_v1 = vor.u32 %v4688_v28, %v4481_v41  ;;  %v4386_v50 = vor.u32 %v4664_v55, %v4385_v10 }
 0x9b9   : > { %v6487_v59 = vor.u32 1.1754944e-38, %v2986_v15  ;;  %vm6516_vm3 = vcmp.eq.f32.partialorder %v2984_v26, 8.507059e+37  ;;  %v4491_v15 = vld [vmem:[%s6755_s3 + $0x1b8] sm:$0xf0] }
 0x9bb   : > { %3437 = vmatpush.bf16.msrb.mxu1 %v4310_v9  ;;  %v4676_v9 = vld [vmem:[%s6755_s3 + $0x154] sm:$0xf] }
 0x9bc   : > { %v4876_v61 = vpop.eup %4875  ;;  %3463 = vmatpush.bf16.msrb.mxu3 %v4318_v25  ;;  %3471 = vmatpush.bf16.msra.mxu0 %v4482_v1  ;;  %v4454_v26 = vor.u32 %v4676_v9, %v4451_v53  ;;  %v4657_v1 = vld [vmem:[%s6755_s3 + $0xb4] sm:$0xf0]  ;;  %v4645_v9 = vld [vmem:[%s6755_s3 + $0x5c] sm:$0xf] }
 0x9bd   : > { %v6457_v32 = vpop.eup %4877  ;;  %v6460_v51 = vadd.f32 1.0, %v4876_v61  ;;  %v4486_v61 = vor.u32 %v4684_v29, %v4483_v3  ;;  %v4652_v29 = vld [vmem:[%s6755_s3 + $0x94] sm:$0xf]  ;;  %v4331_v53 = vld [vmem:[%s6755_s3 + $0x78] sm:$0xf0] }
 0x9be   : > { %v2976_v17 = vmul.f32 %v6457_v32, %v6403_v36  ;;  %vm2981_vm2 = vweird.f32 %v6457_v32  ;;  %v4522_v36 = vor.u32 %v4697_v57, %v4521_v37  ;;  %v4387_v37 = vld [vmem:[%s6755_s3 + $0xf0] sm:$0xf0]  ;;  %v4661_v57 = vld [vmem:[%s6755_s3 + $0xdc] sm:$0xf] }
 0x9bf   : > { %4879 = vrcp.f32 %v6460_v51  ;;  %v3001_v43 = vand.u32 2147483648, %v6460_v51  ;;  %3438 = vmatpush.bf16.msrb.mxu1 %v4278_v34  ;;  %vm6556_vm6 = vmor %vm2980_vm4, %vm2981_vm2  ;;  %vm2995_vm7 = vweird.f32 %v6460_v51  ;;  %v2999_v18 = vand.u32 2147483647, %v6460_v51  ;;  %v4425_v34 = vld [vmem:[%s6755_s3 + $0x118] sm:$0xf] }
 0x9c0   : > { %v2977_v47 = vsub.f32 1.0, %v2976_v17  ;;  %3464 = vmatpush.bf16.msrb.mxu3 %v4286_v4  ;;  %3496 = vmatpush.bf16.msrb.mxu2 %v4522_v36  ;;  %v4494_v17 = vor.u32 %v4685_v16, %v4491_v15  ;;  %v4426_v60 = vor.u32 %v4673_v14, %v4425_v34  ;;  %v4656_v36 = vld [vmem:[%s6755_s3 + $0xac] sm:$0xf0]  ;;  %v4644_v15 = vld [vmem:[%s6755_s3 + $0x54] sm:$0xf] }
 0x9c1   : > { %v3002_v63 = vor.u32 1.1754944e-38, %v3001_v43  ;;  %v4672_v43 = vld [vmem:[%s6755_s3 + $0x12c] sm:$0xf0]  ;;  %vm3000_vm9 = vcmp.eq.f32.partialorder %v2999_v18, 8.507059e+37  ;;  %v4398_v18 = vor.u32 %v4661_v57, %v4395_v54  ;;  %v4637_v34 = vld [vmem:[%s6755_s3 + $0x1c] sm:$0xf] }
 0x9c2   : > { %v2978_v5 = vmul.f32 %v6457_v32, %v2977_v47  ;;  %v4677_v47 = vld [vmem:[%s6755_s3 + $0x15c] sm:$0xf]  ;;  %v4418_v2 = vor.u32 %v4672_v43, %v4417_v40  ;;  %v4334_v40 = vor.u32 %v4645_v9, %v4331_v53 }
 0x9c3   : > { %3483 = vmatpush.bf16.msra.mxu1 %v4518_v31  ;;  %v4462_v44 = vor.u32 %v4677_v47, %v4459_v22  ;;  %v4299_v14 = vld [vmem:[%s6755_s3 + $0x38] sm:$0xf0] }
 0x9c4   : > { %v2979_v48 = vadd.f32 %v6457_v32, %v2978_v5  ;;  %3509 = vmatpush.bf16.msra.mxu3 %v4526_v35  ;;  %3497 = vmatpush.bf16.msrb.mxu2 %v4490_v58  ;;  %v4419_v5 = vld [vmem:[%s6755_s3 + $0x130] sm:$0xf0]  ;;  %v4361_v35 = vld [vmem:[%s6755_s3 + $0x98] sm:$0xf] }
 0x9c5   : > { %v6529_v39 = vpop.eup %4879  ;;  %v4422_v30 = vor.u32 %v4668_v46, %v4419_v5  ;;  %v4362_v58 = vor.u32 %v4657_v1, %v4361_v35  ;;  %v4297_v46 = vld [vmem:[%s6755_s3 + $0x18] sm:$0xf] }
 0x9c6   : > { %v2991_v8 = vmul.f32 %v6529_v39, %v6460_v51  ;;  %vm2996_vm5 = vweird.f32 %v6529_v39  ;;  %v4449_v51 = vld [vmem:[%s6755_s3 + $0x150] sm:$0xf]  ;;  %v2983_v7 = vsel %vm6556_vm6, %v6457_v32, %v2979_v48  ;;  %v4681_v32 = vld [vmem:[%s6755_s3 + $0x174] sm:$0xf0]  ;;  %v4390_v48 = vor.u32 %v4660_v27, %v4387_v37 }
 0x9c7   : > { %vm6570_vm8 = vmor %vm2995_vm7, %vm2996_vm5  ;;  %3484 = vmatpush.bf16.msra.mxu1 %v4486_v61  ;;  %v4450_v33 = vor.u32 %v4680_v12, %v4449_v51  ;;  %v4458_v38 = vor.u32 %v4681_v32, %v4457_v24  ;;  %v2988_v42 = vsel %vm6516_vm3, %v6487_v59, %v2983_v7  ;;  %v4669_v59 = vld [vmem:[%s6755_s3 + $0x11c] sm:$0xf]  ;;  %v4321_v61 = vld [vmem:[%s6755_s3 + $0x50] sm:$0xf] }
 0x9c8   : > { %v2992_v21 = vsub.f32 1.0, %v2991_v8  ;;  %3510 = vmatpush.bf16.msra.mxu3 %v4494_v17  ;;  %v3005_v11 = vmul.f32 %v2988_v42, %v6337_v49  ;;  %v4393_v49 = vld [vmem:[%s6755_s3 + $0xd8] sm:$0xf]  ;;  %v4353_v8 = vld [vmem:[%s6755_s3 + $0x90] sm:$0xf]  ;;  %v4322_v24 = vor.u32 %v4648_v20, %v4321_v61 }
 0x9c9   : > { %3472 = vmatpush.bf16.msra.mxu0 %v4450_v33  ;;  %3498 = vmatpush.bf16.msrb.mxu2 %v4458_v38  ;;  %v4354_v62 = vor.u32 %v4656_v36, %v4353_v8  ;;  %v4323_v51 = vld [vmem:[%s6755_s3 + $0x70] sm:$0xf0]  ;;  %v4329_v7 = vld [vmem:[%s6755_s3 + $0x58] sm:$0xf]  ;;  %v4640_v32 = vld [vmem:[%s6755_s3 + $0x2c] sm:$0xf0] }
 0x9ca   : > { %v2993_v13 = vmul.f32 %v6529_v39, %v2992_v21  ;;  %v4363_v21 = vld [vmem:[%s6755_s3 + $0xb8] sm:$0xf0]  ;;  %v4326_v33 = vor.u32 %v4644_v15, %v4323_v51  ;;  %v4291_v38 = vld [vmem:[%s6755_s3 + $0x30] sm:$0xf0]  ;;  %v4641_v5 = vld [vmem:[%s6755_s3 + $0x34] sm:$0xf0] }
 0x9cb   : > { %3485 = vmatpush.bf16.msra.mxu1 %v4454_v26  ;;  %v4366_v12 = vor.u32 %v4653_v56, %v4363_v21  ;;  %v4289_v26 = vld [vmem:[%s6755_s3 + $0x10] sm:$0xf] }
 0x9cc   : > { %v2994_v25 = vadd.f32 %v6529_v39, %v2993_v13  ;;  %3511 = vmatpush.bf16.msra.mxu3 %v4462_v44  ;;  %v4649_v13 = vld [vmem:[%s6755_s3 + $0x74] sm:$0xf0]  ;;  %v4290_v42 = vor.u32 %v4640_v32, %v4289_v26 }
 0x9cd   : > { %3473 = vmatpush.bf16.msra.mxu0 %v4418_v2  ;;  %3499 = vmatpush.bf16.msrb.mxu2 %v4426_v60  ;;  %v4330_v22 = vor.u32 %v4649_v13, %v4329_v7  ;;  %v3080_v60 = vld [vmem:[%s6756_s4] sm:$0xff] }
 0x9ce   : > { %v2998_v45 = vsel %vm6570_vm8, %v6529_v39, %v2994_v25  ;;  %v4430_v39 = vor.u32 %v4669_v59, %v4427_v19  ;;  %v4636_v25 = vld [vmem:[%s6755_s3 + $0x14] sm:$0xf]  ;;  %v4298_v19 = vor.u32 %v4641_v5, %v4297_v46  ;;  %v3404_v55 = vperm.slane %v3080_v60, 2 }
 0x9cf   : > { %v3003_v23 = vsel %vm3000_vm9, %v3002_v63, %v2998_v45  ;;  %3486 = vmatpush.bf16.msra.mxu1 %v4422_v30  ;;  %v4358_v63 = vor.u32 %v4652_v29, %v4355_v6  ;;  %v4294_v44 = vor.u32 %v4636_v25, %v4291_v38  ;;  %v3405_v27 = vperm.slane %v3080_v60, 3 }
 0x9d0   : > { %v3006_v4 = vmul.f32 %v3003_v23, %v6388_v52  ;;  %v4665_v52 = vld [vmem:[%s6755_s3 + $0xf4] sm:$0xf0]  ;;  %3512 = vmatpush.bf16.msra.mxu3 %v4430_v39  ;;  %v4302_v23 = vor.u32 %v4637_v34, %v4299_v14  ;;  %v3403_v37 = vperm.slane %v3080_v60, 1  ;;  %v3407_v57 = vperm.slane %v3080_v60, 5 }
 0x9d1   : > { %v4394_v28 = vor.u32 %v4665_v52, %v4393_v49  ;;  %3474 = vmatpush.bf16.msra.mxu0 %v4386_v50  ;;  %v3406_v52 = vperm.slane %v3080_v60, 4  ;;  %v3409_v29 = vperm.slane %v3080_v60, 7  ;;  %v3402_v6 = vperm.slane %v3080_v60, 0 }
 0x9d2   : > { %v3007_v31 = vadd.f32 %v3006_v4, %v3005_v11 }
 0x9d3   : > { %3487 = vmatpush.bf16.msra.mxu1 %v4390_v48  ;;  %3500 = vmatpush.bf16.msrb.mxu2 %v4394_v28  ;;  %v3408_v28 = vperm.slane %v3080_v60, 6 }
 0x9d4   : > { %v3008_v41 = vrot.slane %v3007_v31, 4  ;;  %3513 = vmatpush.bf16.msra.mxu3 %v4398_v18 }
 0x9d5   : > { %3475 = vmatpush.bf16.msra.mxu0 %v4354_v62 }
 0x9d6   : > { %v3009_v3 = vadd.f32 %v3008_v41, %v3007_v31 }
 0x9d7   : > { %3488 = vmatpush.bf16.msra.mxu1 %v4358_v63  ;;  %3501 = vmatpush.bf16.msrb.mxu2 %v4362_v58 }
 0x9d8   : > { %v3010_v16 = vrot.slane %v3009_v3, 2  ;;  %3514 = vmatpush.bf16.msra.mxu3 %v4366_v12 }
 0x9d9   : > { %3476 = vmatpush.bf16.msra.mxu0 %v4322_v24 }
 0x9da   : > { %v3011_v17 = vadd.f32 %v3010_v16, %v3009_v3 }
 0x9db   : > { %3489 = vmatpush.bf16.msra.mxu1 %v4326_v33  ;;  %3502 = vmatpush.bf16.msrb.mxu2 %v4330_v22 }
 0x9dc   : > { %v3012_v47 = vrot.slane %v3011_v17, 1  ;;  %3515 = vmatpush.bf16.msra.mxu3 %v4334_v40 }
 0x9dd   : > { %3477 = vmatpush.bf16.msra.mxu0 %v4290_v42 }
 0x9de   : > { %v3013_v43 = vadd.f32 %v3012_v47, %v3011_v17 }
 0x9df   : > { %3490 = vmatpush.bf16.msra.mxu1 %v4294_v44  ;;  %3503 = vmatpush.bf16.msrb.mxu2 %v4298_v19 }
 0x9e0   : > { %v3014_v45 = vmul.f32 %v3013_v43, %v5989_v0  ;;  %3516 = vmatpush.bf16.msra.mxu3 %v4302_v23 }
 0x9e2   : > { %v3015_v59 = vpack.c.bf16 %v3014_v45, %v3014_v45 }
 0x9e4   : > { %3426 = vmatmul.bf16.vlgmr.msrb.gmra.mxu0 %v3015_v59  ;;  %3439 = vmatmul.bf16.vlgmr.msrb.gmra.mxu1 %v3015_v59 }
 0x9e5   : > { %3452 = vmatmul.bf16.vlgmr.msra.gmra.mxu2 %v3015_v59  ;;  %3465 = vmatmul.bf16.vlgmr.msrb.gmra.mxu3 %v3015_v59 }
 0x9f4   : > { %3478 = vmatmul.bf16.vlgmr.msra.gmra.mxu0 %v3015_v59  ;;  %3491 = vmatmul.bf16.vlgmr.msra.gmra.mxu1 %v3015_v59 }
 0x9f5   : > { %3504 = vmatmul.bf16.vlgmr.msrb.gmra.mxu2 %v3015_v59  ;;  %3517 = vmatmul.bf16.vlgmr.msra.gmra.mxu3 %v3015_v59 }
 0xa61   : > { %v3427_v2 = vpop.f32.mrf.mxu0  ;;  %v3440_v30 = vpop.f32.mrf.mxu1 }
 0xa62   : > { %v3441_v8 = vadd.f32 %v3440_v30, %v3403_v37  ;;  %v3428_v58 = vadd.f32 %v3427_v2, %v3402_v6 }
 0xa64   : > { %v3530_v1 = vrot.slane %v3441_v8, 7 }
 0xa66   : > { %v3538_v7 = vsel %vm3537_vm10, %v3428_v58, %v3530_v1 }
 0xa68   : > { %v3453_v0 = vpop.f32.mrf.mxu2  ;;  %v3466_v10 = vpop.f32.mrf.mxu3 }
 0xa69   : > { %v3429_v11 = vpop.f32.mrf.mxu0  ;;  %v3442_v4 = vpop.f32.mrf.mxu1  ;;  %v3454_v50 = vadd.f32 %v3453_v0, %v3404_v55  ;;  %v3467_v48 = vadd.f32 %v3466_v10, %v3405_v27 }
 0xa6b   : > { %v3531_v18 = vrot.slane %v3454_v50, 6  ;;  %v3532_v35 = vrot.slane %v3467_v48, 5 }
 0xa6d   : > { %v3540_v15 = vsel %vm3539_vm11, %v3531_v18, %v3532_v35 }
 0xa6e   : > { %v3542_v9 = vsel %vm3541_vm12, %v3538_v7, %v3540_v15 }
 0xa70   : > { %v3455_v39 = vpop.f32.mrf.mxu2  ;;  %v3468_v49 = vpop.f32.mrf.mxu3 }
 0xa71   : > { %v3479_v31 = vpop.f32.mrf.mxu0  ;;  %v3492_v54 = vpop.f32.mrf.mxu1 }
 0xa72   : > { %v3480_v36 = vadd.f32 %v3479_v31, %v3406_v52  ;;  %v3493_v41 = vadd.f32 %v3492_v54, %v3407_v57 }
 0xa74   : > { %v3533_v21 = vrot.slane %v3480_v36, 4  ;;  %v3534_v62 = vrot.slane %v3493_v41, 3 }
 0xa76   : > { %v3544_v13 = vsel %vm3543_vm13, %v3533_v21, %v3534_v62 }
 0xa78   : > { %v3505_v3 = vpop.f32.mrf.mxu2  ;;  %v3518_v56 = vpop.f32.mrf.mxu3 }
 0xa79   : > { %v3506_v63 = vadd.f32 %v3505_v3, %v3408_v28  ;;  %v3519_v61 = vadd.f32 %v3518_v56, %v3409_v29  ;;  %v3481_v20 = vpop.f32.mrf.mxu0  ;;  %v3494_v16 = vpop.f32.mrf.mxu1 }
 0xa7b   : > { %v3535_v51 = vrot.slane %v3506_v63, 2  ;;  %v3536_v12 = vrot.slane %v3519_v61, 1 }
 0xa7d   : > { %v3546_v17 = vsel %vm3545_vm14, %v3535_v51, %v3536_v12 }
 0xa7e   : > { %v3548_v53 = vsel %vm3547_vm15, %v3544_v13, %v3546_v17 }
 0xa7f   : > { %v3550_v24 = vsel %vm3549_vm0, %v3542_v9, %v3548_v53 }
 0xa80   : > { %3552 = vst [vmem:[%s222_s26] sm:$0xff] %v3550_v24  ;;  %v3507_v33 = vpop.f32.mrf.mxu2  ;;  %v3520_v26 = vpop.f32.mrf.mxu3 }
 0xa81 PF: > { %s15_s18 = sadd.s32 1, %s4893_s18  }
 0xa82   : > { %p12_p4 = scmp.ge.s32.totalorder %s15_s18, 4  }
 0xa84   :  { %14 = sbr.rel (!%p12_p4) target bundleno = 1 (0x1), region = 118 }

</bundles_post_ra>
